<compile_context>
chip_gen: v7x
topology: tpu7x:2x2x1
jax: 0.10.0
libtpu: 0.0.40
codegen_flags: <defaults>
</compile_context>

<pallas_src>
import numpy as np
import jax
import jax.numpy as jnp
from jax.experimental import pallas as pl
from jax.experimental.pallas import tpu as pltpu

# ----------------------------------------------------------------------------
# Hyper-parameters (the PyTorch `args`)
# ----------------------------------------------------------------------------
NUM_CLASSES = 3
NUM_FEATURES = 32            # args.num_features (input_size)
DIM_CAPSULE = 16             # args.dim_capsule
FRAMERATE = 2                # args.framerate
CHUNK_SIZE_S = 8             # args.chunk_size
RECEPTIVE_FIELD_S = 4        # args.receptive_field
NUM_DETECTIONS = 5           # args.num_detections
FEATURE_MULTIPLIER = 1       # args.feature_multiplier
MULTIPLIER = 2 * FEATURE_MULTIPLIER   # backbone_player is None -> x2

CHUNK = CHUNK_SIZE_S * FRAMERATE      # 16 (chunk_size in frames)
RF = RECEPTIVE_FIELD_S * FRAMERATE    # 8  (receptive_field in frames)
PYR_KS = (int(np.ceil(RF / 7)), int(np.ceil(RF / 3)),
          int(np.ceil(RF / 2)), int(np.ceil(RF)))          # (2, 3, 4, 8)
PYR_OUT = (4 * MULTIPLIER, 8 * MULTIPLIER,
           16 * MULTIPLIER, 32 * MULTIPLIER)               # (8, 16, 32, 64)
PYR_MAX = PYR_KS[-1]                  # 8
PYR_TOP = (PYR_MAX - 1) // 2          # 3
KERNEL_SEG = 3
KERNEL_SPOT = 3
BN_EPS = 1e-3

C1_CH = 64 * MULTIPLIER               # 128
C2_CH = 16 * MULTIPLIER               # 32
PYR_CH = sum(PYR_OUT)                 # 120
CAT_CH = C2_CH + PYR_CH               # 152  (= conv_seg in_channels)
SEG_CH = DIM_CAPSULE * NUM_CLASSES    # 48
SPOT_CH = NUM_CLASSES * (DIM_CAPSULE + 1)   # 51
T_POOL1 = (CHUNK - 3) // 2 + 1        # 7
T_POOL2 = (T_POOL1 - 3) // 2 + 1      # 3
HEAD_IN = 16 * (CHUNK // 8 - 1)       # 16
HEAD_OUT = NUM_DETECTIONS * (2 + NUM_CLASSES)   # 25

SLAB_ROWS = 32                        # padded time rows (per element)
VALID_ROW0 = 8                        # valid chunk lives at rows 8..23 (aligned)


# ----------------------------------------------------------------------------
# The fused forward-pass kernel (BT batch elements per grid step)
# ----------------------------------------------------------------------------
def _forward_kernel(
    x_ref,
    w1, b1, w2, b2,
    wpyr, bpyr, wseg, bseg,
    bn_scale, bn_shift, seg_sel,
    big1, ws1, bs1, big2, ws2, bs2, pick3, wh, bh,
    seg_out, spot_out,
    slab, imcol,
):
    f32 = jnp.float32
    bt = slab.shape[0]
    m_rows = bt * CHUNK

    def mm(a, b_):
        return jnp.dot(a, b_, preferred_element_type=f32)

    # ---- conv_1 (dense over features) + conv_2 (1x1), stacked (batch*time) ----
    x = x_ref[...]                                            # (bt*16, 32)
    c1 = jnp.maximum(mm(x, w1[...]) + b1[...], 0.0)           # (bt*16, 128)
    c2 = jnp.maximum(mm(c1, w2[...]) + b2[...], 0.0)          # (bt*16, 32)
    c2_3d = c2.reshape(bt, CHUNK, C2_CH)

    # padded slab holding [c2 | p1 | p2 | p3 | p4] per element.  Only the
    # sublane-aligned pad-row tiles are zeroed; the 16-row interior at offset 8
    # is written once with full stores.
    slab[:, 0:VALID_ROW0, :] = jnp.zeros((bt, VALID_ROW0, CAT_CH), f32)
    slab[:, VALID_ROW0 + CHUNK:SLAB_ROWS, :] = jnp.zeros(
        (bt, SLAB_ROWS - VALID_ROW0 - CHUNK, CAT_CH), f32)
    slab[:, VALID_ROW0:VALID_ROW0 + CHUNK, 0:C2_CH] = c2_3d

    # ---- all four pyramid convs fused into ONE K=256 matmul (temporal im2col) ----
    base = VALID_ROW0 - PYR_TOP                               # 5
    for j in range(PYR_MAX):                                  # 8 shifted slots
        imcol[:, :, C2_CH * j:C2_CH * (j + 1)] = \
            slab[:, base + j:base + j + CHUNK, 0:C2_CH]
    pyr = jnp.maximum(
        mm(imcol[...].reshape(m_rows, PYR_MAX * C2_CH), wpyr[...]) + bpyr[...],
        0.0)                                                  # (bt*16, 120)
    slab[:, VALID_ROW0:VALID_ROW0 + CHUNK, C2_CH:CAT_CH] = \
        pyr.reshape(bt, CHUNK, PYR_CH)

    # ---- conv_seg (k=3, pad (1,1)) over the 152-wide concat: 3 matmuls ----
    seg = bseg[...]
    for dk in range(KERNEL_SEG):
        lo = VALID_ROW0 - 1 + dk
        seg = seg + mm(slab[:, lo:lo + CHUNK, :].reshape(m_rows, CAT_CH), wseg[dk])

    # segmentation head: eval-mode BN (per-time affine, BN channel == chunk idx)
    # + sigmoid + capsule length sqrt(sum_d (y-0.5)^2 * 4 / D)
    y = jax.nn.sigmoid(seg * bn_scale[...] + bn_shift[...])
    sq = (y - 0.5) * (y - 0.5)
    seg_len = jnp.sqrt(mm(sq, seg_sel[...]) * (4.0 / DIM_CAPSULE))   # (bt*16, 3)
    seg_out[...] = seg_len

    # ---- spotting path: relu(cat(conv_seg, 1-seg)) -> 3x (maxpool/conv) ----
    # Pool selection + zero-padded conv tap shifts are host-precomputed 0/1
    # matrices, so everything stays a stacked 2-D matmul.
    spot_cat = jnp.concatenate(
        [jnp.maximum(seg, 0.0), jnp.maximum(1.0 - seg_len, 0.0)], axis=-1)  # (bt*16, 51)

    def window_max(v):
        n = v.shape[0]
        return jnp.maximum(v[0:n - 2], jnp.maximum(v[1:n - 1], v[2:n]))

    n1 = bt * T_POOL1
    sh1 = mm(big1[...], window_max(spot_cat))                 # (3*bt*7, 51)
    s1 = (mm(sh1[0:n1], ws1[0]) + mm(sh1[n1:2 * n1], ws1[1])
          + mm(sh1[2 * n1:3 * n1], ws1[2]) + bs1[...])
    s1 = jnp.maximum(s1, 0.0)                                 # (bt*7, 32)

    n2 = bt * T_POOL2
    sh2 = mm(big2[...], window_max(s1))                       # (3*bt*3, 32)
    s2 = (mm(sh2[0:n2], ws2[0]) + mm(sh2[n2:2 * n2], ws2[1])
          + mm(sh2[2 * n2:3 * n2], ws2[2]) + bs2[...])
    s2 = jnp.maximum(s2, 0.0)                                 # (bt*3, 16)

    s2p = mm(pick3[...], window_max(s2))                      # (bt, 16)

    # merged conv_conf / conv_class 1x1 heads: one (bt,16)x(16,25) matmul
    spot_out[...] = mm(s2p, wh[...]) + bh[...]                # (bt, 25)


# ----------------------------------------------------------------------------
# Wrapper: single pallas_call + tiny JAX epilogue (sigmoid / softmax / reshape)
# ----------------------------------------------------------------------------
WEIGHT_NAMES = (
    "w1", "b1", "w2", "b2",
    "wpyr", "bpyr", "wseg", "bseg",
    "bn_scale", "bn_shift", "seg_sel",
    "big1", "ws1", "bs1", "big2", "ws2", "bs2", "pick3", "wh", "bh",
)


def context_aware_forward(params, inputs, batch_tile=8):
    """inputs: (B, 1, chunk, num_features) float32 (same layout as PyTorch).
    Returns (output_segmentation (B, chunk, num_classes),
             output_spotting     (B, num_detections, 2 + num_classes))."""
    B = inputs.shape[0]
    bt = batch_tile
    assert params["bn_scale"].shape[0] == bt * CHUNK, \
        "params were built for a different batch_tile"
    bp = ((B + bt - 1) // bt) * bt                       # pad batch to tile

    x = inputs[:, 0, :, :]                               # (B, T, F)
    if bp != B:
        x = jnp.concatenate(
            [x, jnp.zeros((bp - B, CHUNK, NUM_FEATURES), x.dtype)], axis=0)
    x2 = x.reshape(bp * CHUNK, NUM_FEATURES)             # row-dense stacked input

    weights = [params[n] for n in WEIGHT_NAMES]
    in_specs = [pl.BlockSpec((bt * CHUNK, NUM_FEATURES), lambda i: (i, 0))]
    for wgt in weights:
        in_specs.append(pl.BlockSpec(wgt.shape, lambda i, _n=wgt.ndim: (0,) * _n))

    out_shape = (
        jax.ShapeDtypeStruct((bp * CHUNK, NUM_CLASSES), jnp.float32),
        jax.ShapeDtypeStruct((bp, HEAD_OUT), jnp.float32),
    )
    out_specs = (
        pl.BlockSpec((bt * CHUNK, NUM_CLASSES), lambda i: (i, 0)),
        pl.BlockSpec((bt, HEAD_OUT), lambda i: (i, 0)),
    )
    scratch_shapes = [
        pltpu.VMEM((bt, SLAB_ROWS, CAT_CH), jnp.float32),        # padded [c2|pyr] slab
        pltpu.VMEM((bt, CHUNK, PYR_MAX * C2_CH), jnp.float32),   # pyramid im2col
    ]

    seg2d, spot_raw = pl.pallas_call(
        _forward_kernel,
        out_shape=out_shape,
        grid=(bp // bt,),
        in_specs=in_specs,
        out_specs=out_specs,
        scratch_shapes=scratch_shapes,
        compiler_params=pltpu.CompilerParams(dimension_semantics=("parallel",)),
    )(x2, *weights)

    # trivial epilogue in plain JAX (B x 25 elements) + drop batch padding
    seg = seg2d.reshape(bp, CHUNK, NUM_CLASSES)[:B]
    spot = spot_raw[:B]
    conf = jax.nn.sigmoid(
        spot[:, :NUM_DETECTIONS * 2].reshape(B, NUM_DETECTIONS, 2))
    cls = jax.nn.softmax(
        spot[:, NUM_DETECTIONS * 2:].reshape(B, NUM_DETECTIONS, NUM_CLASSES),
        axis=-1)
    return seg, jnp.concatenate([conf, cls], axis=-1)


# ----------------------------------------------------------------------------
# Deterministic, kernel-ready parameter initialization (host-side packing)
# ----------------------------------------------------------------------------
def _pool_tap_select(bt, t_in, t_pool):
    """0/1 matrix combining MaxPool2d((3,1),(2,1)) row selection with the
    3-tap, zero-padded temporal shift of the conv that follows it.  Applied to
    the stride-1 window-max of the stacked (bt*t_in, C) input."""
    n_win = bt * t_in - 2
    m = np.zeros((KERNEL_SPOT * bt * t_pool, n_win), np.float32)
    for dk in range(KERNEL_SPOT):
        for b in range(bt):
            for t in range(t_pool):
                u = t + dk - 1                      # pooled index read by tap dk
                if 0 <= u < t_pool:
                    m[(dk * bt + b) * t_pool + t, b * t_in + 2 * u] = 1.0
    return m


def init_params(key, batch_tile=8):
    def conv(k_, kern, cin, cout):
        kw, kb = jax.random.split(k_)
        bound = 1.0 / np.sqrt(cin * kern)
        w = jax.random.uniform(kw, (kern, cin, cout), jnp.float32, -bound, bound)
        b = jax.random.uniform(kb, (1, cout), jnp.float32, -bound, bound)
        return w, b

    keys = jax.random.split(key, 11)
    p = {}
    w1, p["b1"] = conv(keys[0], 1, NUM_FEATURES, C1_CH)       # conv_1 k=(1,input)
    p["w1"] = w1[0]
    w2, p["b2"] = conv(keys[1], 1, C1_CH, C2_CH)              # conv_2 1x1
    p["w2"] = w2[0]

    # pack the four pyramid convs into one (8*32, 120) weight; slots a smaller
    # kernel does not cover are zero, so a single im2col matmul reproduces the
    # four separately padded convolutions exactly.
    wpyr = np.zeros((PYR_MAX * C2_CH, PYR_CH), np.float32)
    bpyr = []
    col = 0
    for i, (kk, cout) in enumerate(zip(PYR_KS, PYR_OUT)):
        w, b = conv(keys[2 + i], kk, C2_CH, cout)
        w_np = np.asarray(w)
        top = (kk - 1) // 2
        for dk in range(kk):
            j = dk + PYR_TOP - top
            wpyr[j * C2_CH:(j + 1) * C2_CH, col:col + cout] = w_np[dk]
        bpyr.append(np.asarray(b))
        col += cout
    p["wpyr"] = jnp.asarray(wpyr)
    p["bpyr"] = jnp.asarray(np.concatenate(bpyr, axis=-1))    # (1, 120)

    p["wseg"], p["bseg"] = conv(keys[6], KERNEL_SEG, CAT_CH, SEG_CH)
    p["ws1"], p["bs1"] = conv(keys[7], KERNEL_SPOT, SPOT_CH, 32)
    p["ws2"], p["bs2"] = conv(keys[8], KERNEL_SPOT, 32, 16)

    wconf, bconf = conv(keys[9], 1, HEAD_IN, NUM_DETECTIONS * 2)
    wcls, bcls = conv(keys[10], 1, HEAD_IN, NUM_DETECTIONS * NUM_CLASSES)
    p["wh"] = jnp.concatenate([wconf[0], wcls[0]], axis=-1)   # (16, 25)
    p["bh"] = jnp.concatenate([bconf, bcls], axis=-1)         # (1, 25)

    # BatchNorm2d(num_features=chunk), eval mode, default running stats
    # -> per-time affine, pre-tiled to the (batch_tile*chunk, 1) stacked rows.
    gamma = np.ones((CHUNK,), np.float32)
    beta = np.zeros((CHUNK,), np.float32)
    r_mean = np.zeros((CHUNK,), np.float32)
    r_var = np.ones((CHUNK,), np.float32)
    scale = gamma / np.sqrt(r_var + BN_EPS)
    shift = beta - r_mean * scale
    p["bn_scale"] = jnp.asarray(np.tile(scale.reshape(CHUNK, 1), (batch_tile, 1)))
    p["bn_shift"] = jnp.asarray(np.tile(shift.reshape(CHUNK, 1), (batch_tile, 1)))

    # conv_seg channel c feeds class (c % num_classes) after the PyTorch
    # view(B, chunk, dim_capsule, num_classes) of the permuted conv output.
    c_idx = np.arange(SEG_CH)[:, None]
    k_idx = np.arange(NUM_CLASSES)[None, :]
    p["seg_sel"] = jnp.asarray((c_idx % NUM_CLASSES) == k_idx, jnp.float32)

    # host-precomputed pooling / conv-tap selection matrices (depend on batch_tile)
    p["big1"] = jnp.asarray(_pool_tap_select(batch_tile, CHUNK, T_POOL1))
    p["big2"] = jnp.asarray(_pool_tap_select(batch_tile, T_POOL1, T_POOL2))
    pick3 = np.zeros((batch_tile, batch_tile * T_POOL2 - 2), np.float32)
    for b in range(batch_tile):
        pick3[b, b * T_POOL2] = 1.0
    p["pick3"] = jnp.asarray(pick3)
    return p


# TODO(synk): checkpoint loading (torch.load in load_weights), training-mode
# behavior (batch-statistics BN, stochastic branch dropout) and the inactive
# 3DConv/Dense backbone branches have no Pallas equivalent here; parameters
# are synthetic and BN runs in eval mode.

if __name__ == "__main__":
    key = jax.random.PRNGKey(0)
    pkey, xkey = jax.random.split(key)

    BT = 8                               # batch tile: M = 128 rows per matmul
    params = init_params(pkey, batch_tile=BT)

    B = 16                               # two grid steps -> both v7x TCs busy
    inputs = jax.random.normal(xkey, (B, 1, CHUNK, NUM_FEATURES), jnp.float32)

    fwd = jax.jit(context_aware_forward, static_argnames=("batch_tile",))
    out_seg, out_spot = fwd(params, inputs, batch_tile=BT)
    jax.block_until_ready(out_seg)
    jax.block_until_ready(out_spot)

    assert out_seg.shape == (B, CHUNK, NUM_CLASSES)
    assert out_spot.shape == (B, NUM_DETECTIONS, 2 + NUM_CLASSES)
    assert bool(jnp.all(jnp.isfinite(out_seg))) and bool(jnp.all(jnp.isfinite(out_spot)))
    print("KERNEL_OK")
</pallas_src>

<mosaic_0001>
module attributes {stable_mosaic.version = 11 : i64} {
  func.func @_forward_kernel(%arg0: i32, %arg1: memref<128x32xf32, #tpu.memory_space<vmem>>, %arg2: memref<32x128xf32, #tpu.memory_space<vmem>>, %arg3: memref<1x128xf32, #tpu.memory_space<vmem>>, %arg4: memref<128x32xf32, #tpu.memory_space<vmem>>, %arg5: memref<1x32xf32, #tpu.memory_space<vmem>>, %arg6: memref<256x120xf32, #tpu.memory_space<vmem>>, %arg7: memref<1x120xf32, #tpu.memory_space<vmem>>, %arg8: memref<3x152x48xf32, #tpu.memory_space<vmem>>, %arg9: memref<1x48xf32, #tpu.memory_space<vmem>>, %arg10: memref<128x1xf32, #tpu.memory_space<vmem>>, %arg11: memref<128x1xf32, #tpu.memory_space<vmem>>, %arg12: memref<48x3xf32, #tpu.memory_space<vmem>>, %arg13: memref<168x126xf32, #tpu.memory_space<vmem>>, %arg14: memref<3x51x32xf32, #tpu.memory_space<vmem>>, %arg15: memref<1x32xf32, #tpu.memory_space<vmem>>, %arg16: memref<72x54xf32, #tpu.memory_space<vmem>>, %arg17: memref<3x32x16xf32, #tpu.memory_space<vmem>>, %arg18: memref<1x16xf32, #tpu.memory_space<vmem>>, %arg19: memref<8x22xf32, #tpu.memory_space<vmem>>, %arg20: memref<16x25xf32, #tpu.memory_space<vmem>>, %arg21: memref<1x25xf32, #tpu.memory_space<vmem>>, %arg22: memref<128x3xf32, #tpu.memory_space<vmem>>, %arg23: memref<8x25xf32, #tpu.memory_space<vmem>>, %arg24: memref<8x32x152xf32, #tpu.memory_space<vmem>>, %arg25: memref<8x16x256xf32, #tpu.memory_space<vmem>>) attributes {dimension_semantics = [#tpu.dimension_semantics<parallel>], iteration_bounds = array<i64: 2>, scalar_prefetch = 0 : i64, scratch_operands = 2 : i64, tpu.core_type = #tpu.core_type<tc>, window_params = [{transform_indices = @transform_0, window_bounds = array<i64: 128, 32>}, {pipeline_mode = #tpu.pipeline_mode<synchronous>, transform_indices = @transform_1, window_bounds = array<i64: 32, 128>}, {pipeline_mode = #tpu.pipeline_mode<synchronous>, transform_indices = @transform_2, window_bounds = array<i64: 1, 128>}, {pipeline_mode = #tpu.pipeline_mode<synchronous>, transform_indices = @transform_3, window_bounds = array<i64: 128, 32>}, {pipeline_mode = #tpu.pipeline_mode<synchronous>, transform_indices = @transform_4, window_bounds = array<i64: 1, 32>}, {pipeline_mode = #tpu.pipeline_mode<synchronous>, transform_indices = @transform_5, window_bounds = array<i64: 256, 120>}, {pipeline_mode = #tpu.pipeline_mode<synchronous>, transform_indices = @transform_6, window_bounds = array<i64: 1, 120>}, {pipeline_mode = #tpu.pipeline_mode<synchronous>, transform_indices = @transform_7, window_bounds = array<i64: 3, 152, 48>}, {pipeline_mode = #tpu.pipeline_mode<synchronous>, transform_indices = @transform_8, window_bounds = array<i64: 1, 48>}, {pipeline_mode = #tpu.pipeline_mode<synchronous>, transform_indices = @transform_9, window_bounds = array<i64: 128, 1>}, {pipeline_mode = #tpu.pipeline_mode<synchronous>, transform_indices = @transform_10, window_bounds = array<i64: 128, 1>}, {pipeline_mode = #tpu.pipeline_mode<synchronous>, transform_indices = @transform_11, window_bounds = array<i64: 48, 3>}, {pipeline_mode = #tpu.pipeline_mode<synchronous>, transform_indices = @transform_12, window_bounds = array<i64: 168, 126>}, {pipeline_mode = #tpu.pipeline_mode<synchronous>, transform_indices = @transform_13, window_bounds = array<i64: 3, 51, 32>}, {pipeline_mode = #tpu.pipeline_mode<synchronous>, transform_indices = @transform_14, window_bounds = array<i64: 1, 32>}, {pipeline_mode = #tpu.pipeline_mode<synchronous>, transform_indices = @transform_15, window_bounds = array<i64: 72, 54>}, {pipeline_mode = #tpu.pipeline_mode<synchronous>, transform_indices = @transform_16, window_bounds = array<i64: 3, 32, 16>}, {pipeline_mode = #tpu.pipeline_mode<synchronous>, transform_indices = @transform_17, window_bounds = array<i64: 1, 16>}, {pipeline_mode = #tpu.pipeline_mode<synchronous>, transform_indices = @transform_18, window_bounds = array<i64: 8, 22>}, {pipeline_mode = #tpu.pipeline_mode<synchronous>, transform_indices = @transform_19, window_bounds = array<i64: 16, 25>}, {pipeline_mode = #tpu.pipeline_mode<synchronous>, transform_indices = @transform_20, window_bounds = array<i64: 1, 25>}, {transform_indices = @transform_21, window_bounds = array<i64: 128, 3>}, {transform_indices = @transform_22, window_bounds = array<i64: 8, 25>}]} {
    %c0 = arith.constant 0 : index
    %c0_0 = arith.constant 0 : index
    %0 = vector.load %arg1[%c0, %c0_0] : memref<128x32xf32, #tpu.memory_space<vmem>>, vector<128x32xf32>
    %c0_1 = arith.constant 0 : index
    %c0_2 = arith.constant 0 : index
    %1 = vector.load %arg2[%c0_1, %c0_2] : memref<32x128xf32, #tpu.memory_space<vmem>>, vector<32x128xf32>
    %cst = arith.constant dense<0.000000e+00> : vector<128x128xf32>
    %2 = tpu.matmul %0, %1, %cst {dimension_numbers = #tpu.dot_dimension_numbers<[1], [0], [0], [1], [0, 0, 1, 1], [], []>} : vector<128x32xf32>, vector<32x128xf32>, vector<128x128xf32> -> vector<128x128xf32>
    %c0_3 = arith.constant 0 : index
    %c0_4 = arith.constant 0 : index
    %3 = vector.load %arg3[%c0_3, %c0_4] : memref<1x128xf32, #tpu.memory_space<vmem>>, vector<1x128xf32>
    %4 = vector.broadcast %3 : vector<1x128xf32> to vector<128x128xf32>
    %5 = arith.addf %2, %4 : vector<128x128xf32>
    %cst_5 = arith.constant 0.000000e+00 : f32
    %6 = vector.broadcast %cst_5 : f32 to vector<128x128xf32>
    %7 = arith.maximumf %5, %6 : vector<128x128xf32>
    %c0_6 = arith.constant 0 : index
    %c0_7 = arith.constant 0 : index
    %8 = vector.load %arg4[%c0_6, %c0_7] : memref<128x32xf32, #tpu.memory_space<vmem>>, vector<128x32xf32>
    %cst_8 = arith.constant dense<0.000000e+00> : vector<128x32xf32>
    %9 = tpu.matmul %7, %8, %cst_8 {dimension_numbers = #tpu.dot_dimension_numbers<[1], [0], [0], [1], [0, 0, 1, 1], [], []>} : vector<128x128xf32>, vector<128x32xf32>, vector<128x32xf32> -> vector<128x32xf32>
    %c0_9 = arith.constant 0 : index
    %c0_10 = arith.constant 0 : index
    %10 = vector.load %arg5[%c0_9, %c0_10] : memref<1x32xf32, #tpu.memory_space<vmem>>, vector<1x32xf32>
    %11 = vector.broadcast %10 : vector<1x32xf32> to vector<128x32xf32>
    %12 = arith.addf %9, %11 : vector<128x32xf32>
    %cst_11 = arith.constant 0.000000e+00 : f32
    %13 = vector.broadcast %cst_11 : f32 to vector<128x32xf32>
    %14 = arith.maximumf %12, %13 : vector<128x32xf32>
    %15 = vector.shape_cast %14 : vector<128x32xf32> to vector<8x16x32xf32>
    %cst_12 = arith.constant 0.000000e+00 : f32
    %16 = vector.broadcast %cst_12 : f32 to vector<8x8x152xf32>
    %c0_13 = arith.constant 0 : index
    %c0_14 = arith.constant 0 : index
    %c0_15 = arith.constant 0 : index
    %17 = vector.load %arg24[%c0_13, %c0_14, %c0_15] : memref<8x32x152xf32, #tpu.memory_space<vmem>>, vector<8x8x152xf32>
    tpu.vector_store %arg24[%c0_13, %c0_14, %c0_15], %16 {strides = array<i32>} : memref<8x32x152xf32, #tpu.memory_space<vmem>>, vector<8x8x152xf32>,
    %cst_16 = arith.constant 0.000000e+00 : f32
    %18 = vector.broadcast %cst_16 : f32 to vector<8x8x152xf32>
    %c0_17 = arith.constant 0 : index
    %c24 = arith.constant 24 : index
    %c0_18 = arith.constant 0 : index
    %19 = vector.load %arg24[%c0_17, %c24, %c0_18] : memref<8x32x152xf32, #tpu.memory_space<vmem>>, vector<8x8x152xf32>
    tpu.vector_store %arg24[%c0_17, %c24, %c0_18], %18 {strides = array<i32>} : memref<8x32x152xf32, #tpu.memory_space<vmem>>, vector<8x8x152xf32>,
    %c0_19 = arith.constant 0 : index
    %c8 = arith.constant 8 : index
    %c0_20 = arith.constant 0 : index
    %20 = vector.load %arg24[%c0_19, %c8, %c0_20] : memref<8x32x152xf32, #tpu.memory_space<vmem>>, vector<8x16x32xf32>
    tpu.vector_store %arg24[%c0_19, %c8, %c0_20], %15 {strides = array<i32>} : memref<8x32x152xf32, #tpu.memory_space<vmem>>, vector<8x16x32xf32>,
    %c0_21 = arith.constant 0 : index
    %c5 = arith.constant 5 : index
    %c0_22 = arith.constant 0 : index
    %21 = vector.load %arg24[%c0_21, %c5, %c0_22] : memref<8x32x152xf32, #tpu.memory_space<vmem>>, vector<8x16x32xf32>
    %c0_23 = arith.constant 0 : index
    %c0_24 = arith.constant 0 : index
    %c0_25 = arith.constant 0 : index
    %22 = vector.load %arg25[%c0_23, %c0_24, %c0_25] : memref<8x16x256xf32, #tpu.memory_space<vmem>>, vector<8x16x32xf32>
    tpu.vector_store %arg25[%c0_23, %c0_24, %c0_25], %21 {strides = array<i32>} : memref<8x16x256xf32, #tpu.memory_space<vmem>>, vector<8x16x32xf32>,
    %c0_26 = arith.constant 0 : index
    %c6 = arith.constant 6 : index
    %c0_27 = arith.constant 0 : index
    %23 = vector.load %arg24[%c0_26, %c6, %c0_27] : memref<8x32x152xf32, #tpu.memory_space<vmem>>, vector<8x16x32xf32>
    %c0_28 = arith.constant 0 : index
    %c0_29 = arith.constant 0 : index
    %c32 = arith.constant 32 : index
    %24 = vector.load %arg25[%c0_28, %c0_29, %c32] : memref<8x16x256xf32, #tpu.memory_space<vmem>>, vector<8x16x32xf32>
    tpu.vector_store %arg25[%c0_28, %c0_29, %c32], %23 {strides = array<i32>} : memref<8x16x256xf32, #tpu.memory_space<vmem>>, vector<8x16x32xf32>,
    %c0_30 = arith.constant 0 : index
    %c7 = arith.constant 7 : index
    %c0_31 = arith.constant 0 : index
    %25 = vector.load %arg24[%c0_30, %c7, %c0_31] : memref<8x32x152xf32, #tpu.memory_space<vmem>>, vector<8x16x32xf32>
    %c0_32 = arith.constant 0 : index
    %c0_33 = arith.constant 0 : index
    %c64 = arith.constant 64 : index
    %26 = vector.load %arg25[%c0_32, %c0_33, %c64] : memref<8x16x256xf32, #tpu.memory_space<vmem>>, vector<8x16x32xf32>
    tpu.vector_store %arg25[%c0_32, %c0_33, %c64], %25 {strides = array<i32>} : memref<8x16x256xf32, #tpu.memory_space<vmem>>, vector<8x16x32xf32>,
    %c0_34 = arith.constant 0 : index
    %c8_35 = arith.constant 8 : index
    %c0_36 = arith.constant 0 : index
    %27 = vector.load %arg24[%c0_34, %c8_35, %c0_36] : memref<8x32x152xf32, #tpu.memory_space<vmem>>, vector<8x16x32xf32>
    %c0_37 = arith.constant 0 : index
    %c0_38 = arith.constant 0 : index
    %c96 = arith.constant 96 : index
    %28 = vector.load %arg25[%c0_37, %c0_38, %c96] : memref<8x16x256xf32, #tpu.memory_space<vmem>>, vector<8x16x32xf32>
    tpu.vector_store %arg25[%c0_37, %c0_38, %c96], %27 {strides = array<i32>} : memref<8x16x256xf32, #tpu.memory_space<vmem>>, vector<8x16x32xf32>,
    %c0_39 = arith.constant 0 : index
    %c9 = arith.constant 9 : index
    %c0_40 = arith.constant 0 : index
    %29 = vector.load %arg24[%c0_39, %c9, %c0_40] : memref<8x32x152xf32, #tpu.memory_space<vmem>>, vector<8x16x32xf32>
    %c0_41 = arith.constant 0 : index
    %c0_42 = arith.constant 0 : index
    %c128 = arith.constant 128 : index
    %30 = vector.load %arg25[%c0_41, %c0_42, %c128] : memref<8x16x256xf32, #tpu.memory_space<vmem>>, vector<8x16x32xf32>
    tpu.vector_store %arg25[%c0_41, %c0_42, %c128], %29 {strides = array<i32>} : memref<8x16x256xf32, #tpu.memory_space<vmem>>, vector<8x16x32xf32>,
    %c0_43 = arith.constant 0 : index
    %c10 = arith.constant 10 : index
    %c0_44 = arith.constant 0 : index
    %31 = vector.load %arg24[%c0_43, %c10, %c0_44] : memref<8x32x152xf32, #tpu.memory_space<vmem>>, vector<8x16x32xf32>
    %c0_45 = arith.constant 0 : index
    %c0_46 = arith.constant 0 : index
    %c160 = arith.constant 160 : index
    %32 = vector.load %arg25[%c0_45, %c0_46, %c160] : memref<8x16x256xf32, #tpu.memory_space<vmem>>, vector<8x16x32xf32>
    tpu.vector_store %arg25[%c0_45, %c0_46, %c160], %31 {strides = array<i32>} : memref<8x16x256xf32, #tpu.memory_space<vmem>>, vector<8x16x32xf32>,
    %c0_47 = arith.constant 0 : index
    %c11 = arith.constant 11 : index
    %c0_48 = arith.constant 0 : index
    %33 = vector.load %arg24[%c0_47, %c11, %c0_48] : memref<8x32x152xf32, #tpu.memory_space<vmem>>, vector<8x16x32xf32>
    %c0_49 = arith.constant 0 : index
    %c0_50 = arith.constant 0 : index
    %c192 = arith.constant 192 : index
    %34 = vector.load %arg25[%c0_49, %c0_50, %c192] : memref<8x16x256xf32, #tpu.memory_space<vmem>>, vector<8x16x32xf32>
    tpu.vector_store %arg25[%c0_49, %c0_50, %c192], %33 {strides = array<i32>} : memref<8x16x256xf32, #tpu.memory_space<vmem>>, vector<8x16x32xf32>,
    %c0_51 = arith.constant 0 : index
    %c12 = arith.constant 12 : index
    %c0_52 = arith.constant 0 : index
    %35 = vector.load %arg24[%c0_51, %c12, %c0_52] : memref<8x32x152xf32, #tpu.memory_space<vmem>>, vector<8x16x32xf32>
    %c0_53 = arith.constant 0 : index
    %c0_54 = arith.constant 0 : index
    %c224 = arith.constant 224 : index
    %36 = vector.load %arg25[%c0_53, %c0_54, %c224] : memref<8x16x256xf32, #tpu.memory_space<vmem>>, vector<8x16x32xf32>
    tpu.vector_store %arg25[%c0_53, %c0_54, %c224], %35 {strides = array<i32>} : memref<8x16x256xf32, #tpu.memory_space<vmem>>, vector<8x16x32xf32>,
    %c0_55 = arith.constant 0 : index
    %c0_56 = arith.constant 0 : index
    %c0_57 = arith.constant 0 : index
    %37 = vector.load %arg25[%c0_55, %c0_56, %c0_57] : memref<8x16x256xf32, #tpu.memory_space<vmem>>, vector<8x16x256xf32>
    %38 = vector.shape_cast %37 : vector<8x16x256xf32> to vector<128x256xf32>
    %c0_58 = arith.constant 0 : index
    %c0_59 = arith.constant 0 : index
    %39 = vector.load %arg6[%c0_58, %c0_59] : memref<256x120xf32, #tpu.memory_space<vmem>>, vector<256x120xf32>
    %cst_60 = arith.constant dense<0.000000e+00> : vector<128x120xf32>
    %40 = tpu.matmul %38, %39, %cst_60 {dimension_numbers = #tpu.dot_dimension_numbers<[1], [0], [0], [1], [0, 0, 1, 1], [], []>} : vector<128x256xf32>, vector<256x120xf32>, vector<128x120xf32> -> vector<128x120xf32>
    %c0_61 = arith.constant 0 : index
    %c0_62 = arith.constant 0 : index
    %41 = vector.load %arg7[%c0_61, %c0_62] : memref<1x120xf32, #tpu.memory_space<vmem>>, vector<1x120xf32>
    %42 = vector.broadcast %41 : vector<1x120xf32> to vector<128x120xf32>
    %43 = arith.addf %40, %42 : vector<128x120xf32>
    %cst_63 = arith.constant 0.000000e+00 : f32
    %44 = vector.broadcast %cst_63 : f32 to vector<128x120xf32>
    %45 = arith.maximumf %43, %44 : vector<128x120xf32>
    %46 = vector.shape_cast %45 : vector<128x120xf32> to vector<8x16x120xf32>
    %c0_64 = arith.constant 0 : index
    %c8_65 = arith.constant 8 : index
    %c32_66 = arith.constant 32 : index
    %47 = vector.load %arg24[%c0_64, %c8_65, %c32_66] : memref<8x32x152xf32, #tpu.memory_space<vmem>>, vector<8x16x120xf32>
    tpu.vector_store %arg24[%c0_64, %c8_65, %c32_66], %46 {strides = array<i32>} : memref<8x32x152xf32, #tpu.memory_space<vmem>>, vector<8x16x120xf32>,
    %c0_67 = arith.constant 0 : index
    %c0_68 = arith.constant 0 : index
    %48 = vector.load %arg9[%c0_67, %c0_68] : memref<1x48xf32, #tpu.memory_space<vmem>>, vector<1x48xf32>
    %c0_69 = arith.constant 0 : index
    %c7_70 = arith.constant 7 : index
    %c0_71 = arith.constant 0 : index
    %49 = vector.load %arg24[%c0_69, %c7_70, %c0_71] : memref<8x32x152xf32, #tpu.memory_space<vmem>>, vector<8x16x152xf32>
    %50 = vector.shape_cast %49 : vector<8x16x152xf32> to vector<128x152xf32>
    %c0_72 = arith.constant 0 : index
    %c0_73 = arith.constant 0 : index
    %c0_74 = arith.constant 0 : index
    %51 = vector.load %arg8[%c0_72, %c0_73, %c0_74] : memref<3x152x48xf32, #tpu.memory_space<vmem>>, vector<1x152x48xf32>
    %52 = vector.shape_cast %51 : vector<1x152x48xf32> to vector<152x48xf32>
    %cst_75 = arith.constant dense<0.000000e+00> : vector<128x48xf32>
    %53 = tpu.matmul %50, %52, %cst_75 {dimension_numbers = #tpu.dot_dimension_numbers<[1], [0], [0], [1], [0, 0, 1, 1], [], []>} : vector<128x152xf32>, vector<152x48xf32>, vector<128x48xf32> -> vector<128x48xf32>
    %54 = vector.broadcast %48 : vector<1x48xf32> to vector<128x48xf32>
    %55 = arith.addf %54, %53 : vector<128x48xf32>
    %c0_76 = arith.constant 0 : index
    %c8_77 = arith.constant 8 : index
    %c0_78 = arith.constant 0 : index
    %56 = vector.load %arg24[%c0_76, %c8_77, %c0_78] : memref<8x32x152xf32, #tpu.memory_space<vmem>>, vector<8x16x152xf32>
    %57 = vector.shape_cast %56 : vector<8x16x152xf32> to vector<128x152xf32>
    %c1 = arith.constant 1 : index
    %c0_79 = arith.constant 0 : index
    %c0_80 = arith.constant 0 : index
    %58 = vector.load %arg8[%c1, %c0_79, %c0_80] : memref<3x152x48xf32, #tpu.memory_space<vmem>>, vector<1x152x48xf32>
    %59 = vector.shape_cast %58 : vector<1x152x48xf32> to vector<152x48xf32>
    %cst_81 = arith.constant dense<0.000000e+00> : vector<128x48xf32>
    %60 = tpu.matmul %57, %59, %cst_81 {dimension_numbers = #tpu.dot_dimension_numbers<[1], [0], [0], [1], [0, 0, 1, 1], [], []>} : vector<128x152xf32>, vector<152x48xf32>, vector<128x48xf32> -> vector<128x48xf32>
    %61 = arith.addf %55, %60 : vector<128x48xf32>
    %c0_82 = arith.constant 0 : index
    %c9_83 = arith.constant 9 : index
    %c0_84 = arith.constant 0 : index
    %62 = vector.load %arg24[%c0_82, %c9_83, %c0_84] : memref<8x32x152xf32, #tpu.memory_space<vmem>>, vector<8x16x152xf32>
    %63 = vector.shape_cast %62 : vector<8x16x152xf32> to vector<128x152xf32>
    %c2 = arith.constant 2 : index
    %c0_85 = arith.constant 0 : index
    %c0_86 = arith.constant 0 : index
    %64 = vector.load %arg8[%c2, %c0_85, %c0_86] : memref<3x152x48xf32, #tpu.memory_space<vmem>>, vector<1x152x48xf32>
    %65 = vector.shape_cast %64 : vector<1x152x48xf32> to vector<152x48xf32>
    %cst_87 = arith.constant dense<0.000000e+00> : vector<128x48xf32>
    %66 = tpu.matmul %63, %65, %cst_87 {dimension_numbers = #tpu.dot_dimension_numbers<[1], [0], [0], [1], [0, 0, 1, 1], [], []>} : vector<128x152xf32>, vector<152x48xf32>, vector<128x48xf32> -> vector<128x48xf32>
    %67 = arith.addf %61, %66 : vector<128x48xf32>
    %c0_88 = arith.constant 0 : index
    %c0_89 = arith.constant 0 : index
    %68 = vector.load %arg10[%c0_88, %c0_89] : memref<128x1xf32, #tpu.memory_space<vmem>>, vector<128x1xf32>
    %69 = vector.broadcast %68 : vector<128x1xf32> to vector<128x48xf32>
    %70 = arith.mulf %67, %69 : vector<128x48xf32>
    %c0_90 = arith.constant 0 : index
    %c0_91 = arith.constant 0 : index
    %71 = vector.load %arg11[%c0_90, %c0_91] : memref<128x1xf32, #tpu.memory_space<vmem>>, vector<128x1xf32>
    %72 = vector.broadcast %71 : vector<128x1xf32> to vector<128x48xf32>
    %73 = arith.addf %70, %72 : vector<128x48xf32>
    %74 = arith.negf %73 : vector<128x48xf32>
    %75 = math.exp %74 : vector<128x48xf32>
    %cst_92 = arith.constant 1.000000e+00 : f32
    %76 = vector.broadcast %cst_92 : f32 to vector<128x48xf32>
    %77 = arith.addf %76, %75 : vector<128x48xf32>
    %78 = arith.divf %76, %77 : vector<128x48xf32>
    %cst_93 = arith.constant 5.000000e-01 : f32
    %79 = vector.broadcast %cst_93 : f32 to vector<128x48xf32>
    %80 = arith.subf %78, %79 : vector<128x48xf32>
    %cst_94 = arith.constant 5.000000e-01 : f32
    %81 = vector.broadcast %cst_94 : f32 to vector<128x48xf32>
    %82 = arith.subf %78, %81 : vector<128x48xf32>
    %83 = arith.mulf %80, %82 : vector<128x48xf32>
    %c0_95 = arith.constant 0 : index
    %c0_96 = arith.constant 0 : index
    %84 = vector.load %arg12[%c0_95, %c0_96] : memref<48x3xf32, #tpu.memory_space<vmem>>, vector<48x3xf32>
    %cst_97 = arith.constant dense<0.000000e+00> : vector<128x3xf32>
    %85 = tpu.matmul %83, %84, %cst_97 {dimension_numbers = #tpu.dot_dimension_numbers<[1], [0], [0], [1], [0, 0, 1, 1], [], []>} : vector<128x48xf32>, vector<48x3xf32>, vector<128x3xf32> -> vector<128x3xf32>
    %cst_98 = arith.constant 2.500000e-01 : f32
    %86 = vector.broadcast %cst_98 : f32 to vector<128x3xf32>
    %87 = arith.mulf %85, %86 : vector<128x3xf32>
    %88 = math.sqrt %87 : vector<128x3xf32>
    %c0_99 = arith.constant 0 : index
    %c0_100 = arith.constant 0 : index
    %89 = vector.load %arg22[%c0_99, %c0_100] : memref<128x3xf32, #tpu.memory_space<vmem>>, vector<128x3xf32>
    tpu.vector_store %arg22[%c0_99, %c0_100], %88 {strides = array<i32>} : memref<128x3xf32, #tpu.memory_space<vmem>>, vector<128x3xf32>,
    %cst_101 = arith.constant 0.000000e+00 : f32
    %90 = vector.broadcast %cst_101 : f32 to vector<128x48xf32>
    %91 = arith.maximumf %67, %90 : vector<128x48xf32>
    %cst_102 = arith.constant 1.000000e+00 : f32
    %92 = vector.broadcast %cst_102 : f32 to vector<128x3xf32>
    %93 = arith.subf %92, %88 : vector<128x3xf32>
    %cst_103 = arith.constant 0.000000e+00 : f32
    %94 = vector.broadcast %cst_103 : f32 to vector<128x3xf32>
    %95 = arith.maximumf %93, %94 : vector<128x3xf32>
    %96 = tpu.concatenate %91, %95 in 1 : vector<128x48xf32>, vector<128x3xf32> -> vector<128x51xf32>
    %c0_104 = arith.constant 0 : index
    %c0_105 = arith.constant 0 : index
    %97 = vector.load %arg13[%c0_104, %c0_105] : memref<168x126xf32, #tpu.memory_space<vmem>>, vector<168x126xf32>
    %98 = vector.extract_strided_slice %96 {offsets = [0, 0], sizes = [126, 51], strides = [1, 1]} : vector<128x51xf32> to vector<126x51xf32>
    %99 = vector.extract_strided_slice %96 {offsets = [1, 0], sizes = [126, 51], strides = [1, 1]} : vector<128x51xf32> to vector<126x51xf32>
    %100 = vector.extract_strided_slice %96 {offsets = [2, 0], sizes = [126, 51], strides = [1, 1]} : vector<128x51xf32> to vector<126x51xf32>
    %101 = arith.maximumf %99, %100 : vector<126x51xf32>
    %102 = arith.maximumf %98, %101 : vector<126x51xf32>
    %cst_106 = arith.constant dense<0.000000e+00> : vector<168x51xf32>
    %103 = tpu.matmul %97, %102, %cst_106 {dimension_numbers = #tpu.dot_dimension_numbers<[1], [0], [0], [1], [0, 0, 1, 1], [], []>} : vector<168x126xf32>, vector<126x51xf32>, vector<168x51xf32> -> vector<168x51xf32>
    %104 = vector.extract_strided_slice %103 {offsets = [0, 0], sizes = [56, 51], strides = [1, 1]} : vector<168x51xf32> to vector<56x51xf32>
    %c0_107 = arith.constant 0 : index
    %c0_108 = arith.constant 0 : index
    %c0_109 = arith.constant 0 : index
    %105 = vector.load %arg14[%c0_107, %c0_108, %c0_109] : memref<3x51x32xf32, #tpu.memory_space<vmem>>, vector<1x51x32xf32>
    %106 = vector.shape_cast %105 : vector<1x51x32xf32> to vector<51x32xf32>
    %cst_110 = arith.constant dense<0.000000e+00> : vector<56x32xf32>
    %107 = tpu.matmul %104, %106, %cst_110 {dimension_numbers = #tpu.dot_dimension_numbers<[1], [0], [0], [1], [0, 0, 1, 1], [], []>} : vector<56x51xf32>, vector<51x32xf32>, vector<56x32xf32> -> vector<56x32xf32>
    %108 = vector.extract_strided_slice %103 {offsets = [56, 0], sizes = [56, 51], strides = [1, 1]} : vector<168x51xf32> to vector<56x51xf32>
    %c1_111 = arith.constant 1 : index
    %c0_112 = arith.constant 0 : index
    %c0_113 = arith.constant 0 : index
    %109 = vector.load %arg14[%c1_111, %c0_112, %c0_113] : memref<3x51x32xf32, #tpu.memory_space<vmem>>, vector<1x51x32xf32>
    %110 = vector.shape_cast %109 : vector<1x51x32xf32> to vector<51x32xf32>
    %cst_114 = arith.constant dense<0.000000e+00> : vector<56x32xf32>
    %111 = tpu.matmul %108, %110, %cst_114 {dimension_numbers = #tpu.dot_dimension_numbers<[1], [0], [0], [1], [0, 0, 1, 1], [], []>} : vector<56x51xf32>, vector<51x32xf32>, vector<56x32xf32> -> vector<56x32xf32>
    %112 = arith.addf %107, %111 : vector<56x32xf32>
    %113 = vector.extract_strided_slice %103 {offsets = [112, 0], sizes = [56, 51], strides = [1, 1]} : vector<168x51xf32> to vector<56x51xf32>
    %c2_115 = arith.constant 2 : index
    %c0_116 = arith.constant 0 : index
    %c0_117 = arith.constant 0 : index
    %114 = vector.load %arg14[%c2_115, %c0_116, %c0_117] : memref<3x51x32xf32, #tpu.memory_space<vmem>>, vector<1x51x32xf32>
    %115 = vector.shape_cast %114 : vector<1x51x32xf32> to vector<51x32xf32>
    %cst_118 = arith.constant dense<0.000000e+00> : vector<56x32xf32>
    %116 = tpu.matmul %113, %115, %cst_118 {dimension_numbers = #tpu.dot_dimension_numbers<[1], [0], [0], [1], [0, 0, 1, 1], [], []>} : vector<56x51xf32>, vector<51x32xf32>, vector<56x32xf32> -> vector<56x32xf32>
    %117 = arith.addf %112, %116 : vector<56x32xf32>
    %c0_119 = arith.constant 0 : index
    %c0_120 = arith.constant 0 : index
    %118 = vector.load %arg15[%c0_119, %c0_120] : memref<1x32xf32, #tpu.memory_space<vmem>>, vector<1x32xf32>
    %119 = vector.broadcast %118 : vector<1x32xf32> to vector<56x32xf32>
    %120 = arith.addf %117, %119 : vector<56x32xf32>
    %cst_121 = arith.constant 0.000000e+00 : f32
    %121 = vector.broadcast %cst_121 : f32 to vector<56x32xf32>
    %122 = arith.maximumf %120, %121 : vector<56x32xf32>
    %c0_122 = arith.constant 0 : index
    %c0_123 = arith.constant 0 : index
    %123 = vector.load %arg16[%c0_122, %c0_123] : memref<72x54xf32, #tpu.memory_space<vmem>>, vector<72x54xf32>
    %124 = vector.extract_strided_slice %122 {offsets = [0, 0], sizes = [54, 32], strides = [1, 1]} : vector<56x32xf32> to vector<54x32xf32>
    %125 = vector.extract_strided_slice %122 {offsets = [1, 0], sizes = [54, 32], strides = [1, 1]} : vector<56x32xf32> to vector<54x32xf32>
    %126 = vector.extract_strided_slice %122 {offsets = [2, 0], sizes = [54, 32], strides = [1, 1]} : vector<56x32xf32> to vector<54x32xf32>
    %127 = arith.maximumf %125, %126 : vector<54x32xf32>
    %128 = arith.maximumf %124, %127 : vector<54x32xf32>
    %cst_124 = arith.constant dense<0.000000e+00> : vector<72x32xf32>
    %129 = tpu.matmul %123, %128, %cst_124 {dimension_numbers = #tpu.dot_dimension_numbers<[1], [0], [0], [1], [0, 0, 1, 1], [], []>} : vector<72x54xf32>, vector<54x32xf32>, vector<72x32xf32> -> vector<72x32xf32>
    %130 = vector.extract_strided_slice %129 {offsets = [0, 0], sizes = [24, 32], strides = [1, 1]} : vector<72x32xf32> to vector<24x32xf32>
    %c0_125 = arith.constant 0 : index
    %c0_126 = arith.constant 0 : index
    %c0_127 = arith.constant 0 : index
    %131 = vector.load %arg17[%c0_125, %c0_126, %c0_127] : memref<3x32x16xf32, #tpu.memory_space<vmem>>, vector<1x32x16xf32>
    %132 = vector.shape_cast %131 : vector<1x32x16xf32> to vector<32x16xf32>
    %cst_128 = arith.constant dense<0.000000e+00> : vector<24x16xf32>
    %133 = tpu.matmul %130, %132, %cst_128 {dimension_numbers = #tpu.dot_dimension_numbers<[1], [0], [0], [1], [0, 0, 1, 1], [], []>} : vector<24x32xf32>, vector<32x16xf32>, vector<24x16xf32> -> vector<24x16xf32>
    %134 = vector.extract_strided_slice %129 {offsets = [24, 0], sizes = [24, 32], strides = [1, 1]} : vector<72x32xf32> to vector<24x32xf32>
    %c1_129 = arith.constant 1 : index
    %c0_130 = arith.constant 0 : index
    %c0_131 = arith.constant 0 : index
    %135 = vector.load %arg17[%c1_129, %c0_130, %c0_131] : memref<3x32x16xf32, #tpu.memory_space<vmem>>, vector<1x32x16xf32>
    %136 = vector.shape_cast %135 : vector<1x32x16xf32> to vector<32x16xf32>
    %cst_132 = arith.constant dense<0.000000e+00> : vector<24x16xf32>
    %137 = tpu.matmul %134, %136, %cst_132 {dimension_numbers = #tpu.dot_dimension_numbers<[1], [0], [0], [1], [0, 0, 1, 1], [], []>} : vector<24x32xf32>, vector<32x16xf32>, vector<24x16xf32> -> vector<24x16xf32>
    %138 = arith.addf %133, %137 : vector<24x16xf32>
    %139 = vector.extract_strided_slice %129 {offsets = [48, 0], sizes = [24, 32], strides = [1, 1]} : vector<72x32xf32> to vector<24x32xf32>
    %c2_133 = arith.constant 2 : index
    %c0_134 = arith.constant 0 : index
    %c0_135 = arith.constant 0 : index
    %140 = vector.load %arg17[%c2_133, %c0_134, %c0_135] : memref<3x32x16xf32, #tpu.memory_space<vmem>>, vector<1x32x16xf32>
    %141 = vector.shape_cast %140 : vector<1x32x16xf32> to vector<32x16xf32>
    %cst_136 = arith.constant dense<0.000000e+00> : vector<24x16xf32>
    %142 = tpu.matmul %139, %141, %cst_136 {dimension_numbers = #tpu.dot_dimension_numbers<[1], [0], [0], [1], [0, 0, 1, 1], [], []>} : vector<24x32xf32>, vector<32x16xf32>, vector<24x16xf32> -> vector<24x16xf32>
    %143 = arith.addf %138, %142 : vector<24x16xf32>
    %c0_137 = arith.constant 0 : index
    %c0_138 = arith.constant 0 : index
    %144 = vector.load %arg18[%c0_137, %c0_138] : memref<1x16xf32, #tpu.memory_space<vmem>>, vector<1x16xf32>
    %145 = vector.broadcast %144 : vector<1x16xf32> to vector<24x16xf32>
    %146 = arith.addf %143, %145 : vector<24x16xf32>
    %cst_139 = arith.constant 0.000000e+00 : f32
    %147 = vector.broadcast %cst_139 : f32 to vector<24x16xf32>
    %148 = arith.maximumf %146, %147 : vector<24x16xf32>
    %c0_140 = arith.constant 0 : index
    %c0_141 = arith.constant 0 : index
    %149 = vector.load %arg19[%c0_140, %c0_141] : memref<8x22xf32, #tpu.memory_space<vmem>>, vector<8x22xf32>
    %150 = vector.extract_strided_slice %148 {offsets = [0, 0], sizes = [22, 16], strides = [1, 1]} : vector<24x16xf32> to vector<22x16xf32>
    %151 = vector.extract_strided_slice %148 {offsets = [1, 0], sizes = [22, 16], strides = [1, 1]} : vector<24x16xf32> to vector<22x16xf32>
    %152 = vector.extract_strided_slice %148 {offsets = [2, 0], sizes = [22, 16], strides = [1, 1]} : vector<24x16xf32> to vector<22x16xf32>
    %153 = arith.maximumf %151, %152 : vector<22x16xf32>
    %154 = arith.maximumf %150, %153 : vector<22x16xf32>
    %cst_142 = arith.constant dense<0.000000e+00> : vector<8x16xf32>
    %155 = tpu.matmul %149, %154, %cst_142 {dimension_numbers = #tpu.dot_dimension_numbers<[1], [0], [0], [1], [0, 0, 1, 1], [], []>} : vector<8x22xf32>, vector<22x16xf32>, vector<8x16xf32> -> vector<8x16xf32>
    %c0_143 = arith.constant 0 : index
    %c0_144 = arith.constant 0 : index
    %156 = vector.load %arg20[%c0_143, %c0_144] : memref<16x25xf32, #tpu.memory_space<vmem>>, vector<16x25xf32>
    %cst_145 = arith.constant dense<0.000000e+00> : vector<8x25xf32>
    %157 = tpu.matmul %155, %156, %cst_145 {dimension_numbers = #tpu.dot_dimension_numbers<[1], [0], [0], [1], [0, 0, 1, 1], [], []>} : vector<8x16xf32>, vector<16x25xf32>, vector<8x25xf32> -> vector<8x25xf32>
    %c0_146 = arith.constant 0 : index
    %c0_147 = arith.constant 0 : index
    %158 = vector.load %arg21[%c0_146, %c0_147] : memref<1x25xf32, #tpu.memory_space<vmem>>, vector<1x25xf32>
    %159 = vector.broadcast %158 : vector<1x25xf32> to vector<8x25xf32>
    %160 = arith.addf %157, %159 : vector<8x25xf32>
    %c0_148 = arith.constant 0 : index
    %c0_149 = arith.constant 0 : index
    %161 = vector.load %arg23[%c0_148, %c0_149] : memref<8x25xf32, #tpu.memory_space<vmem>>, vector<8x25xf32>
    tpu.vector_store %arg23[%c0_148, %c0_149], %160 {strides = array<i32>} : memref<8x25xf32, #tpu.memory_space<vmem>>, vector<8x25xf32>,
    return
  }
  func.func @transform_0(%arg0: i32) -> (i32, i32) {
    %c0_i32 = arith.constant 0 : i32
    %c0_i32_0 = arith.constant 0 : i32
    return %arg0, %c0_i32 : i32, i32
  }
  func.func @transform_1(%arg0: i32) -> (i32, i32) {
    %c0_i32 = arith.constant 0 : i32
    %c0_i32_0 = arith.constant 0 : i32
    %c0_i32_1 = arith.constant 0 : i32
    return %c0_i32, %c0_i32_0 : i32, i32
  }
  func.func @transform_2(%arg0: i32) -> (i32, i32) {
    %c0_i32 = arith.constant 0 : i32
    %c0_i32_0 = arith.constant 0 : i32
    %c0_i32_1 = arith.constant 0 : i32
    return %c0_i32, %c0_i32_0 : i32, i32
  }
  func.func @transform_3(%arg0: i32) -> (i32, i32) {
    %c0_i32 = arith.constant 0 : i32
    %c0_i32_0 = arith.constant 0 : i32
    %c0_i32_1 = arith.constant 0 : i32
    return %c0_i32, %c0_i32_0 : i32, i32
  }
  func.func @transform_4(%arg0: i32) -> (i32, i32) {
    %c0_i32 = arith.constant 0 : i32
    %c0_i32_0 = arith.constant 0 : i32
    %c0_i32_1 = arith.constant 0 : i32
    return %c0_i32, %c0_i32_0 : i32, i32
  }
  func.func @transform_5(%arg0: i32) -> (i32, i32) {
    %c0_i32 = arith.constant 0 : i32
    %c0_i32_0 = arith.constant 0 : i32
    %c0_i32_1 = arith.constant 0 : i32
    return %c0_i32, %c0_i32_0 : i32, i32
  }
  func.func @transform_6(%arg0: i32) -> (i32, i32) {
    %c0_i32 = arith.constant 0 : i32
    %c0_i32_0 = arith.constant 0 : i32
    %c0_i32_1 = arith.constant 0 : i32
    return %c0_i32, %c0_i32_0 : i32, i32
  }
  func.func @transform_7(%arg0: i32) -> (i32, i32, i32) {
    %c0_i32 = arith.constant 0 : i32
    %c0_i32_0 = arith.constant 0 : i32
    %c0_i32_1 = arith.constant 0 : i32
    %c0_i32_2 = arith.constant 0 : i32
    return %c0_i32, %c0_i32_0, %c0_i32_1 : i32, i32, i32
  }
  func.func @transform_8(%arg0: i32) -> (i32, i32) {
    %c0_i32 = arith.constant 0 : i32
    %c0_i32_0 = arith.constant 0 : i32
    %c0_i32_1 = arith.constant 0 : i32
    return %c0_i32, %c0_i32_0 : i32, i32
  }
  func.func @transform_9(%arg0: i32) -> (i32, i32) {
    %c0_i32 = arith.constant 0 : i32
    %c0_i32_0 = arith.constant 0 : i32
    %c0_i32_1 = arith.constant 0 : i32
    return %c0_i32, %c0_i32_0 : i32, i32
  }
  func.func @transform_10(%arg0: i32) -> (i32, i32) {
    %c0_i32 = arith.constant 0 : i32
    %c0_i32_0 = arith.constant 0 : i32
    %c0_i32_1 = arith.constant 0 : i32
    return %c0_i32, %c0_i32_0 : i32, i32
  }
  func.func @transform_11(%arg0: i32) -> (i32, i32) {
    %c0_i32 = arith.constant 0 : i32
    %c0_i32_0 = arith.constant 0 : i32
    %c0_i32_1 = arith.constant 0 : i32
    return %c0_i32, %c0_i32_0 : i32, i32
  }
  func.func @transform_12(%arg0: i32) -> (i32, i32) {
    %c0_i32 = arith.constant 0 : i32
    %c0_i32_0 = arith.constant 0 : i32
    %c0_i32_1 = arith.constant 0 : i32
    return %c0_i32, %c0_i32_0 : i32, i32
  }
  func.func @transform_13(%arg0: i32) -> (i32, i32, i32) {
    %c0_i32 = arith.constant 0 : i32
    %c0_i32_0 = arith.constant 0 : i32
    %c0_i32_1 = arith.constant 0 : i32
    %c0_i32_2 = arith.constant 0 : i32
    return %c0_i32, %c0_i32_0, %c0_i32_1 : i32, i32, i32
  }
  func.func @transform_14(%arg0: i32) -> (i32, i32) {
    %c0_i32 = arith.constant 0 : i32
    %c0_i32_0 = arith.constant 0 : i32
    %c0_i32_1 = arith.constant 0 : i32
    return %c0_i32, %c0_i32_0 : i32, i32
  }
  func.func @transform_15(%arg0: i32) -> (i32, i32) {
    %c0_i32 = arith.constant 0 : i32
    %c0_i32_0 = arith.constant 0 : i32
    %c0_i32_1 = arith.constant 0 : i32
    return %c0_i32, %c0_i32_0 : i32, i32
  }
  func.func @transform_16(%arg0: i32) -> (i32, i32, i32) {
    %c0_i32 = arith.constant 0 : i32
    %c0_i32_0 = arith.constant 0 : i32
    %c0_i32_1 = arith.constant 0 : i32
    %c0_i32_2 = arith.constant 0 : i32
    return %c0_i32, %c0_i32_0, %c0_i32_1 : i32, i32, i32
  }
  func.func @transform_17(%arg0: i32) -> (i32, i32) {
    %c0_i32 = arith.constant 0 : i32
    %c0_i32_0 = arith.constant 0 : i32
    %c0_i32_1 = arith.constant 0 : i32
    return %c0_i32, %c0_i32_0 : i32, i32
  }
  func.func @transform_18(%arg0: i32) -> (i32, i32) {
    %c0_i32 = arith.constant 0 : i32
    %c0_i32_0 = arith.constant 0 : i32
    %c0_i32_1 = arith.constant 0 : i32
    return %c0_i32, %c0_i32_0 : i32, i32
  }
  func.func @transform_19(%arg0: i32) -> (i32, i32) {
    %c0_i32 = arith.constant 0 : i32
    %c0_i32_0 = arith.constant 0 : i32
    %c0_i32_1 = arith.constant 0 : i32
    return %c0_i32, %c0_i32_0 : i32, i32
  }
  func.func @transform_20(%arg0: i32) -> (i32, i32) {
    %c0_i32 = arith.constant 0 : i32
    %c0_i32_0 = arith.constant 0 : i32
    %c0_i32_1 = arith.constant 0 : i32
    return %c0_i32, %c0_i32_0 : i32, i32
  }
  func.func @transform_21(%arg0: i32) -> (i32, i32) {
    %c0_i32 = arith.constant 0 : i32
    %c0_i32_0 = arith.constant 0 : i32
    return %arg0, %c0_i32 : i32, i32
  }
  func.func @transform_22(%arg0: i32) -> (i32, i32) {
    %c0_i32 = arith.constant 0 : i32
    %c0_i32_0 = arith.constant 0 : i32
    return %arg0, %c0_i32 : i32, i32
  }
}

</mosaic_0001>

<bundles_post_ra>
// kernel: context_aware_forward.1
= control target key start
LH: loop header
LB: loop body
LE: loop exit
PB: predicated region body
PF: predicated region fallthrough
CT: control target
= control target key end

     0   :  { %s9842_s0 = inlined_call_operand.vmem [shape: f32[256,32], index: 0, kind: input, shape index: {}]   ;;  %s9843_s1 = inlined_call_operand.vmem [shape: f32[32,128], index: 1, kind: input, shape index: {}]   ;;  %s9844_s2 = inlined_call_operand.vmem [shape: f32[1,128], index: 2, kind: input, shape index: {}]   ;;  %s9845_s3 = inlined_call_operand.vmem [shape: f32[128,32], index: 3, kind: input, shape index: {}]   ;;  %s9846_s4 = inlined_call_operand.vmem [shape: f32[1,32], index: 4, kind: input, shape index: {}]   ;;  %s9847_s5 = inlined_call_operand.vmem [shape: f32[256,120], index: 5, kind: input, shape index: {}]   ;;  %s9848_s6 = inlined_call_operand.vmem [shape: f32[1,120], index: 6, kind: input, shape index: {}]   ;;  %s9849_s7 = inlined_call_operand.vmem [shape: f32[3,152,48], index: 7, kind: input, shape index: {}]   ;;  %s9850_s8 = inlined_call_operand.vmem [shape: f32[1,48], index: 8, kind: input, shape index: {}]   ;;  %s9851_s9 = inlined_call_operand.vmem [shape: f32[128,1], index: 9, kind: input, shape index: {}]   ;;  %s9852_s10 = inlined_call_operand.vmem [shape: f32[128,1], index: 10, kind: input, shape index: {}]   ;;  %s9853_s11 = inlined_call_operand.vmem [shape: f32[48,3], index: 11, kind: input, shape index: {}]   ;;  %s9854_s12 = inlined_call_operand.vmem [shape: f32[168,126], index: 12, kind: input, shape index: {}]   ;;  %s9855_s13 = inlined_call_operand.vmem [shape: f32[3,51,32], index: 13, kind: input, shape index: {}]   ;;  %s9856_s14 = inlined_call_operand.vmem [shape: f32[1,32], index: 14, kind: input, shape index: {}]   ;;  %s9857_s15 = inlined_call_operand.vmem [shape: f32[72,54], index: 15, kind: input, shape index: {}]   ;;  %s9858_s16 = inlined_call_operand.vmem [shape: f32[3,32,16], index: 16, kind: input, shape index: {}]   ;;  %s9859_s17 = inlined_call_operand.vmem [shape: f32[1,16], index: 17, kind: input, shape index: {}]   ;;  %s9860_s18 = inlined_call_operand.vmem [shape: f32[8,22], index: 18, kind: input, shape index: {}]   ;;  %s9861_s19 = inlined_call_operand.vmem [shape: f32[16,25], index: 19, kind: input, shape index: {}]   ;;  %s9862_s20 = inlined_call_operand.vmem [shape: f32[1,25], index: 20, kind: input, shape index: {}]   ;;  %s9863_s21 = inlined_call_operand.vmem [shape: f32[256,3], index: 21, kind: output, shape index: {0}]   ;;  %s9864_s22 = inlined_call_operand.vmem [shape: f32[16,25], index: 22, kind: output, shape index: {1}]  }
   0x1   :  { %9871 = sst [smem:[#allocation4_spill]] %s9842_s0 }
   0x2   :  { %9872 = sst [smem:[#allocation5_spill]] %s9843_s1 }
   0x3   :  { %9873 = sst [smem:[#allocation6_spill]] %s9844_s2 }
   0x4   :  { %9874 = sst [smem:[#allocation7_spill]] %s9845_s3  ;;  %s7703_s3 = smov 0  }
   0x5   :  { %9875 = sst [smem:[#allocation8_spill]] %s9846_s4 }
   0x6   :  { %9876 = sst [smem:[#allocation9_spill]] %s9847_s5 }
   0x7   :  { %9877 = sst [smem:[#allocation10_spill]] %s9848_s6 }
   0x8 LB: > { %s7709_s28 = sadd.s32 4294967295, %s7577_s3   ;;  %p6118_p0 = scmp.ge.s32.totalorder %s7577_s3, 1  ;;  %s7577_s3 = sphi %s7703_s3, %s33_s3  }
   0x9   : > { %p616_p1 = scmp.lt.s32.totalorder %s7577_s3, 3 }
   0xb   : > { %p617_p2 = pnand %p6118_p0, %p616_p1 }
   0xc   : > { %s9878_s4 = sld [smem:[#allocation5_spill]] (!%p617_p2)  ;;  %s6119_s24 = sshll.u32 (!%p617_p2), %s7709_s28, 4  ;;  %vm725_vm0 = vcmask (!%p617_p2), 261120   ;;  %vm1863_vm1 = vcmask (!%p617_p2), 1045504   ;;  %vm2016_vm2 = vcmask (!%p617_p2), 1044480   ;;  %vm2169_vm3 = vcmask (!%p617_p2), 1043456  }
   0xd   : > { %620 = sbr.rel (%p617_p2) target bundleno = 3319 (0xcf7), region = 104  ;;  %p683_p3 = scmp.lt.s32.totalorder (!%p617_p2), %s6119_s24, 31  ;;  %vm1491_vm4 = vcmask (!%p617_p2), 1040384   ;;  %vm1337_vm5 = vcmask (!%p617_p2), 1041408   ;;  %vm1742_vm6 = vcmask (!%p617_p2), 1046528   ;;  %vm1216_vm7 = vcmask (!%p617_p2), 1042432  }
   0xe   : > { %s9879_s27 = sld [smem:[#allocation7_spill]] (!%p617_p2)  ;;  %s9880_s23 = sld [smem:[#allocation4_spill]] (!%p617_p2)  ;;  %vm1426_vm8 = vcmask (!%p617_p2), 523520   ;;  %vm1580_vm9 = vcmask (!%p617_p2), 785920   ;;  %vm1677_vm10 = vcmask (!%p617_p2), 1048320   ;;  %vm1120_vm11 = vcmask (!%p617_p2), 195584  }
   0xf   : > { %s9881_s0 = sld [smem:[#allocation6_spill]] (!%p617_p2)  ;;  %s9882_s5 = sld [smem:[#allocation8_spill]] (!%p617_p2)  ;;  %vm2570_vm12 = vcmask (!%p617_p2), 1047808   ;;  %vm4014_vm13 = vcmask (!%p617_p2), 392192   ;;  %vm4336_vm15 = vcmask (!%p617_p2), 23552  }
  0x10   : > { %s9883_s26 = sld [smem:[#allocation9_spill]] (!%p617_p2)  ;;  %s7580_s30 = smov (!%p617_p2), 96  }
  0x11   : > { %p694_p4 = scmp.lt.s32.totalorder (!%p617_p2), %s7709_s28, 1 }
  0x12   : > { %v714_v0 = vld [vmem:[%s9878_s4] sm:$0xff] (!%p617_p2)  ;;  %v715_v1 = vld [vmem:[%s9878_s4 + $0x8] sm:$0xff] (!%p617_p2)  ;;  %v716_v2 = vld [vmem:[%s9878_s4 + $0x10] sm:$0xff] (!%p617_p2) }
  0x13   : > { %v7082_v3 = vpack.c.bf16 (!%p617_p2), %v715_v1, %v714_v0  ;;  %v717_v4 = vld [vmem:[%s9878_s4 + $0x18] sm:$0xff] (!%p617_p2) }
  0x14   : > { %v935_v5 = vld [vmem:[%s9879_s27] sm:$0xff]  ;;  %v936_v6 = vld [vmem:[%s9879_s27 + $0x8] sm:$0xff]  ;;  %v7086_v7 = vpack.c.bf16 %v717_v4, %v716_v2  ;;  %v937_v9 = vld [vmem:[%s9879_s27 + $0x10] sm:$0xff]  ;;  %s9887_s24 = smov (!%p683_p3, %s6119_s24), 31  ;;  %s9889_s28 = smov (!%p694_p4, %s7709_s28), 1 }
  0x15   : > { %v7090_v8 = vpack.c.bf16 %v936_v6, %v935_v5  ;;  %v938_v10 = vld [vmem:[%s9879_s27 + $0x18] sm:$0xff]  ;;  %7083 = vmatprep.subr.bf16.mxu0 %v7082_v3  ;;  %v939_v12 = vld [vmem:[%s9879_s27 + $0x20] sm:$0xff]  ;;  %v940_v13 = vld [vmem:[%s9879_s27 + $0x28] sm:$0xff]  ;;  %s9868_s29 = sshll.u32 %s9887_s24, 3  ;;  %s9885_s25 = sshll.u32 %s9887_s24, 3 }
  0x16   : > { %v7094_v11 = vpack.c.bf16 %v938_v10, %v937_v9  ;;  %7085 = vmatpush3.bf16.msra.mxu0 %v7082_v3  ;;  %s7752_s1 = scalar_lea.vmem %s9880_s23, %s9868_s29  ;;  %v7098_v14 = vpack.c.bf16 %v940_v13, %v939_v12  ;;  %v941_v16 = vld [vmem:[%s9879_s27 + $0x30] sm:$0xff]  ;;  %v942_v17 = vld [vmem:[%s9879_s27 + $0x38] sm:$0xff]  ;;  %v943_v21 = vld [vmem:[%s9879_s27 + $0x40] sm:$0xff]  ;;  %s7585_s24 = smov 48  }
  0x17   : > { %7091 = vmatprep.subr.bf16.mxu1 %v7090_v8  ;;  %7087 = vmatprep.subr.bf16.mxu0 %v7086_v7  ;;  %v698_v15 = vld [vmem:[%s7752_s1] sm:$0xff]  ;;  %v699_v18 = vld [vmem:[%s7752_s1 + $0x8] sm:$0xff]  ;;  %v700_v19 = vld [vmem:[%s7752_s1 + $0x10] sm:$0xff]  ;;  %v7102_v20 = vpack.c.bf16 %v942_v17, %v941_v16 }
  0x18   : > { %7093 = vmatpush3.bf16.msra.mxu1 %v7090_v8  ;;  %6658 = vmatprep.mubr.msk.f32.mxu0 %vm725_vm0, %v698_v15  ;;  %v944_v22 = vld [vmem:[%s9879_s27 + $0x48] sm:$0xff]  ;;  %v701_v23 = vld [vmem:[%s7752_s1 + $0x18] sm:$0xff]  ;;  %v702_v24 = vld [vmem:[%s7752_s1 + $0x20] sm:$0xff] }
  0x19   : > { %7095 = vmatprep.subr.bf16.mxu1 %v7094_v11  ;;  %v7106_v25 = vpack.c.bf16 %v944_v22, %v943_v21  ;;  %v945_v26 = vld [vmem:[%s9879_s27 + $0x50] sm:$0xff]  ;;  %v946_v27 = vld [vmem:[%s9879_s27 + $0x58] sm:$0xff]  ;;  %v703_v28 = vld [vmem:[%s7752_s1 + $0x28] sm:$0xff] }
  0x1a   : > { %7089 = vmatpush3.bf16.msra.mxu0 %v7086_v7  ;;  %v704_v29 = vld [vmem:[%s7752_s1 + $0x30] sm:$0xff]  ;;  %v7110_v30 = vpack.c.bf16 %v946_v27, %v945_v26  ;;  %v947_v31 = vld [vmem:[%s9879_s27 + $0x60] sm:$0xff]  ;;  %v948_v32 = vld [vmem:[%s9879_s27 + $0x68] sm:$0xff] }
  0x1b   : > { %v705_v33 = vld [vmem:[%s7752_s1 + $0x38] sm:$0xff]  ;;  %v706_v34 = vld [vmem:[%s7752_s1 + $0x40] sm:$0xff]  ;;  %v7114_v35 = vpack.c.bf16 %v948_v32, %v947_v31  ;;  %v707_v36 = vld [vmem:[%s7752_s1 + $0x48] sm:$0xff]  ;;  %v7579_v31 = vmov 0.0  }
  0x1c   : > { %7097 = vmatpush3.bf16.msra.mxu1 %v7094_v11  ;;  %v708_v37 = vld [vmem:[%s7752_s1 + $0x50] sm:$0xff]  ;;  %v709_v38 = vld [vmem:[%s7752_s1 + $0x58] sm:$0xff]  ;;  %v710_v39 = vld [vmem:[%s7752_s1 + $0x60] sm:$0xff]  ;;  %1136 = vst [vmem:[#allocation2 + $0x30] sm:$0xff] %v7579_v31 }
  0x1d   : > { %7099 = vmatprep.subr.bf16.mxu1 %v7098_v14  ;;  %6659 = vmatmul.mubr.msk.f32.vlgmr.msra.gmra.mrb[0].mxu0 %vm725_vm0, %v699_v18  ;;  %v711_v40 = vld [vmem:[%s7752_s1 + $0x68] sm:$0xff]  ;;  %v712_v41 = vld [vmem:[%s7752_s1 + $0x70] sm:$0xff]  ;;  %v713_v42 = vld [vmem:[%s7752_s1 + $0x78] sm:$0xff]  ;;  %1119 = vst [vmem:[#allocation2] sm:$0xff] %v7579_v31  ;;  %s7582_s1 = smov 64  }
  0x1e   : > { %6661 = vmatprep.mubr.msk.f32.mxu0 %vm725_vm0, %v700_v19  ;;  %v949_v43 = vld [vmem:[%s9879_s27 + $0x70] sm:$0xff]  ;;  %v950_v44 = vld [vmem:[%s9879_s27 + $0x78] sm:$0xff]  ;;  %v6124_v46 = vld [vmem:[%s9881_s0] ss:$0 sm:$0xff]  ;;  %1122 = vst [vmem:[#allocation2 + $0x40] sm:$0xff] %v7579_v31  ;;  %s7581_s0 = smov 32  }
  0x1f   : > { %v7118_v45 = vpack.c.bf16 %v950_v44, %v949_v43  ;;  %1124 = vst [vmem:[#allocation2 + $0x80] sm:$0xff] %v7579_v31  ;;  %1126 = vst [vmem:[#allocation2 + $0xc0] sm:$0xff] %v7579_v31  ;;  %v7822_v32 = vld [vmem:[%s9882_s5] ss:$0 sm:$0xff]  ;;  %v2324_v44 = vld [vmem:[%s9883_s26 + $0x90] sm:$0xff]  ;;  %s9210_s5 = scalar_lea.vmem %s9863_s21, %s9885_s25 }
  0x20   : > { %7101 = vmatpush3.bf16.msra.mxu1 %v7098_v14  ;;  %1128 = vst [vmem:[#allocation2 + $0x100] sm:$0xff] %v7579_v31  ;;  %1130 = vst [vmem:[#allocation2 + $0x140] sm:$0xff] %v7579_v31 }
  0x21   : > { %7103 = vmatprep.subr.bf16.mxu1 %v7102_v20  ;;  %6662 = vmatmul.mubr.msk.f32.gmra.mrb[2].mxu0 %vm725_vm0, %v701_v23  ;;  %1132 = vst [vmem:[#allocation2 + $0x180] sm:$0xff] %v7579_v31  ;;  %1134 = vst [vmem:[#allocation2 + $0x1c0] sm:$0xff] %v7579_v31 }
  0x22   : > { %6664 = vmatprep.mubr.msk.f32.mxu0 %vm725_vm0, %v702_v24  ;;  %1138 = vst [vmem:[#allocation2 + $0x70] sm:$0xff] %v7579_v31  ;;  %1140 = vst [vmem:[#allocation2 + $0xb0] sm:$0xff] %v7579_v31 }
  0x23   : > { %1142 = vst [vmem:[#allocation2 + $0xf0] sm:$0xff] %v7579_v31  ;;  %1144 = vst [vmem:[#allocation2 + $0x130] sm:$0xff] %v7579_v31 }
  0x24   : > { %7105 = vmatpush3.bf16.msra.mxu1 %v7102_v20  ;;  %1146 = vst [vmem:[#allocation2 + $0x170] sm:$0xff] %v7579_v31  ;;  %1148 = vst [vmem:[#allocation2 + $0x1b0] sm:$0xff] %v7579_v31 }
  0x25   : > { %7107 = vmatprep.subr.bf16.mxu1 %v7106_v25  ;;  %6665 = vmatmul.mubr.msk.f32.gmra.mrb[4].mxu0 %vm725_vm0, %v703_v28  ;;  %1150 = vst [vmem:[#allocation2 + $0x1f0] sm:$0xff] %v7579_v31 }
  0x26   : > { %6667 = vmatprep.mubr.msk.f32.mxu0 %vm725_vm0, %v704_v29 }
  0x28   : > { %7109 = vmatpush3.bf16.msra.mxu1 %v7106_v25 }
  0x29   : > { %7111 = vmatprep.subr.bf16.mxu1 %v7110_v30  ;;  %6668 = vmatmul.mubr.msk.f32.gmra.mrb[6].mxu0 %vm725_vm0, %v705_v33  ;;  %v2322_v33 = vld [vmem:[%s9883_s26 + $0x80] sm:$0xff] }
  0x2a   : > { %6670 = vmatprep.mubr.msk.f32.mxu0 %vm725_vm0, %v706_v34  ;;  %v2323_v34 = vld [vmem:[%s9883_s26 + $0x88] sm:$0xff] }
  0x2c   : > { %7113 = vmatpush3.bf16.msra.mxu1 %v7110_v30 }
  0x2d   : > { %7115 = vmatprep.subr.bf16.mxu1 %v7114_v35  ;;  %6671 = vmatmul.mubr.msk.f32.gmra.mrb[8].mxu0 %vm725_vm0, %v707_v36  ;;  %v7122_v36 = vpack.c.bf16 %v2323_v34, %v2322_v33  ;;  %v1289_v34 = vld [vmem:[#allocation2] sm:$0xc0] }
  0x2e   : > { %6673 = vmatprep.mubr.msk.f32.mxu0 %vm725_vm0, %v708_v37  ;;  %v2306_v37 = vld [vmem:[%s9883_s26] sm:$0xff] }
  0x2f   : > { %7123 = vmatprep.subr.bf16.mxu0 %v7122_v36 }
  0x30   : > { %7117 = vmatpush3.bf16.msra.mxu1 %v7114_v35 }
  0x31   : > { %6674 = vmatmul.mubr.msk.f32.gmra.mrb[10].mxu0 %vm725_vm0, %v709_v38  ;;  %7119 = vmatprep.subr.bf16.mxu1 %v7118_v45  ;;  %v2307_v38 = vld [vmem:[%s9883_s26 + $0x8] sm:$0xff] }
  0x32   : > { %6676 = vmatprep.mubr.msk.f32.mxu0 %vm725_vm0, %v710_v39 }
  0x34   : > { %7121 = vmatpush3.bf16.msra.mxu1 %v7118_v45  ;;  %v2325_v45 = vld [vmem:[%s9883_s26 + $0x98] sm:$0xff] }
  0x35   : > { %6677 = vmatmul.mubr.msk.f32.gmra.mrb[12].mxu0 %vm725_vm0, %v711_v40 }
  0x36   : > { %6679 = vmatprep.mubr.msk.f32.mxu0 %vm725_vm0, %v712_v41  ;;  %v7124_v41 = vpack.c.bf16 %v2307_v38, %v2306_v37 }
  0x38   : > { %7125 = vmatpush3.bf16.msra.mxu0 %v7124_v41 }
  0x39   : > { %6680 = vmatmul.mubr.msk.f32.gmra.mrb[14].mxu0 %vm725_vm0, %v713_v42 }
  0xf0   : > { %v6660_v47 = vpop.f32.mrb[0].mxu0 }
  0xf1   : > { %v846_v48 = vadd.f32 %v6660_v47, %v6124_v46  ;;  %v840_v49 = vpop.f32.mrb[1].mxu0 }
  0xf2   : > { %v841_v50 = vadd.f32 %v6124_v46, %v840_v49  ;;  %v2308_v49 = vld [vmem:[%s9883_s26 + $0x10] sm:$0xff] }
  0xf3   : > { %v920_v53 = vmax.f32 %v846_v48, 0.0  ;;  %v7126_v48 = vpack.c.bf16 %v2325_v45, %v2324_v44  ;;  %v1338_v45 = vrot.slane %v1289_v34, 6 }
  0xf4   : > { %v919_v51 = vmax.f32 %v841_v50, 0.0  ;;  %v6663_v52 = vpop.f32.mrb[2].mxu0  ;;  %v2309_v50 = vld [vmem:[%s9883_s26 + $0x18] sm:$0xff] }
  0xf5   : > { %v856_v54 = vadd.f32 %v6663_v52, %v6124_v46  ;;  %v850_v55 = vpop.f32.mrb[3].mxu0  ;;  %7127 = vmatprep.subr.bf16.mxu0 %v7126_v48  ;;  %v1696_v48 = vld [vmem:[#allocation2 + $0x30] sm:$0x1] }
  0xf6   : > { %6714 = vmatprep.mubr.f32.mxu1 %v919_v51  ;;  %v851_v56 = vadd.f32 %v6124_v46, %v850_v55 }
  0xf7   : > { %6715 = vmatmul.mubr.f32.vlgmr.msra.gmra.mrb[0].mxu1 %v920_v53  ;;  %v922_v57 = vmax.f32 %v856_v54, 0.0  ;;  %v7128_v53 = vpack.c.bf16 %v2309_v50, %v2308_v49 }
  0xf8   : > { %v921_v58 = vmax.f32 %v851_v56, 0.0  ;;  %v6666_v59 = vpop.f32.mrb[4].mxu0  ;;  %v2326_v56 = vld [vmem:[%s9883_s26 + $0xa0] sm:$0xff] }
  0xf9   : > { %v866_v60 = vadd.f32 %v6666_v59, %v6124_v46  ;;  %v860_v61 = vpop.f32.mrb[5].mxu0  ;;  %7129 = vmatpush3.bf16.msra.mxu0 %v7128_v53 }
  0xfa   : > { %6717 = vmatprep.mubr.f32.mxu1 %v921_v58  ;;  %v861_v62 = vadd.f32 %v6124_v46, %v860_v61  ;;  %v1817_v58 = vld [vmem:[#allocation2 + $0x30] sm:$0x3] }
  0xfb   : > { %6718 = vmatmul.mubr.f32.gmra.mrb[2].mxu1 %v922_v57  ;;  %v924_v63 = vmax.f32 %v866_v60, 0.0  ;;  %v2327_v57 = vld [vmem:[%s9883_s26 + $0xa8] sm:$0xff] }
  0xfc   : > { %v923_v0 = vmax.f32 %v861_v62, 0.0  ;;  %v6669_v1 = vpop.f32.mrb[6].mxu0  ;;  %v7130_v61 = vpack.c.bf16 %v2327_v57, %v2326_v56  ;;  %v2310_v62 = vld [vmem:[%s9883_s26 + $0x20] sm:$0xff]  ;;  %v2312_v56 = vld [vmem:[%s9883_s26 + $0x30] sm:$0xff]  ;;  %v2313_v57 = vld [vmem:[%s9883_s26 + $0x38] sm:$0xff] }
  0xfd   : > { %v876_v2 = vadd.f32 %v6669_v1, %v6124_v46  ;;  %v870_v3 = vpop.f32.mrb[7].mxu0 }
  0xfe   : > { %6720 = vmatprep.mubr.f32.mxu1 %v923_v0  ;;  %v871_v4 = vadd.f32 %v6124_v46, %v870_v3  ;;  %7131 = vmatprep.subr.bf16.mxu0 %v7130_v61 }
  0xff   : > { %6721 = vmatmul.mubr.f32.gmra.mrb[4].mxu1 %v924_v63  ;;  %v926_v5 = vmax.f32 %v876_v2, 0.0  ;;  %v2311_v63 = vld [vmem:[%s9883_s26 + $0x28] sm:$0xff] }
 0x100   : > { %v925_v6 = vmax.f32 %v871_v4, 0.0  ;;  %v6672_v7 = vpop.f32.mrb[8].mxu0  ;;  %v7132_v2 = vpack.c.bf16 %v2311_v63, %v2310_v62  ;;  %v1867_v4 = vrot.slane %v1817_v58, 2  ;;  %v2330_v63 = vld [vmem:[%s9883_s26 + $0xc0] sm:$0xff] }
 0x101   : > { %v886_v8 = vadd.f32 %v6672_v7, %v6124_v46  ;;  %v880_v9 = vpop.f32.mrb[9].mxu0  ;;  %v2329_v7 = vld [vmem:[%s9883_s26 + $0xb8] sm:$0xff] }
 0x102   : > { %6723 = vmatprep.mubr.f32.mxu1 %v925_v6  ;;  %v881_v10 = vadd.f32 %v6124_v46, %v880_v9  ;;  %7133 = vmatpush3.bf16.msra.mxu0 %v7132_v2  ;;  %v2328_v6 = vld [vmem:[%s9883_s26 + $0xb0] sm:$0xff] }
 0x103   : > { %6724 = vmatmul.mubr.f32.gmra.mrb[6].mxu1 %v926_v5  ;;  %v928_v11 = vmax.f32 %v886_v8, 0.0  ;;  %v1970_v9 = vld [vmem:[#allocation2 + $0x30] sm:$0x7] }
 0x104   : > { %v927_v12 = vmax.f32 %v881_v10, 0.0  ;;  %v6675_v13 = vpop.f32.mrb[10].mxu0 }
 0x105   : > { %v896_v14 = vadd.f32 %v6675_v13, %v6124_v46  ;;  %v890_v15 = vpop.f32.mrb[11].mxu0 }
 0x106   : > { %6726 = vmatprep.mubr.f32.mxu1 %v927_v12  ;;  %v891_v16 = vadd.f32 %v6124_v46, %v890_v15 }
 0x107   : > { %6727 = vmatmul.mubr.f32.gmra.mrb[8].mxu1 %v928_v11  ;;  %v930_v17 = vmax.f32 %v896_v14, 0.0  ;;  %v7134_v11 = vpack.c.bf16 %v2329_v7, %v2328_v6  ;;  %v2315_v6 = vld [vmem:[%s9883_s26 + $0x48] sm:$0xff] }
 0x108   : > { %v929_v18 = vmax.f32 %v891_v16, 0.0  ;;  %v6678_v19 = vpop.f32.mrb[12].mxu0  ;;  %v2020_v16 = vrot.slane %v1970_v9, 3  ;;  %v1820_v9 = vld [vmem:[#allocation2 + $0x70] sm:$0x3] }
 0x109   : > { %v906_v20 = vadd.f32 %v6678_v19, %v6124_v46  ;;  %v900_v21 = vpop.f32.mrb[13].mxu0  ;;  %7135 = vmatprep.subr.bf16.mxu0 %v7134_v11 }
 0x10a   : > { %6729 = vmatprep.mubr.f32.mxu1 %v929_v18  ;;  %v901_v22 = vadd.f32 %v6124_v46, %v900_v21 }
 0x10b   : > { %6730 = vmatmul.mubr.f32.gmra.mrb[10].mxu1 %v930_v17  ;;  %v932_v23 = vmax.f32 %v906_v20, 0.0  ;;  %v2123_v20 = vld [vmem:[#allocation2 + $0x30] sm:$0xf] }
 0x10c   : > { %v931_v24 = vmax.f32 %v901_v22, 0.0  ;;  %v6681_v25 = vpop.f32.mrb[14].mxu0  ;;  %v1443_v22 = vld [vmem:[#allocation2] sm:$0x80] }
 0x10d   : > { %v916_v26 = vadd.f32 %v6681_v25, %v6124_v46  ;;  %v910_v27 = vpop.f32.mrb[15].mxu0  ;;  %v2173_v25 = vrot.slane %v2123_v20, 4 }
 0x10e   : > { %6732 = vmatprep.mubr.f32.mxu1 %v931_v24  ;;  %v911_v28 = vadd.f32 %v6124_v46, %v910_v27 }
 0x10f   : > { %6733 = vmatmul.mubr.f32.gmra.mrb[12].mxu1 %v932_v23  ;;  %v934_v29 = vmax.f32 %v916_v26, 0.0 }
 0x110   : > { %v933_v30 = vmax.f32 %v911_v28, 0.0  ;;  %v1492_v28 = vrot.slane %v1443_v22, 7 }
 0x112   : > { %6735 = vmatprep.mubr.f32.mxu1 %v933_v30 }
 0x113   : > { %6736 = vmatmul.mubr.f32.gmra.mrb[14].mxu1 %v934_v29 }
 0x1ca   : > { %v6716_v35 = vpop.f32.mrb[0].mxu1 }
 0x1cb   : > { %v1030_v39 = vadd.f32 %v6716_v35, %v7822_v32  ;;  %v1024_v40 = vpop.f32.mrb[1].mxu1 }
 0x1cc   : > { %v1025_v42 = vadd.f32 %v7822_v32, %v1024_v40 }
 0x1cd   : > { %v1104_v43 = vmax.f32 %v1030_v39, 0.0 }
 0x1ce   : > { %v1103_v46 = vmax.f32 %v1025_v42, 0.0  ;;  %v6719_v47 = vpop.f32.mrb[2].mxu1 }
 0x1cf   : > { %1153 = vst.msk [vmem:[#allocation2 + $0x20] sm:$0xff] %vm725_vm0, %v1104_v43  ;;  %v1040_v51 = vadd.f32 %v6719_v47, %v7822_v32  ;;  %v1034_v52 = vpop.f32.mrb[3].mxu1 }
 0x1d0   : > { %1152 = vst.msk [vmem:[#allocation2 + $0x10] sm:$0xff] %vm725_vm0, %v1103_v46  ;;  %v1035_v54 = vadd.f32 %v7822_v32, %v1034_v52 }
 0x1d1   : > { %v1106_v55 = vmax.f32 %v1040_v51, 0.0 }
 0x1d2   : > { %v1105_v59 = vmax.f32 %v1035_v54, 0.0  ;;  %v6722_v60 = vpop.f32.mrb[4].mxu1 }
 0x1d3   : > { %1155 = vst.msk [vmem:[#allocation2 + $0x60] sm:$0xff] %vm725_vm0, %v1106_v55  ;;  %v1050_v0 = vadd.f32 %v6722_v60, %v7822_v32  ;;  %v1044_v1 = vpop.f32.mrb[5].mxu1  ;;  %v1746_v55 = vrot.slane %v1696_v48, 1 }
 0x1d4   : > { %1154 = vst.msk [vmem:[#allocation2 + $0x50] sm:$0xff] %vm725_vm0, %v1105_v59  ;;  %v1045_v3 = vadd.f32 %v7822_v32, %v1044_v1 }
 0x1d5   : > { %v1108_v5 = vmax.f32 %v1050_v0, 0.0 }
 0x1d6   : > { %v7876_v8 = vld [vmem:[#allocation2 + $0x20] sm:$0xff]  ;;  %v1107_v10 = vmax.f32 %v1045_v3, 0.0  ;;  %v6725_v17 = vpop.f32.mrb[6].mxu1 }
 0x1d7   : > { %1631 = vrot.lane.b32.xlu1 %v7876_v8, %s7580_s30  ;;  %v1865_v12 = vrot.slane %v7876_v8, 2  ;;  %v1968_v13 = vld [vmem:[#allocation2 + $0x10] sm:$0xf8]  ;;  %1157 = vst.msk [vmem:[#allocation2 + $0xa0] sm:$0xff] %vm725_vm0, %v1108_v5  ;;  %v2018_v15 = vrot.slane %v7876_v8, 3  ;;  %v1054_v21 = vpop.f32.mrb[7].mxu1  ;;  %v1060_v35 = vadd.f32 %v6725_v17, %v7822_v32 }
 0x1d8   : > { %1156 = vst.msk [vmem:[#allocation2 + $0x90] sm:$0xff] %vm725_vm0, %v1107_v10  ;;  %v7886_v18 = vld [vmem:[#allocation2 + $0x10] sm:$0xff]  ;;  %v2017_v19 = vrot.slane %v1968_v13, 3  ;;  %v2171_v24 = vrot.slane %v7876_v8, 4  ;;  %v1291_v33 = vld [vmem:[#allocation2 + $0x20] sm:$0x3f]  ;;  %v1055_v47 = vadd.f32 %v7822_v32, %v1054_v21  ;;  %v7136_v13 = vpack.c.bf16 %v2313_v57, %v2312_v56 }
 0x1d9   : > { %v1868_v14 = vsel %vm1863_vm1, %v1865_v12, %v1867_v4  ;;  %v2021_v23 = vsel %vm2016_vm2, %v2018_v15, %v2020_v16  ;;  %v1493_v29 = vrot.slane %v7886_v18, 7  ;;  %v1815_v30 = vld [vmem:[#allocation2 + $0x10] sm:$0xfc]  ;;  %v1339_v41 = vrot.slane %v7886_v18, 6  ;;  %v1445_v46 = vld [vmem:[#allocation2 + $0x20] sm:$0x7f] }
 0x1da   : > { %1906 = vrot.lane.b32.xlu0 %v1868_v14, %s7581_s0  ;;  %v6728_v26 = vpop.f32.mrb[8].mxu1  ;;  %v2019_v27 = vsel %vm2016_vm2, %v2017_v19, %v2018_v15  ;;  %v2174_v37 = vsel %vm2169_vm3, %v2171_v24, %v2173_v25  ;;  %v1864_v38 = vrot.slane %v1815_v30, 2  ;;  %v1341_v42 = vrot.slane %v1291_v33, 6  ;;  %v2121_v51 = vld [vmem:[#allocation2 + $0x10] sm:$0xf0]  ;;  %v2331_v4 = vld [vmem:[%s9883_s26 + $0xc8] sm:$0xff]  ;;  %7137 = vmatpush3.bf16.msra.mxu0 %v7136_v13 }
 0x1db   : > { %1629 = vrot.lane.b32.xlu1 %v7886_v18, %s7580_s30  ;;  %v1064_v31 = vpop.f32.mrb[9].mxu1  ;;  %v1494_v40 = vsel %vm1491_vm4, %v1492_v28, %v1493_v29  ;;  %v1110_v43 = vmax.f32 %v1060_v35, 0.0  ;;  %v1109_v52 = vmax.f32 %v1055_v47, 0.0  ;;  %v1495_v54 = vrot.slane %v1445_v46, 7  ;;  %v1694_v62 = vld [vmem:[#allocation2 + $0x10] sm:$0xfe] }
 0x1dc   : > { %v1866_v50 = vsel %vm1863_vm1, %v1864_v38, %v1865_v12  ;;  %v1342_v53 = vsel %vm1337_vm5, %v1339_v41, %v1341_v42  ;;  %v1340_v58 = vsel %vm1337_vm5, %v1338_v45, %v1339_v41  ;;  %v1070_v59 = vadd.f32 %v6728_v26, %v7822_v32  ;;  %v2314_v5 = vld [vmem:[%s9883_s26 + $0x40] sm:$0xff]  ;;  %v1973_v33 = vld [vmem:[#allocation2 + $0x70] sm:$0x7]  ;;  %v2333_v41 = vld [vmem:[%s9883_s26 + $0xd8] sm:$0xff] }
 0x1dd   : > { %1159 = vst.msk [vmem:[#allocation2 + $0xe0] sm:$0xff] %vm725_vm0, %v1110_v43  ;;  %1158 = vst.msk [vmem:[#allocation2 + $0xd0] sm:$0xff] %vm725_vm0, %v1109_v52  ;;  %v1065_v60 = vadd.f32 %v7822_v32, %v1064_v31  ;;  %v2170_v0 = vrot.slane %v2121_v51, 4  ;;  %v1744_v2 = vrot.slane %v7876_v8, 1  ;;  %v7936_v7 = vld [vmem:[#allocation2 + $0x60] sm:$0xff]  ;;  %v1496_v14 = vsel %vm1491_vm4, %v1493_v29, %v1495_v54  ;;  %v2316_v57 = vld [vmem:[%s9883_s26 + $0x50] sm:$0xff] }
 0x1de   : > { %2059 = vrot.lane.b32.xlu0 %v2021_v23, %s7582_s1  ;;  %v6731_v36 = vpop.f32.mrb[10].mxu1  ;;  %v1112_v10 = vmax.f32 %v1070_v59, 0.0  ;;  %v1170_v19 = vld [vmem:[#allocation2 + $0x20] sm:$0x1f]  ;;  %v1743_v21 = vrot.slane %v1694_v62, 1  ;;  %v7138_v22 = vpack.c.bf16 %v2331_v4, %v2330_v63  ;;  %v7140_v23 = vpack.c.bf16 %v2315_v6, %v2314_v5  ;;  %v2317_v59 = vld [vmem:[%s9883_s26 + $0x58] sm:$0xff] }
 0x1df   : > { %2057 = vrot.lane.b32.xlu1 %v2019_v27, %s7582_s1  ;;  %v1074_v39 = vpop.f32.mrb[11].mxu1  ;;  %v1080_v61 = vadd.f32 %v6731_v36, %v7822_v32  ;;  %v1111_v11 = vmax.f32 %v1065_v60, 0.0  ;;  %v1747_v16 = vsel %vm1742_vm6, %v1744_v2, %v1746_v55  ;;  %v1168_v25 = vld [vmem:[#allocation2] sm:$0xe0]  ;;  %v1870_v26 = vrot.slane %v7936_v7, 2  ;;  %v7959_v36 = vld [vmem:[#allocation2 + $0x50] sm:$0xff] }
 0x1e0   : > { %v1075_v1 = vadd.f32 %v7822_v32, %v1074_v39  ;;  %1161 = vst.msk [vmem:[#allocation2 + $0x120] sm:$0xff] %vm725_vm0, %v1112_v10  ;;  %1800 = vst.msk [vmem:[#allocation3 + $0x18] sm:$0xff] %vm725_vm0, %v1747_v16  ;;  %v1872_v27 = vrot.slane %v1820_v9, 2  ;;  %v2172_v28 = vsel %vm2169_vm3, %v2170_v0, %v2171_v24  ;;  %v1745_v30 = vsel %vm1742_vm6, %v1743_v21, %v1744_v2  ;;  %v1292_v8 = vld [vmem:[#allocation2 + $0x40] sm:$0xc0]  ;;  %v2319_v6 = vld [vmem:[%s9883_s26 + $0x68] sm:$0xff] }
 0x1e1   : > { %v1114_v12 = vmax.f32 %v1080_v61, 0.0  ;;  %1160 = vst.msk [vmem:[#allocation2 + $0x110] sm:$0xff] %vm725_vm0, %v1111_v11  ;;  %v1220_v31 = vrot.slane %v1170_v19, 5  ;;  %7139 = vmatprep.subr.bf16.mxu0 %v7138_v22  ;;  %1799 = vst.msk [vmem:[#allocation3 + $0x8] sm:$0xff] %vm725_vm0, %v1745_v30  ;;  %v1218_v34 = vrot.slane %v7886_v18, 5  ;;  %v1217_v35 = vrot.slane %v1168_v25, 5 }
 0x1e2   : > { %2212 = vrot.lane.b32.xlu0 %v2174_v37, %s7580_s30  ;;  %v6734_v44 = vpop.f32.mrb[12].mxu1  ;;  %v1113_v15 = vmax.f32 %v1075_v1, 0.0  ;;  %7141 = vmatpush3.bf16.msra.mxu0 %v7140_v23  ;;  %v1873_v38 = vsel %vm1863_vm1, %v1870_v26, %v1872_v27  ;;  %v2023_v18 = vrot.slane %v7936_v7, 3  ;;  %v2025_v39 = vrot.slane %v1973_v33, 3  ;;  %v2126_v45 = vld [vmem:[#allocation2 + $0x70] sm:$0xf] }
 0x1e3   : > { %1532 = vrot.lane.b32.xlu1 %v1494_v40, %s7582_s1  ;;  %v1084_v49 = vpop.f32.mrb[13].mxu1  ;;  %v1090_v3 = vadd.f32 %v6734_v44, %v7822_v32  ;;  %1163 = vst.msk [vmem:[#allocation2 + $0x160] sm:$0xff] %vm725_vm0, %v1114_v12  ;;  %v1221_v24 = vsel %vm1216_vm7, %v1218_v34, %v1220_v31  ;;  %v2332_v40 = vld [vmem:[%s9883_s26 + $0xd0] sm:$0xff]  ;;  %v1343_v43 = vrot.slane %v1292_v8, 6  ;;  %v1344_v44 = vrot.slane %v7959_v36, 6  ;;  %v2334_v60 = vld [vmem:[%s9883_s26 + $0xe0] sm:$0xff] }
 0x1e4   : > { %v1085_v20 = vadd.f32 %v7822_v32, %v1084_v49  ;;  %1162 = vst.msk [vmem:[#allocation2 + $0x150] sm:$0xff] %vm725_vm0, %v1113_v15  ;;  %1274 = vst.msk [vmem:[#allocation3 + $0x10] sm:$0xff] %vm725_vm0, %v1221_v24  ;;  %v1219_v46 = vsel %vm1216_vm7, %v1217_v35, %v1218_v34  ;;  %v1446_v47 = vld [vmem:[#allocation2 + $0x40] sm:$0x80]  ;;  %v7142_v48 = vpack.c.bf16 %v2333_v41, %v2332_v40  ;;  %v2178_v51 = vrot.slane %v2126_v45, 4  ;;  %v2335_v61 = vld [vmem:[%s9883_s26 + $0xe8] sm:$0xff] }
 0x1e5   : > { %v1116_v17 = vmax.f32 %v1090_v3, 0.0  ;;  %1273 = vst.msk [vmem:[#allocation3] sm:$0xff] %vm725_vm0, %v1219_v46  ;;  %v2026_v49 = vsel %vm2016_vm2, %v2023_v18, %v2025_v39  ;;  %v1345_v52 = vsel %vm1337_vm5, %v1343_v43, %v1344_v44  ;;  %v1498_v54 = vrot.slane %v7959_v36, 7  ;;  %v1818_v55 = vld [vmem:[#allocation2 + $0x50] sm:$0xfc]  ;;  %v2318_v5 = vld [vmem:[%s9883_s26 + $0x60] sm:$0xff] }
 0x1e6   : > { %1904 = vrot.lane.b32.xlu0 %v1866_v50, %s7581_s0  ;;  %v1115_v29 = vmax.f32 %v1085_v20, 0.0  ;;  %v7963_v37 = vpop.f32.mrb[14].mxu1  ;;  %v2176_v50 = vrot.slane %v7936_v7, 4  ;;  %7143 = vmatprep.subr.bf16.mxu0 %v7142_v48  ;;  %v1294_v56 = vld [vmem:[#allocation2 + $0x60] sm:$0x3f]  ;;  %v1869_v63 = vrot.slane %v1818_v55, 2  ;;  %v7144_v10 = vpack.c.bf16 %v2317_v59, %v2316_v57 }
 0x1e7   : > { %1380 = vrot.lane.b32.xlu1 %v1342_v53, %s7581_s0  ;;  %1165 = vst.msk [vmem:[#allocation2 + $0x1a0] sm:$0xff] %vm725_vm0, %v1116_v17  ;;  %v7976_v42 = vpop.f32.mrb[15].mxu1  ;;  %v1497_v53 = vrot.slane %v1446_v47, 7  ;;  %v1448_v0 = vld [vmem:[#allocation2 + $0x60] sm:$0x7f]  ;;  %v1346_v3 = vrot.slane %v1294_v56, 6  ;;  %v7146_v11 = vpack.c.bf16 %v2335_v61, %v2334_v60  ;;  %v7148_v21 = vpack.c.bf16 %v2319_v6, %v2318_v5 }
 0x1e8   : > { %1164 = vst.msk [vmem:[#allocation2 + $0x190] sm:$0xff] %vm725_vm0, %v1115_v29  ;;  %v2179_v62 = vsel %vm2169_vm3, %v2176_v50, %v2178_v51  ;;  %v1171_v1 = vld [vmem:[#allocation2 + $0x40] sm:$0xe0]  ;;  %v1971_v4 = vld [vmem:[#allocation2 + $0x50] sm:$0xf8]  ;;  %v2337_v13 = vld [vmem:[%s9883_s26 + $0xf8] sm:$0xff]  ;;  %v1871_v16 = vsel %vm1863_vm1, %v1869_v63, %v1870_v26  ;;  %7145 = vmatpush3.bf16.msra.mxu0 %v7144_v10  ;;  %v1100_v8 = vadd.f32 %v7963_v37, %v7822_v32 }
 0x1e9   : > { %v1499_v2 = vsel %vm1491_vm4, %v1497_v53, %v1498_v54  ;;  %v2336_v12 = vld [vmem:[%s9883_s26 + $0xf0] sm:$0xff]  ;;  %v1222_v15 = vrot.slane %v1171_v1, 5  ;;  %v2022_v17 = vrot.slane %v1971_v4, 3  ;;  %v1500_v19 = vrot.slane %v1448_v0, 7  ;;  %7147 = vmatprep.subr.bf16.mxu0 %v7146_v11  ;;  %v2321_v26 = vld [vmem:[%s9883_s26 + $0x78] sm:$0xff]  ;;  %v8053_v37 = vld [vmem:[#allocation2 + $0xa0] sm:$0xff] }
 0x1ea   : > { %1378 = vrot.lane.b32.xlu0 %v1340_v58, %s7581_s0  ;;  %v1699_v58 = vld [vmem:[#allocation2 + $0x70] sm:$0x1]  ;;  %v2124_v20 = vld [vmem:[#allocation2 + $0x50] sm:$0xf0]  ;;  %v1347_v22 = vsel %vm1337_vm5, %v1344_v44, %v1346_v3  ;;  %v7150_v25 = vpack.c.bf16 %v2337_v13, %v2336_v12  ;;  %v1173_v30 = vld [vmem:[#allocation2 + $0x60] sm:$0x1f]  ;;  %v1095_v39 = vadd.f32 %v7822_v32, %v7976_v42 }
 0x1eb   : > { %1534 = vrot.lane.b32.xlu1 %v1496_v14, %s7582_s1  ;;  %v1751_v9 = vrot.slane %v1699_v58, 1  ;;  %v1749_v14 = vrot.slane %v7936_v7, 1  ;;  %v2320_v27 = vld [vmem:[%s9883_s26 + $0x70] sm:$0xff]  ;;  %v2175_v31 = vrot.slane %v2124_v20, 4  ;;  %v2024_v24 = vsel %vm2016_vm2, %v2022_v17, %v2023_v18  ;;  %v1174_v45 = vld [vmem:[#allocation2 + $0x80] sm:$0xe0] }
 0x1ec   : > { %v1697_v29 = vld [vmem:[#allocation2 + $0x50] sm:$0xfe]  ;;  %7149 = vmatpush3.bf16.msra.mxu0 %v7148_v21  ;;  %v1702_v41 = vld [vmem:[#allocation2 + $0xb0] sm:$0x1]  ;;  %v1501_v43 = vsel %vm1491_vm4, %v1498_v54, %v1500_v19  ;;  %v1118_v44 = vmax.f32 %v1100_v8, 0.0  ;;  %v1225_v18 = vrot.slane %v1173_v30, 5 }
 0x1ed   : > { %v1752_v23 = vsel %vm1742_vm6, %v1749_v14, %v1751_v9  ;;  %v1823_v33 = vld [vmem:[#allocation2 + $0xb0] sm:$0x3]  ;;  %v1748_v40 = vrot.slane %v1697_v29, 1  ;;  %7151 = vmatprep.subr.bf16.mxu0 %v7150_v25  ;;  %v1117_v47 = vmax.f32 %v1095_v39, 0.0  ;;  %v1756_v53 = vrot.slane %v1702_v41, 1  ;;  %v1704_v61 = vld [vmem:[#allocation2 + $0xe0] sm:$0xff] }
 0x1ee   : > { %2210 = vrot.lane.b32.xlu0 %v2172_v28, %s7580_s30  ;;  %v1223_v28 = vrot.slane %v7959_v36, 5  ;;  %1802 = vst.msk [vmem:[#allocation3 + $0x38] sm:$0xff] %vm725_vm0, %v1752_v23  ;;  %v8038_v34 = vld [vmem:[#allocation2 + $0xb0] sm:$0x7]  ;;  %v1877_v42 = vrot.slane %v1823_v33, 2  ;;  %1167 = vst.msk [vmem:[#allocation2 + $0x1e0] sm:$0xff] %vm725_vm0, %v1118_v44  ;;  %v2177_v54 = vsel %vm2169_vm3, %v2175_v31, %v2176_v50 }
 0x1ef   : > { %1635 = vrot.lane.b32.xlu1 %v7936_v7, %s7580_s30  ;;  %v8056_v46 = vld [vmem:[#allocation2 + $0xb0] sm:$0xf]  ;;  %v1750_v48 = vsel %vm1742_vm6, %v1748_v40, %v1749_v14  ;;  %v2030_v51 = vrot.slane %v8038_v34, 3  ;;  %v1875_v55 = vrot.slane %v8053_v37, 2  ;;  %1166 = vst.msk [vmem:[#allocation2 + $0x1d0] sm:$0xff] %vm725_vm0, %v1117_v47  ;;  %v1227_v57 = vrot.slane %v1174_v45, 5 }
 0x1f0   : > { %v1224_v35 = vsel %vm1216_vm7, %v1222_v15, %v1223_v28  ;;  %v8059_v32 = vld [vmem:[#allocation2 + $0xf0] sm:$0x1]  ;;  %1801 = vst.msk [vmem:[#allocation3 + $0x28] sm:$0xff] %vm725_vm0, %v1750_v48  ;;  %v1177_v58 = vld [vmem:[#allocation2 + $0xc0] sm:$0xe0]  ;;  %v2183_v59 = vrot.slane %v8056_v46, 4 }
 0x1f1   : > { %1275 = vst.msk [vmem:[#allocation3 + $0x20] sm:$0xff] %vm725_vm0, %v1224_v35  ;;  %v8076_v60 = vld [vmem:[#allocation2 + $0x80] sm:$0x80]  ;;  %v1754_v7 = vrot.slane %v8053_v37, 1  ;;  %v1700_v50 = vld [vmem:[#allocation2 + $0x90] sm:$0xfe]  ;;  %v1878_v10 = vsel %vm1863_vm1, %v1875_v55, %v1877_v42 }
 0x1f2   : > { %1910 = vrot.lane.b32.xlu0 %v1873_v38, %s7581_s0  ;;  %v7152_v38 = vpack.c.bf16 %v2321_v26, %v2320_v27  ;;  %v1176_v0 = vld [vmem:[#allocation2 + $0xa0] sm:$0x1f]  ;;  %v1178_v1 = vld [vmem:[#allocation2 + $0xd0] sm:$0xff]  ;;  %v2028_v3 = vrot.slane %v8053_v37, 3  ;;  %v1232_v5 = vrot.slane %v1177_v58, 5  ;;  %v1753_v14 = vrot.slane %v1700_v50, 1 }
 0x1f3   : > { %1633 = vrot.lane.b32.xlu1 %v7959_v36, %s7580_s30  ;;  %v8046_v36 = vld [vmem:[#allocation2 + $0x80] sm:$0xc0]  ;;  %v1757_v4 = vsel %vm1742_vm6, %v1754_v7, %v1756_v53  ;;  %v1708_v6 = vld [vmem:[#allocation2 + $0x130] sm:$0x1]  ;;  %v1179_v15 = vld [vmem:[#allocation2 + $0xe0] sm:$0x1f] }
 0x1f4   : > { %v1348_v56 = vrot.slane %v8046_v36, 6  ;;  %7153 = vmatpush3.bf16.msra.mxu0 %v7152_v38  ;;  %v1180_v9 = vld [vmem:[#allocation2 + $0x100] sm:$0xe0]  ;;  %1804 = vst.msk [vmem:[#allocation3 + $0x58] sm:$0xff] %vm725_vm0, %v1757_v4  ;;  %v1759_v17 = vrot.slane %v1704_v61, 1  ;;  %v1233_v19 = vrot.slane %v1178_v1, 5  ;;  %v1755_v23 = vsel %vm1742_vm6, %v1753_v14, %v1754_v7 }
 0x1f5   : > { %v8089_v12 = vld [vmem:[#allocation2 + $0x120] sm:$0xff]  ;;  %v1181_v21 = vld [vmem:[#allocation2 + $0x110] sm:$0xff]  ;;  %v1766_v25 = vrot.slane %v1708_v6, 1  ;;  %v1237_v27 = vrot.slane %v1180_v9, 5  ;;  %1803 = vst.msk [vmem:[#allocation3 + $0x48] sm:$0xff] %vm725_vm0, %v1755_v23  ;;  %v1235_v30 = vrot.slane %v1179_v15, 5  ;;  %v2031_v33 = vsel %vm2016_vm2, %v2028_v3, %v2030_v51 }
 0x1f6   : > { %2063 = vrot.lane.b32.xlu0 %v2026_v49, %s7582_s1  ;;  %v8061_v49 = vld [vmem:[#allocation2 + $0x90] sm:$0xff]  ;;  %v1764_v31 = vrot.slane %v8089_v12, 1  ;;  %v2181_v34 = vrot.slane %v8053_v37, 4  ;;  %v8110_v8 = vld [vmem:[#allocation2 + $0xa0] sm:$0x7f]  ;;  %v1238_v36 = vrot.slane %v1181_v21, 5  ;;  %v1234_v40 = vsel %vm1216_vm7, %v1232_v5, %v1233_v19 }
 0x1f7   : > { %1382 = vrot.lane.b32.xlu1 %v1345_v52, %s7581_s0  ;;  %v1226_v52 = vsel %vm1216_vm7, %v1223_v28, %v1225_v18  ;;  %v1228_v63 = vrot.slane %v8061_v49, 5  ;;  %v1349_v11 = vrot.slane %v8061_v49, 6  ;;  %v1821_v26 = vld [vmem:[#allocation2 + $0x90] sm:$0xfc]  ;;  %v8099_v28 = vld [vmem:[#allocation2 + $0xa0] sm:$0x3f]  ;;  %v1236_v51 = vsel %vm1216_vm7, %v1233_v19, %v1235_v30 }
 0x1f8   : > { %1276 = vst.msk [vmem:[#allocation3 + $0x30] sm:$0xff] %vm725_vm0, %v1226_v52  ;;  %v8108_v35 = vld [vmem:[#allocation2 + $0x90] sm:$0xf8]  ;;  %v1503_v39 = vrot.slane %v8061_v49, 7  ;;  %v1182_v44 = vld [vmem:[#allocation2 + $0x120] sm:$0x1f]  ;;  %v1767_v52 = vsel %vm1742_vm6, %v1764_v31, %v1766_v25 }
 0x1f9   : > { %v1229_v13 = vsel %vm1216_vm7, %v1227_v57, %v1228_v63  ;;  %v1350_v38 = vsel %vm1337_vm5, %v1348_v56, %v1349_v11  ;;  %v1874_v18 = vrot.slane %v1821_v26, 2  ;;  %v1351_v45 = vrot.slane %v8099_v28, 6  ;;  %v8124_v47 = vld [vmem:[#allocation2 + $0x90] sm:$0xf0]  ;;  %v8126_v48 = vld [vmem:[#allocation2 + $0x160] sm:$0xff]  ;;  %1279 = vst.msk [vmem:[#allocation3 + $0x60] sm:$0xff] %vm725_vm0, %v1234_v40 }
 0x1fa   : > { %2216 = vrot.lane.b32.xlu0 %v2179_v62, %s7580_s30  ;;  %v1761_v62 = vrot.slane %v8059_v32, 1  ;;  %1277 = vst.msk [vmem:[#allocation3 + $0x40] sm:$0xff] %vm725_vm0, %v1229_v13  ;;  %v2027_v32 = vrot.slane %v8108_v35, 3  ;;  %v8131_v42 = vld [vmem:[#allocation2 + $0x150] sm:$0xff]  ;;  %v2184_v56 = vsel %vm2169_vm3, %v2181_v34, %v2183_v59  ;;  %1280 = vst.msk [vmem:[#allocation3 + $0x70] sm:$0xff] %vm725_vm0, %v1236_v51  ;;  %v1239_v57 = vsel %vm1216_vm7, %v1237_v27, %v1238_v36 }
 0x1fb   : > { %1536 = vrot.lane.b32.xlu1 %v1499_v2, %s7582_s1  ;;  %v1703_v2 = vld [vmem:[#allocation2 + $0xd0] sm:$0xfe]  ;;  %v1711_v53 = vld [vmem:[#allocation2 + $0x170] sm:$0x1]  ;;  %1808 = vst.msk [vmem:[#allocation3 + $0x98] sm:$0xff] %vm725_vm0, %v1767_v52  ;;  %v1505_v61 = vrot.slane %v8110_v8, 7  ;;  %v1352_v19 = vsel %vm1337_vm5, %v1349_v11, %v1351_v45 }
 0x1fc   : > { %v1758_v20 = vrot.slane %v1703_v2, 1  ;;  %v1709_v7 = vld [vmem:[#allocation2 + $0x150] sm:$0xfe]  ;;  %v1185_v50 = vld [vmem:[#allocation2 + $0x160] sm:$0x1f]  ;;  %v2180_v59 = vrot.slane %v8124_v47, 4 }
 0x1fd   : > { %1281 = vst.msk [vmem:[#allocation3 + $0x80] sm:$0xff] %vm725_vm0, %v1239_v57  ;;  %v1771_v4 = vrot.slane %v1711_v53, 1  ;;  %v1186_v6 = vld [vmem:[#allocation2 + $0x180] sm:$0xe0]  ;;  %v1712_v9 = vld [vmem:[#allocation2 + $0x190] sm:$0xfe]  ;;  %v1506_v45 = vsel %vm1491_vm4, %v1503_v39, %v1505_v61 }
 0x1fe   : > { %1908 = vrot.lane.b32.xlu0 %v1871_v16, %s7581_s0  ;;  %v1230_v16 = vrot.slane %v1176_v0, 5  ;;  %v1760_v41 = vsel %vm1742_vm6, %v1758_v20, %v1759_v17  ;;  %v1714_v0 = vld [vmem:[#allocation2 + $0x1b0] sm:$0x1]  ;;  %v1243_v14 = vrot.slane %v8131_v42, 5  ;;  %v1768_v15 = vrot.slane %v1709_v7, 1  ;;  %v8167_v20 = vld [vmem:[#allocation2 + $0x1e0] sm:$0xff] }
 0x1ff   : > { %1384 = vrot.lane.b32.xlu1 %v1347_v22, %s7581_s0  ;;  %v1502_v22 = vrot.slane %v8076_v60, 7  ;;  %1805 = vst.msk [vmem:[#allocation3 + $0x68] sm:$0xff] %vm725_vm0, %v1760_v41  ;;  %v1240_v60 = vrot.slane %v1182_v44, 5  ;;  %v8159_v13 = vld [vmem:[#allocation2 + $0x190] sm:$0xff]  ;;  %v1247_v28 = vrot.slane %v1186_v6, 5  ;;  %v1773_v8 = vrot.slane %v1712_v9, 1 }
 0x200   : > { %v1231_v29 = vsel %vm1216_vm7, %v1228_v63, %v1230_v16  ;;  %v1769_v63 = vrot.slane %v8126_v48, 1  ;;  %v1245_v16 = vrot.slane %v1185_v50, 5  ;;  %v1717_v23 = vld [vmem:[#allocation2 + $0x1f0] sm:$0x1]  ;;  %v1715_v30 = vld [vmem:[#allocation2 + $0x1d0] sm:$0xfe]  ;;  %v2182_v57 = vsel %vm2169_vm3, %v2180_v59, %v2181_v34 }
 0x201   : > { %1278 = vst.msk [vmem:[#allocation3 + $0x50] sm:$0xff] %vm725_vm0, %v1231_v29  ;;  %v1504_v46 = vsel %vm1491_vm4, %v1502_v22, %v1503_v39  ;;  %v1241_v2 = vsel %vm1216_vm7, %v1238_v36, %v1240_v60  ;;  %v1776_v22 = vrot.slane %v1714_v0, 1  ;;  %v8172_v25 = vld [vmem:[#allocation2 + $0x1d0] sm:$0xff]  ;;  %v1189_v29 = vld [vmem:[#allocation2 + $0x1c0] sm:$0xe0]  ;;  %v1248_v35 = vrot.slane %v8159_v13, 5 }
 0x202   : > { %2061 = vrot.lane.b32.xlu0 %v2024_v24, %s7582_s1  ;;  %v1762_v24 = vsel %vm1742_vm6, %v1759_v17, %v1761_v62  ;;  %v8149_v62 = vld [vmem:[#allocation2 + $0x1a0] sm:$0xff]  ;;  %1282 = vst.msk [vmem:[#allocation3 + $0x90] sm:$0xff] %vm725_vm0, %v1241_v2  ;;  %v1772_v21 = vsel %vm1742_vm6, %v1769_v63, %v1771_v4  ;;  %v1770_v26 = vsel %vm1742_vm6, %v1768_v15, %v1769_v63  ;;  %v1781_v40 = vrot.slane %v1717_v23, 1  ;;  %v1826_v51 = vld [vmem:[#allocation2 + $0xf0] sm:$0x3] }
 0x203   : > { %1538 = vrot.lane.b32.xlu1 %v1501_v43, %s7582_s1  ;;  %1806 = vst.msk [vmem:[#allocation3 + $0x78] sm:$0xff] %vm725_vm0, %v1762_v24  ;;  %v1706_v43 = vld [vmem:[#allocation2 + $0x110] sm:$0xfe]  ;;  %v1188_v17 = vld [vmem:[#allocation2 + $0x1a0] sm:$0x1f]  ;;  %1810 = vst.msk [vmem:[#allocation3 + $0xb8] sm:$0xff] %vm725_vm0, %v1772_v21  ;;  %v1246_v11 = vsel %vm1216_vm7, %v1243_v14, %v1245_v16 }
 0x204   : > { %v1763_v58 = vrot.slane %v1706_v43, 1  ;;  %1809 = vst.msk [vmem:[#allocation3 + $0xa8] sm:$0xff] %vm725_vm0, %v1770_v26  ;;  %1284 = vst.msk [vmem:[#allocation3 + $0xb0] sm:$0xff] %vm725_vm0, %v1246_v11  ;;  %v1191_v24 = vld [vmem:[#allocation2 + $0x1e0] sm:$0x1f]  ;;  %v1250_v36 = vrot.slane %v1188_v17, 5 }
 0x205   : > { %v1252_v41 = vrot.slane %v1189_v29, 5  ;;  %v1253_v44 = vrot.slane %v8172_v25, 5  ;;  %v1882_v60 = vrot.slane %v1826_v51, 2  ;;  %v1979_v7 = vld [vmem:[#allocation2 + $0xf0] sm:$0x7]  ;;  %v2191_v51 = vrot.slane %v8089_v12, 4 }
 0x206   : > { %2214 = vrot.lane.b32.xlu0 %v2177_v54, %s7580_s30  ;;  %v1183_v54 = vld [vmem:[#allocation2 + $0x140] sm:$0xe0]  ;;  %v1765_v1 = vsel %vm1742_vm6, %v1763_v58, %v1764_v31  ;;  %v2029_v31 = vsel %vm2016_vm2, %v2027_v32, %v2028_v3  ;;  %v1249_v3 = vsel %vm1216_vm7, %v1247_v28, %v1248_v35  ;;  %v1251_v52 = vsel %vm1216_vm7, %v1248_v35, %v1250_v36  ;;  %v1603_v50 = vld [vmem:[#allocation2 + $0xd0] sm:$0xff] }
 0x207   : > { %1639 = vrot.lane.b32.xlu1 %v8053_v37, %s7580_s30  ;;  %v1242_v5 = vrot.slane %v1183_v54, 5  ;;  %1807 = vst.msk [vmem:[#allocation3 + $0x88] sm:$0xff] %vm725_vm0, %v1765_v1  ;;  %v8196_v32 = vld [vmem:[#allocation2 + $0xe0] sm:$0xff]  ;;  %1285 = vst.msk [vmem:[#allocation3 + $0xc0] sm:$0xff] %vm725_vm0, %v1249_v3  ;;  %v1255_v54 = vrot.slane %v1191_v24, 5  ;;  %v2035_v47 = vrot.slane %v1979_v7, 3 }
 0x208   : > { %1286 = vst.msk [vmem:[#allocation3 + $0xd0] sm:$0xff] %vm725_vm0, %v1251_v52  ;;  %v1880_v58 = vrot.slane %v8196_v32, 2  ;;  %v2033_v37 = vrot.slane %v8196_v32, 3  ;;  %v1354_v59 = vrot.slane %v1603_v50, 6  ;;  %v2132_v63 = vld [vmem:[#allocation2 + $0xf0] sm:$0xf] }
 0x209   : > { %v1244_v27 = vsel %vm1216_vm7, %v1242_v5, %v1243_v14  ;;  %v1452_v0 = vld [vmem:[#allocation2 + $0xc0] sm:$0x80]  ;;  %v2186_v2 = vrot.slane %v8196_v32, 4  ;;  %v2188_v4 = vrot.slane %v2132_v63, 4  ;;  %v1508_v9 = vrot.slane %v1603_v50, 7  ;;  %v1605_v36 = vld [vmem:[#allocation2 + $0x110] sm:$0xff] }
 0x20a   : > { %1914 = vrot.lane.b32.xlu0 %v1878_v10, %s7581_s0  ;;  %v1876_v10 = vsel %vm1863_vm1, %v1874_v18, %v1875_v55  ;;  %v1774_v55 = vrot.slane %v8149_v62, 1  ;;  %1283 = vst.msk [vmem:[#allocation3 + $0xa0] sm:$0xff] %vm725_vm0, %v1244_v27  ;;  %v1778_v18 = vrot.slane %v1715_v30, 1  ;;  %v1883_v61 = vsel %vm1863_vm1, %v1880_v58, %v1882_v60  ;;  %v1300_v14 = vld [vmem:[#allocation2 + $0xe0] sm:$0x3f] }
 0x20b   : > { %1637 = vrot.lane.b32.xlu1 %v8061_v49, %s7580_s30  ;;  %v1254_v49 = vsel %vm1216_vm7, %v1252_v41, %v1253_v44  ;;  %v2036_v1 = vsel %vm2016_vm2, %v2033_v37, %v2035_v47  ;;  %v1507_v6 = vrot.slane %v1452_v0, 7  ;;  %v2189_v15 = vsel %vm2169_vm3, %v2186_v2, %v2188_v4  ;;  %v1977_v21 = vld [vmem:[#allocation2 + $0xd0] sm:$0xf8]  ;;  %v1982_v24 = vld [vmem:[#allocation2 + $0x130] sm:$0x7] }
 0x20c   : > { %v1775_v43 = vsel %vm1742_vm6, %v1773_v8, %v1774_v55  ;;  %1287 = vst.msk [vmem:[#allocation3 + $0xe0] sm:$0xff] %vm725_vm0, %v1254_v49  ;;  %v2032_v23 = vrot.slane %v1977_v21, 3  ;;  %v2130_v11 = vld [vmem:[#allocation2 + $0xd0] sm:$0xf0]  ;;  %v1885_v35 = vrot.slane %v8089_v12, 2  ;;  %v2038_v41 = vrot.slane %v8089_v12, 3 }
 0x20d   : > { %1811 = vst.msk [vmem:[#allocation3 + $0xc8] sm:$0xff] %vm725_vm0, %v1775_v43  ;;  %v1509_v17 = vsel %vm1491_vm4, %v1507_v6, %v1508_v9  ;;  %v2185_v29 = vrot.slane %v2130_v11, 4  ;;  %v2040_v3 = vrot.slane %v1982_v24, 3  ;;  %v1513_v49 = vrot.slane %v1605_v36, 7  ;;  %v1830_v24 = vld [vmem:[#allocation2 + $0x150] sm:$0xfc] }
 0x20e   : > { %2067 = vrot.lane.b32.xlu0 %v2031_v33, %s7582_s1  ;;  %v1777_v33 = vsel %vm1742_vm6, %v1774_v55, %v1776_v22  ;;  %v1454_v55 = vld [vmem:[#allocation2 + $0xe0] sm:$0x7f]  ;;  %v2034_v28 = vsel %vm2016_vm2, %v2032_v23, %v2033_v37  ;;  %v2043_v21 = vrot.slane %v8126_v48, 3  ;;  %v1364_v23 = vrot.slane %v8131_v42, 6 }
 0x20f   : > { %1386 = vrot.lane.b32.xlu1 %v1350_v38, %s7581_s0  ;;  %1812 = vst.msk [vmem:[#allocation3 + $0xd8] sm:$0xff] %vm725_vm0, %v1777_v33  ;;  %v1779_v38 = vrot.slane %v8167_v20, 1  ;;  %v1510_v26 = vrot.slane %v1454_v55, 7  ;;  %v2187_v33 = vsel %vm2169_vm3, %v2185_v29, %v2186_v2  ;;  %v1832_v2 = vld [vmem:[#allocation2 + $0x170] sm:$0x3] }
 0x211   : > { %v1782_v53 = vsel %vm1742_vm6, %v1779_v38, %v1781_v40  ;;  %v1780_v39 = vsel %vm1742_vm6, %v1778_v18, %v1779_v38  ;;  %v1511_v30 = vsel %vm1491_vm4, %v1508_v9, %v1510_v26  ;;  %v1301_v38 = vld [vmem:[#allocation2 + $0x100] sm:$0xc0]  ;;  %v2135_v18 = vld [vmem:[#allocation2 + $0x130] sm:$0xf]  ;;  %v1890_v9 = vrot.slane %v8126_v48, 2 }
 0x212   : > { %2220 = vrot.lane.b32.xlu0 %v2184_v56, %s7580_s30  ;;  %1814 = vst.msk [vmem:[#allocation3 + $0xf8] sm:$0xff] %vm725_vm0, %v1782_v53  ;;  %1813 = vst.msk [vmem:[#allocation3 + $0xe8] sm:$0xff] %vm725_vm0, %v1780_v39  ;;  %v1256_v56 = vsel %vm1216_vm7, %v1253_v44, %v1255_v54  ;;  %v1358_v43 = vrot.slane %v1301_v38, 6  ;;  %v1359_v44 = vrot.slane %v1605_v36, 6  ;;  %v2193_v52 = vrot.slane %v2135_v18, 4 }
 0x213   : > { %1540 = vrot.lane.b32.xlu1 %v1504_v46, %s7582_s1  ;;  %1288 = vst.msk [vmem:[#allocation3 + $0xf0] sm:$0xff] %vm725_vm0, %v1256_v56  ;;  %v1298_v46 = vld [vmem:[#allocation2 + $0xc0] sm:$0xc0]  ;;  %v1827_v39 = vld [vmem:[#allocation2 + $0x110] sm:$0xfc] }
 0x214   : > { %v1353_v34 = vrot.slane %v1298_v46, 6  ;;  %v1360_v53 = vsel %vm1337_vm5, %v1358_v43, %v1359_v44  ;;  %v1303_v56 = vld [vmem:[#allocation2 + $0x120] sm:$0x3f]  ;;  %v1458_v26 = vld [vmem:[#allocation2 + $0x140] sm:$0x80] }
 0x215   : > { %v1361_v7 = vrot.slane %v1303_v56, 6  ;;  %v1983_v43 = vld [vmem:[#allocation2 + $0x150] sm:$0xf8] }
 0x216   : > { %1912 = vrot.lane.b32.xlu0 %v1876_v10, %s7581_s0  ;;  %v1355_v5 = vsel %vm1337_vm5, %v1353_v34, %v1354_v59  ;;  %v1824_v10 = vld [vmem:[#allocation2 + $0xd0] sm:$0xfc] }
 0x217   : > { %1388 = vrot.lane.b32.xlu1 %v1352_v19, %s7581_s0  ;;  %v1879_v16 = vrot.slane %v1824_v10, 2  ;;  %v1356_v19 = vrot.slane %v1300_v14, 6  ;;  %v1362_v37 = vsel %vm1337_vm5, %v1359_v44, %v1361_v7  ;;  %v2133_v34 = vld [vmem:[#allocation2 + $0x110] sm:$0xf0]  ;;  %v1892_v10 = vrot.slane %v1832_v2, 2 }
 0x218   : > { %v2190_v0 = vrot.slane %v2133_v34, 4  ;;  %v1985_v14 = vld [vmem:[#allocation2 + $0x170] sm:$0x7]  ;;  %v1460_v44 = vld [vmem:[#allocation2 + $0x160] sm:$0x7f]  ;;  %v2048_v2 = vrot.slane %v8149_v62, 3 }
 0x219   : > { %v1881_v22 = vsel %vm1863_vm1, %v1879_v16, %v1880_v58  ;;  %v1357_v27 = vsel %vm1337_vm5, %v1354_v59, %v1356_v19  ;;  %v1884_v58 = vrot.slane %v1827_v39, 2  ;;  %v1893_v19 = vsel %vm1863_vm1, %v1890_v9, %v1892_v10  ;;  %v2141_v10 = vld [vmem:[#allocation2 + $0x1b0] sm:$0xf] }
 0x21a   : > { %2065 = vrot.lane.b32.xlu0 %v2029_v31, %s7582_s1  ;;  %v1829_v31 = vld [vmem:[#allocation2 + $0x130] sm:$0x3]  ;;  %v2192_v6 = vsel %vm2169_vm3, %v2190_v0, %v2191_v51  ;;  %v2045_v55 = vrot.slane %v1985_v14, 3  ;;  %v1461_v14 = vld [vmem:[#allocation2 + $0x180] sm:$0x80] }
 0x21b   : > { %1542 = vrot.lane.b32.xlu1 %v1506_v45, %s7582_s1  ;;  %v1887_v8 = vrot.slane %v1829_v31, 2  ;;  %v1455_v45 = vld [vmem:[#allocation2 + $0x100] sm:$0x80]  ;;  %v1886_v46 = vsel %vm1863_vm1, %v1884_v58, %v1885_v35 }
 0x21c   : > { %v1512_v54 = vrot.slane %v1455_v45, 7  ;;  %v2046_v29 = vsel %vm2016_vm2, %v2043_v21, %v2045_v55  ;;  %v2203_v55 = vrot.slane %v2141_v10, 4 }
 0x21d   : > { %v1888_v40 = vsel %vm1863_vm1, %v1885_v35, %v1887_v8  ;;  %v1517_v35 = vrot.slane %v1458_v26, 7  ;;  %v1518_v8 = vrot.slane %v8131_v42, 7  ;;  %v1833_v26 = vld [vmem:[#allocation2 + $0x190] sm:$0xfc] }
 0x21e   : > { %2218 = vrot.lane.b32.xlu0 %v2182_v57, %s7580_s30  ;;  %v2194_v57 = vsel %vm2169_vm3, %v2191_v51, %v2193_v52  ;;  %v1514_v60 = vsel %vm1491_vm4, %v1512_v54, %v1513_v49  ;;  %v2042_v51 = vrot.slane %v1983_v43, 3  ;;  %v2136_v54 = vld [vmem:[#allocation2 + $0x150] sm:$0xf0] }
 0x21f   : > { %1643 = vrot.lane.b32.xlu1 %v8196_v32, %s7580_s30  ;;  %v2041_v32 = vsel %vm2016_vm2, %v2038_v41, %v2040_v3  ;;  %v1889_v3 = vrot.slane %v1830_v24, 2 }
 0x220   : > { %v2044_v56 = vsel %vm2016_vm2, %v2042_v51, %v2043_v21  ;;  %v2201_v21 = vrot.slane %v8149_v62, 4 }
 0x222   : > { %1918 = vrot.lane.b32.xlu0 %v1883_v61, %s7581_s0 }
 0x223   : > { %1641 = vrot.lane.b32.xlu1 %v1603_v50, %s7580_s30  ;;  %v1457_v50 = vld [vmem:[#allocation2 + $0x120] sm:$0x7f] }
 0x224   : > { %v1515_v47 = vrot.slane %v1457_v50, 7 }
 0x226   : > { %2071 = vrot.lane.b32.xlu0 %v2036_v1, %s7582_s1  ;;  %v1516_v1 = vsel %vm1491_vm4, %v1513_v49, %v1515_v47  ;;  %v1307_v47 = vld [vmem:[#allocation2 + $0x180] sm:$0xc0] }
 0x227   : > { %1390 = vrot.lane.b32.xlu1 %v1355_v5, %s7581_s0 }
 0x22a   : > { %2224 = vrot.lane.b32.xlu0 %v2189_v15, %s7580_s30  ;;  %v1304_v15 = vld [vmem:[#allocation2 + $0x140] sm:$0xc0] }
 0x22b   : > { %1544 = vrot.lane.b32.xlu1 %v1509_v17, %s7582_s1 }
 0x22e   : > { %1916 = vrot.lane.b32.xlu0 %v1881_v22, %s7581_s0  ;;  %v1363_v22 = vrot.slane %v1304_v15, 6 }
 0x22f   : > { %1392 = vrot.lane.b32.xlu1 %v1357_v27, %s7581_s0  ;;  %v2138_v27 = vld [vmem:[#allocation2 + $0x170] sm:$0xf] }
 0x230   : > { %v2198_v31 = vrot.slane %v2138_v27, 4  ;;  %v1523_v27 = vrot.slane %v8159_v13, 7 }
 0x232   : > { %2069 = vrot.lane.b32.xlu0 %v2034_v28, %s7582_s1 }
 0x233   : > { %1546 = vrot.lane.b32.xlu1 %v1511_v30, %s7582_s1  ;;  %v2196_v30 = vrot.slane %v8126_v48, 4 }
 0x236   : > { %2222 = vrot.lane.b32.xlu0 %v2187_v33, %s7580_s30  ;;  %v1365_v33 = vsel %vm1337_vm5, %v1363_v22, %v1364_v23 }
 0x237   : > { %1647 = vrot.lane.b32.xlu1 %v8089_v12, %s7580_s30  ;;  %v1980_v12 = vld [vmem:[#allocation2 + $0x110] sm:$0xf8] }
 0x238   : > { %v2037_v61 = vrot.slane %v1980_v12, 3 }
 0x23a   : > { %1922 = vrot.lane.b32.xlu0 %v1888_v40, %s7581_s0  ;;  %v2039_v63 = vsel %vm2016_vm2, %v2037_v61, %v2038_v41  ;;  %v2199_v41 = vsel %vm2169_vm3, %v2196_v30, %v2198_v31 }
 0x23b   : > { %1645 = vrot.lane.b32.xlu1 %v1605_v36, %s7580_s30  ;;  %v1306_v36 = vld [vmem:[#allocation2 + $0x160] sm:$0x3f] }
 0x23e   : > { %2075 = vrot.lane.b32.xlu0 %v2041_v32, %s7582_s1  ;;  %v1891_v32 = vsel %vm1863_vm1, %v1889_v3, %v1890_v9  ;;  %v1369_v9 = vrot.slane %v8159_v13, 6  ;;  %v2139_v3 = vld [vmem:[#allocation2 + $0x190] sm:$0xf0] }
 0x23f   : > { %1394 = vrot.lane.b32.xlu1 %v1360_v53, %s7581_s0  ;;  %v1520_v53 = vrot.slane %v1460_v44, 7  ;;  %v2200_v44 = vrot.slane %v2139_v3, 4 }
 0x241   : > { %v1521_v58 = vsel %vm1491_vm4, %v1518_v8, %v1520_v53  ;;  %v2202_v53 = vsel %vm2169_vm3, %v2200_v44, %v2201_v21 }
 0x242   : > { %2228 = vrot.lane.b32.xlu0 %v2194_v57, %s7580_s30  ;;  %v2195_v57 = vrot.slane %v2136_v54, 4  ;;  %v1900_v54 = vrot.slane %v8167_v20, 2 }
 0x243   : > { %1548 = vrot.lane.b32.xlu1 %v1514_v60, %s7582_s1  ;;  %v1835_v60 = vld [vmem:[#allocation2 + $0x1b0] sm:$0x3] }
 0x244   : > { %v2197_v50 = vsel %vm2169_vm3, %v2195_v57, %v2196_v30  ;;  %v1897_v61 = vrot.slane %v1835_v60, 2  ;;  %v1894_v30 = vrot.slane %v1833_v26, 2  ;;  %v1991_v57 = vld [vmem:[#allocation2 + $0x1f0] sm:$0x7] }
 0x246   : > { %1920 = vrot.lane.b32.xlu0 %v1886_v46, %s7581_s0  ;;  %v1895_v46 = vrot.slane %v8149_v62, 2 }
 0x247   : > { %1396 = vrot.lane.b32.xlu1 %v1362_v37, %s7581_s0  ;;  %v1988_v37 = vld [vmem:[#allocation2 + $0x1b0] sm:$0x7] }
 0x248   : > { %v1898_v0 = vsel %vm1863_vm1, %v1895_v46, %v1897_v61  ;;  %v2053_v61 = vrot.slane %v8167_v20, 3 }
 0x249   : > { %v8263_v59 = vpop.permute.xlu1 %1631 }
 0x24a   : > { %2073 = vrot.lane.b32.xlu0 %v2039_v63, %s7582_s1 }
 0x24b   : > { %1550 = vrot.lane.b32.xlu1 %v1516_v1, %s7582_s1 }
 0x24c   : > { %v1907_v4 = vpop.permute.xlu0 %1906 }
 0x24d   : > { %1953 = vst.msk [vmem:[#allocation3 + $0x18] sm:$0xff] %vm1426_vm8, %v1907_v4  ;;  %v1630_v5 = vpop.permute.xlu1 %1629  ;;  %v2050_v4 = vrot.slane %v1988_v37, 3  ;;  %v2055_v37 = vrot.slane %v1991_v57, 3 }
 0x24e   : > { %2226 = vrot.lane.b32.xlu0 %v2192_v6, %s7580_s30  ;;  %v1368_v6 = vrot.slane %v1307_v47, 6 }
 0x24f   : > { %1651 = vrot.lane.b32.xlu1 %v8126_v48, %s7580_s30  ;;  %v1519_v48 = vsel %vm1491_vm4, %v1517_v35, %v1518_v8  ;;  %v1463_v35 = vld [vmem:[#allocation2 + $0x1a0] sm:$0x7f] }
 0x250   : > { %v2060_v16 = vpop.permute.xlu0 %2059  ;;  %v1370_v22 = vsel %vm1337_vm5, %v1368_v6, %v1369_v9 }
 0x251   : > { %2106 = vst.msk [vmem:[#allocation3 + $0x18] sm:$0xff] %vm1580_vm9, %v2060_v16  ;;  %v2058_v17 = vpop.permute.xlu1 %2057 }
 0x252   : > { %1926 = vrot.lane.b32.xlu0 %v1893_v19, %s7581_s0 }
 0x253   : > { %1649 = vrot.lane.b32.xlu1 %v8131_v42, %s7580_s30  ;;  %v1366_v42 = vrot.slane %v1306_v36, 6  ;;  %v1896_v36 = vsel %vm1863_vm1, %v1894_v30, %v1895_v46  ;;  %v2144_v30 = vld [vmem:[#allocation2 + $0x1f0] sm:$0xf] }
 0x254   : > { %v2213_v11 = vpop.permute.xlu0 %2212 }
 0x255   : > { %2259 = vst.msk [vmem:[#allocation3 + $0x18] sm:$0xff] %vm1677_vm10, %v2213_v11  ;;  %v1533_v28 = vpop.permute.xlu1 %1532  ;;  %v1367_v52 = vsel %vm1337_vm5, %v1364_v23, %v1366_v42  ;;  %v1522_v23 = vrot.slane %v1461_v14, 7  ;;  %v1309_v11 = vld [vmem:[#allocation2 + $0x1a0] sm:$0x3f]  ;;  %v1989_v14 = vld [vmem:[#allocation2 + $0x1d0] sm:$0xf8] }
 0x256   : > { %2079 = vrot.lane.b32.xlu0 %v2046_v29, %s7582_s1  ;;  %v2204_v29 = vsel %vm2169_vm3, %v2201_v21, %v2203_v55  ;;  %v2052_v21 = vrot.slane %v1989_v14, 3 }
 0x257   : > { %1398 = vrot.lane.b32.xlu1 %v1365_v33, %s7581_s0  ;;  %v1524_v31 = vsel %vm1491_vm4, %v1522_v23, %v1523_v27  ;;  %v1986_v33 = vld [vmem:[#allocation2 + $0x190] sm:$0xf8] }
 0x258   : > { %v1905_v38 = vpop.permute.xlu0 %1904  ;;  %v2142_v23 = vld [vmem:[#allocation2 + $0x1d0] sm:$0xf0] }
 0x259   : > { %1952 = vst.msk [vmem:[#allocation3 + $0x8] sm:$0xff] %vm1426_vm8, %v1905_v38  ;;  %v1381_v40 = vpop.permute.xlu1 %1380  ;;  %v2047_v38 = vrot.slane %v1986_v33, 3 }
 0x25a   : > { %2105 = vst.msk [vmem:[#allocation3 + $0x8] sm:$0xff] %vm1580_vm9, %v2058_v17  ;;  %2232 = vrot.lane.b32.xlu0 %v2199_v41, %s7580_s30  ;;  %v2051_v17 = vsel %vm2016_vm2, %v2048_v2, %v2050_v4  ;;  %v1525_v41 = vrot.slane %v1463_v35, 7  ;;  %v2208_v35 = vrot.slane %v2144_v30, 4 }
 0x25b   : > { %1428 = vst.msk [vmem:[#allocation3 + $0x10] sm:$0xff] %vm1426_vm8, %v1381_v40  ;;  %1552 = vrot.lane.b32.xlu1 %v1519_v48, %s7582_s1  ;;  %v2049_v43 = vsel %vm2016_vm2, %v2047_v38, %v2048_v2 }
 0x25c   : > { %v1379_v18 = vpop.permute.xlu0 %1378 }
 0x25d   : > { %1427 = vst.msk [vmem:[#allocation3] sm:$0xff] %vm1426_vm8, %v1379_v18  ;;  %v1535_v45 = vpop.permute.xlu1 %1534  ;;  %v1526_v18 = vsel %vm1491_vm4, %v1523_v27, %v1525_v41 }
 0x25e   : > { %1581 = vst.msk [vmem:[#allocation3] sm:$0xff] %vm1580_vm9, %v1533_v28  ;;  %1582 = vst.msk [vmem:[#allocation3 + $0x10] sm:$0xff] %vm1580_vm9, %v1535_v45  ;;  %1924 = vrot.lane.b32.xlu0 %v1891_v32, %s7581_s0  ;;  %v1838_v45 = vld [vmem:[#allocation2 + $0x1f0] sm:$0x3]  ;;  %v1310_v32 = vld [vmem:[#allocation2 + $0x1c0] sm:$0xc0] }
 0x25f   : > { %1678 = vst.msk [vmem:[#allocation3] sm:$0xff] %vm1677_vm10, %v1630_v5  ;;  %1679 = vst.msk [vmem:[#allocation3 + $0x10] sm:$0xff] %vm1677_vm10, %v8263_v59  ;;  %1400 = vrot.lane.b32.xlu1 %v1367_v52, %s7581_s0  ;;  %v2277_v5 = vld [vmem:[#allocation3 + $0x18] sm:$0xff] }
 0x260   : > { %v2211_v49 = vpop.permute.xlu0 %2210 }
 0x261   : > { %2258 = vst.msk [vmem:[#allocation3 + $0x8] sm:$0xff] %vm1677_vm10, %v2211_v49  ;;  %v8307_v39 = vpop.permute.xlu1 %1635  ;;  %v1902_v49 = vrot.slane %v1838_v45, 2 }
 0x262   : > { %2077 = vrot.lane.b32.xlu0 %v2044_v56, %s7582_s1  ;;  %v1374_v56 = vrot.slane %v8172_v25, 6 }
 0x263   : > { %1554 = vrot.lane.b32.xlu1 %v1521_v58, %s7582_s1  ;;  %v1464_v58 = vld [vmem:[#allocation2 + $0x1c0] sm:$0x80] }
 0x264   : > { %v1911_v7 = vpop.permute.xlu0 %1910 }
 0x265   : > { %1955 = vst.msk [vmem:[#allocation3 + $0x38] sm:$0xff] %vm1426_vm8, %v1911_v7  ;;  %v1634_v12 = vpop.permute.xlu1 %1633 }
 0x266   : > { %2230 = vrot.lane.b32.xlu0 %v2197_v50, %s7580_s30  ;;  %v2274_v1 = vld [vmem:[#allocation3] sm:$0xff]  ;;  %v2276_v19 = vld [vmem:[#allocation3 + $0x10] sm:$0xff]  ;;  %v1903_v50 = vsel %vm1863_vm1, %v1900_v54, %v1902_v49 }
 0x267   : > { %1655 = vrot.lane.b32.xlu1 %v8149_v62, %s7580_s30 }
 0x268   : > { %v2064_v34 = vpop.permute.xlu0 %2063  ;;  %v2275_v59 = vld [vmem:[#allocation3 + $0x8] sm:$0xff] }
 0x269   : > { %2108 = vst.msk [vmem:[#allocation3 + $0x38] sm:$0xff] %vm1580_vm9, %v2064_v34  ;;  %v1383_v63 = vpop.permute.xlu1 %1382  ;;  %2409 = vmatprep.mubr.f32.mxu0 %v2275_v59  ;;  %v1527_v59 = vrot.slane %v1464_v58, 7 }
 0x26a   : > { %1429 = vst.msk [vmem:[#allocation3 + $0x20] sm:$0xff] %vm1426_vm8, %v1383_v63  ;;  %1930 = vrot.lane.b32.xlu0 %v1898_v0, %s7581_s0  ;;  %2410 = vmatmul.mubr.f32.vlgmr.msra.gmra.mrb[16].mxu0 %v2274_v1  ;;  %v1528_v63 = vrot.slane %v8172_v25, 7  ;;  %v1836_v0 = vld [vmem:[#allocation2 + $0x1d0] sm:$0xfc]  ;;  %v1312_v1 = vld [vmem:[#allocation2 + $0x1e0] sm:$0x3f] }
 0x26b   : > { %1653 = vrot.lane.b32.xlu1 %v8159_v13, %s7580_s30  ;;  %2414 = vmatprep.mubr.f32.mxu0 %v2277_v5  ;;  %v1371_v13 = vrot.slane %v1309_v11, 6  ;;  %v2056_v5 = vsel %vm2016_vm2, %v2053_v61, %v2055_v37  ;;  %v1376_v10 = vrot.slane %v1312_v1, 6  ;;  %v2054_v11 = vsel %vm2016_vm2, %v2052_v21, %v2053_v61 }
 0x26c   : > { %v2217_v15 = vpop.permute.xlu0 %2216 }
 0x26d   : > { %2261 = vst.msk [vmem:[#allocation3 + $0x38] sm:$0xff] %vm1677_vm10, %v2217_v15  ;;  %v1537_v16 = vpop.permute.xlu1 %1536  ;;  %v1372_v40 = vsel %vm1337_vm5, %v1369_v9, %v1371_v13  ;;  %v1899_v9 = vrot.slane %v1836_v0, 2  ;;  %v1466_v15 = vld [vmem:[#allocation2 + $0x1e0] sm:$0x7f]  ;;  %v1377_v55 = vsel %vm1337_vm5, %v1374_v56, %v1376_v10 }
 0x26e   : > { %1583 = vst.msk [vmem:[#allocation3 + $0x20] sm:$0xff] %vm1580_vm9, %v1537_v16  ;;  %2083 = vrot.lane.b32.xlu0 %v2051_v17, %s7582_s1  ;;  %2415 = vmatmul.mubr.f32.gmra.mrb[18].mxu0 %v2276_v19 }
 0x26f   : > { %1680 = vst.msk [vmem:[#allocation3 + $0x20] sm:$0xff] %vm1677_vm10, %v1634_v12  ;;  %1402 = vrot.lane.b32.xlu1 %v1370_v22, %s7581_s0  ;;  %v1901_v19 = vsel %vm1863_vm1, %v1899_v9, %v1900_v54  ;;  %v1530_v22 = vrot.slane %v1466_v15, 7 }
 0x270   : > { %v1909_v28 = vpop.permute.xlu0 %1908 }
 0x271   : > { %1954 = vst.msk [vmem:[#allocation3 + $0x28] sm:$0xff] %vm1426_vm8, %v1909_v28  ;;  %v1385_v62 = vpop.permute.xlu1 %1384  ;;  %v2205_v28 = vrot.slane %v2142_v23, 4 }
 0x272   : > { %1430 = vst.msk [vmem:[#allocation3 + $0x30] sm:$0xff] %vm1426_vm8, %v1385_v62  ;;  %2236 = vrot.lane.b32.xlu0 %v2204_v29, %s7580_s30  ;;  %v2206_v62 = vrot.slane %v8167_v20, 4  ;;  %v1531_v29 = vsel %vm1491_vm4, %v1528_v63, %v1530_v22 }
 0x273   : > { %1556 = vrot.lane.b32.xlu1 %v1524_v31, %s7582_s1 }
 0x274   : > { %v2062_v8 = vpop.permute.xlu0 %2061  ;;  %v2281_v34 = vld [vmem:[#allocation3 + $0x38] sm:$0xff]  ;;  %v2207_v33 = vsel %vm2169_vm3, %v2205_v28, %v2206_v62 }
 0x275   : > { %2107 = vst.msk [vmem:[#allocation3 + $0x28] sm:$0xff] %vm1580_vm9, %v2062_v8  ;;  %v1539_v24 = vpop.permute.xlu1 %1538 }
 0x276   : > { %1584 = vst.msk [vmem:[#allocation3 + $0x30] sm:$0xff] %vm1580_vm9, %v1539_v24  ;;  %1928 = vrot.lane.b32.xlu0 %v1896_v36, %s7581_s0  ;;  %v2278_v46 = vld [vmem:[#allocation3 + $0x20] sm:$0xff]  ;;  %v2209_v36 = vsel %vm2169_vm3, %v2206_v62, %v2208_v35 }
 0x277   : > { %1681 = vst.msk [vmem:[#allocation3 + $0x30] sm:$0xff] %vm1677_vm10, %v8307_v39  ;;  %1404 = vrot.lane.b32.xlu1 %v1372_v40, %s7581_s0  ;;  %v1373_v39 = vrot.slane %v1310_v32, 6 }
 0x278   : > { %v2215_v48 = vpop.permute.xlu0 %2214 }
 0x279   : > { %2260 = vst.msk [vmem:[#allocation3 + $0x28] sm:$0xff] %vm1677_vm10, %v2215_v48  ;;  %v8351_v42 = vpop.permute.xlu1 %1639  ;;  %v1375_v47 = vsel %vm1337_vm5, %v1373_v39, %v1374_v56 }
 0x27a   : > { %2081 = vrot.lane.b32.xlu0 %v2049_v43, %s7582_s1 }
 0x27b   : > { %1558 = vrot.lane.b32.xlu1 %v1526_v18, %s7582_s1 }
 0x27c   : > { %v1915_v51 = vpop.permute.xlu0 %1914 }
 0x27d   : > { %1957 = vst.msk [vmem:[#allocation3 + $0x58] sm:$0xff] %vm1426_vm8, %v1915_v51  ;;  %v1638_v52 = vpop.permute.xlu1 %1637 }
 0x27e   : > { %2234 = vrot.lane.b32.xlu0 %v2202_v53, %s7580_s30  ;;  %v2280_v6 = vld [vmem:[#allocation3 + $0x30] sm:$0xff] }
 0x27f   : > { %1657 = vrot.lane.b32.xlu1 %v8172_v25, %s7580_s30  ;;  %v1529_v25 = vsel %vm1491_vm4, %v1527_v59, %v1528_v63 }
 0x280   : > { %v2068_v60 = vpop.permute.xlu0 %2067  ;;  %v2279_v7 = vld [vmem:[#allocation3 + $0x28] sm:$0xff] }
 0x281   : > { %2110 = vst.msk [vmem:[#allocation3 + $0x58] sm:$0xff] %vm1580_vm9, %v2068_v60  ;;  %v1387_v12 = vpop.permute.xlu1 %1386  ;;  %2419 = vmatprep.mubr.f32.mxu0 %v2279_v7 }
 0x282   : > { %1431 = vst.msk [vmem:[#allocation3 + $0x40] sm:$0xff] %vm1426_vm8, %v1387_v12  ;;  %1934 = vrot.lane.b32.xlu0 %v1903_v50, %s7581_s0  ;;  %2420 = vmatmul.mubr.f32.gmra.mrb[20].mxu0 %v2278_v46 }
 0x283   : > { %1406 = vrot.lane.b32.xlu1 %v1375_v47, %s7581_s0  ;;  %2424 = vmatprep.mubr.f32.mxu0 %v2281_v34 }
 0x284   : > { %v2221_v2 = vpop.permute.xlu0 %2220 }
 0x285   : > { %2263 = vst.msk [vmem:[#allocation3 + $0x58] sm:$0xff] %vm1677_vm10, %v2221_v2  ;;  %v1541_v4 = vpop.permute.xlu1 %1540 }
 0x286   : > { %1585 = vst.msk [vmem:[#allocation3 + $0x40] sm:$0xff] %vm1580_vm9, %v1541_v4  ;;  %2087 = vrot.lane.b32.xlu0 %v2056_v5, %s7582_s1  ;;  %2425 = vmatmul.mubr.f32.gmra.mrb[22].mxu0 %v2280_v6 }
 0x287   : > { %1682 = vst.msk [vmem:[#allocation3 + $0x40] sm:$0xff] %vm1677_vm10, %v1638_v52  ;;  %1560 = vrot.lane.b32.xlu1 %v1529_v25, %s7582_s1 }
 0x288   : > { %v1913_v16 = vpop.permute.xlu0 %1912 }
 0x289   : > { %1956 = vst.msk [vmem:[#allocation3 + $0x48] sm:$0xff] %vm1426_vm8, %v1913_v16  ;;  %v1389_v17 = vpop.permute.xlu1 %1388 }
 0x28a   : > { %1432 = vst.msk [vmem:[#allocation3 + $0x50] sm:$0xff] %vm1426_vm8, %v1389_v17  ;;  %1932 = vrot.lane.b32.xlu0 %v1901_v19, %s7581_s0 }
 0x28b   : > { %1408 = vrot.lane.b32.xlu1 %v1377_v55, %s7581_s0 }
 0x28c   : > { %v2066_v27 = vpop.permute.xlu0 %2065  ;;  %v2285_v48 = vld [vmem:[#allocation3 + $0x58] sm:$0xff] }
 0x28d   : > { %2109 = vst.msk [vmem:[#allocation3 + $0x48] sm:$0xff] %vm1580_vm9, %v2066_v27  ;;  %v1543_v26 = vpop.permute.xlu1 %1542 }
 0x28e   : > { %1586 = vst.msk [vmem:[#allocation3 + $0x50] sm:$0xff] %vm1580_vm9, %v1543_v26  ;;  %2085 = vrot.lane.b32.xlu0 %v2054_v11, %s7582_s1  ;;  %v2282_v3 = vld [vmem:[#allocation3 + $0x40] sm:$0xff] }
 0x28f   : > { %1683 = vst.msk [vmem:[#allocation3 + $0x50] sm:$0xff] %vm1677_vm10, %v8351_v42  ;;  %1562 = vrot.lane.b32.xlu1 %v1531_v29, %s7582_s1  ;;  %s6123_s1 = sshll.u32 %s9889_s28, 3 }
 0x290   : > { %v2219_v31 = vpop.permute.xlu0 %2218  ;;  %s697_s23 = scalar_lea.vmem %s9864_s22, %s6123_s1 }
 0x291   : > { %2262 = vst.msk [vmem:[#allocation3 + $0x48] sm:$0xff] %vm1677_vm10, %v2219_v31  ;;  %v1644_v13 = vpop.permute.xlu1 %1643 }
 0x292   : > { %2238 = vrot.lane.b32.xlu0 %v2207_v33, %s7580_s30 }
 0x293   : > { %1659 = vrot.lane.b32.xlu1 %v8167_v20, %s7580_s30 }
 0x294   : > { %v1919_v8 = vpop.permute.xlu0 %1918 }
 0x295   : > { %1959 = vst.msk [vmem:[#allocation3 + $0x78] sm:$0xff] %vm1426_vm8, %v1919_v8  ;;  %v1642_v24 = vpop.permute.xlu1 %1641 }
 0x296   : > { %2240 = vrot.lane.b32.xlu0 %v2209_v36, %s7580_s30  ;;  %v2284_v43 = vld [vmem:[#allocation3 + $0x50] sm:$0xff]  ;;  %s9884_s30 = sld [smem:[#allocation10_spill]] }
 0x298   : > { %v2072_v38 = vpop.permute.xlu0 %2071  ;;  %v2283_v40 = vld [vmem:[#allocation3 + $0x48] sm:$0xff] }
 0x299   : > { %2112 = vst.msk [vmem:[#allocation3 + $0x78] sm:$0xff] %vm1580_vm9, %v2072_v38  ;;  %v1391_v41 = vpop.permute.xlu1 %1390  ;;  %2429 = vmatprep.mubr.f32.mxu0 %v2283_v40 }
 0x29a   : > { %1433 = vst.msk [vmem:[#allocation3 + $0x60] sm:$0xff] %vm1426_vm8, %v1391_v41  ;;  %2430 = vmatmul.mubr.f32.gmra.mrb[24].mxu0 %v2282_v3 }
 0x29b   : > { %2434 = vmatprep.mubr.f32.mxu0 %v2285_v48 }
 0x29c   : > { %v2225_v20 = vpop.permute.xlu0 %2224 }
 0x29d   : > { %2265 = vst.msk [vmem:[#allocation3 + $0x78] sm:$0xff] %vm1677_vm10, %v2225_v20  ;;  %v1545_v42 = vpop.permute.xlu1 %1544 }
 0x29e   : > { %1587 = vst.msk [vmem:[#allocation3 + $0x60] sm:$0xff] %vm1580_vm9, %v1545_v42  ;;  %2435 = vmatmul.mubr.f32.gmra.mrb[26].mxu0 %v2284_v43 }
 0x29f   : > { %1684 = vst.msk [vmem:[#allocation3 + $0x60] sm:$0xff] %vm1677_vm10, %v1642_v24 }
 0x2a0   : > { %v1917_v44 = vpop.permute.xlu0 %1916 }
 0x2a1   : > { %1958 = vst.msk [vmem:[#allocation3 + $0x68] sm:$0xff] %vm1426_vm8, %v1917_v44  ;;  %v1393_v18 = vpop.permute.xlu1 %1392 }
 0x2a2   : > { %1434 = vst.msk [vmem:[#allocation3 + $0x70] sm:$0xff] %vm1426_vm8, %v1393_v18 }
 0x2a4   : > { %v2070_v45 = vpop.permute.xlu0 %2069  ;;  %v2289_v58 = vld [vmem:[#allocation3 + $0x78] sm:$0xff] }
 0x2a5   : > { %2111 = vst.msk [vmem:[#allocation3 + $0x68] sm:$0xff] %vm1580_vm9, %v2070_v45  ;;  %v1547_v32 = vpop.permute.xlu1 %1546 }
 0x2a6   : > { %1588 = vst.msk [vmem:[#allocation3 + $0x70] sm:$0xff] %vm1580_vm9, %v1547_v32  ;;  %v2286_v57 = vld [vmem:[#allocation3 + $0x60] sm:$0xff] }
 0x2a7   : > { %1685 = vst.msk [vmem:[#allocation3 + $0x70] sm:$0xff] %vm1677_vm10, %v1644_v13 }
 0x2a8   : > { %v2223_v51 = vpop.permute.xlu0 %2222 }
 0x2a9   : > { %2264 = vst.msk [vmem:[#allocation3 + $0x68] sm:$0xff] %vm1677_vm10, %v2223_v51  ;;  %v1648_v52 = vpop.permute.xlu1 %1647 }
 0x2ac   : > { %v1923_v53 = vpop.permute.xlu0 %1922 }
 0x2ad   : > { %1961 = vst.msk [vmem:[#allocation3 + $0x98] sm:$0xff] %vm1426_vm8, %v1923_v53  ;;  %v1646_v54 = vpop.permute.xlu1 %1645 }
 0x2ae   : > { %v2288_v12 = vld [vmem:[#allocation3 + $0x70] sm:$0xff] }
 0x2b0   : > { %v2076_v49 = vpop.permute.xlu0 %2075  ;;  %v2287_v39 = vld [vmem:[#allocation3 + $0x68] sm:$0xff] }
 0x2b1   : > { %2114 = vst.msk [vmem:[#allocation3 + $0x98] sm:$0xff] %vm1580_vm9, %v2076_v49  ;;  %v1395_v56 = vpop.permute.xlu1 %1394  ;;  %2439 = vmatprep.mubr.f32.mxu0 %v2287_v39  ;;  %v2796_v39 = vld [vmem:[%s9849_s7] sm:$0xff] }
 0x2b2   : > { %1435 = vst.msk [vmem:[#allocation3 + $0x80] sm:$0xff] %vm1426_vm8, %v1395_v56  ;;  %2440 = vmatmul.mubr.f32.gmra.mrb[28].mxu0 %v2286_v57  ;;  %v2797_v56 = vld [vmem:[%s9849_s7 + $0x8] sm:$0xff]  ;;  %v7583_v57 = vmov 0.0|0.0  }
 0x2b3   : > { %2444 = vmatprep.mubr.f32.mxu0 %v2289_v58  ;;  %7154 = vmatprep.subr.bf16.mxu1 %v7583_v57  ;;  %v7155_v58 = vpack.c.bf16 %v2797_v56, %v2796_v39 }
 0x2b4   : > { %v2229_v60 = vpop.permute.xlu0 %2228 }
 0x2b5   : > { %2267 = vst.msk [vmem:[#allocation3 + $0x98] sm:$0xff] %vm1677_vm10, %v2229_v60  ;;  %v1549_v7 = vpop.permute.xlu1 %1548  ;;  %7156 = vmatpush1.bf16.msra.mxu1 %v7155_v58  ;;  %v2798_v60 = vld [vmem:[%s9849_s7 + $0x10] sm:$0xff] }
 0x2b6   : > { %1589 = vst.msk [vmem:[#allocation3 + $0x80] sm:$0xff] %vm1580_vm9, %v1549_v7  ;;  %2445 = vmatmul.mubr.f32.gmra.mrb[30].mxu0 %v2288_v12  ;;  %7157 = vmatprep.subr.bf16.mxu1 %v7583_v57  ;;  %v2799_v7 = vld [vmem:[%s9849_s7 + $0x18] sm:$0xff]  ;;  %v2800_v12 = vld [vmem:[%s9849_s7 + $0x20] sm:$0xff] }
 0x2b7   : > { %1686 = vst.msk [vmem:[#allocation3 + $0x80] sm:$0xff] %vm1677_vm10, %v1646_v54 }
 0x2b8   : > { %v1921_v50 = vpop.permute.xlu0 %1920 }
 0x2b9   : > { %1960 = vst.msk [vmem:[#allocation3 + $0x88] sm:$0xff] %vm1426_vm8, %v1921_v50  ;;  %v1397_v46 = vpop.permute.xlu1 %1396  ;;  %v7158_v50 = vpack.c.bf16 %v2799_v7, %v2798_v60 }
 0x2ba   : > { %1436 = vst.msk [vmem:[#allocation3 + $0x90] sm:$0xff] %vm1426_vm8, %v1397_v46  ;;  %v2801_v46 = vld [vmem:[%s9849_s7 + $0x28] sm:$0xff] }
 0x2bb   : > { %7159 = vmatpush1.bf16.msra.mxu1 %v7158_v50 }
 0x2bc   : > { %v2074_v61 = vpop.permute.xlu0 %2073  ;;  %v2293_v5 = vld [vmem:[#allocation3 + $0x98] sm:$0xff]  ;;  %7160 = vmatprep.subr.bf16.mxu1 %v7583_v57 }
 0x2bd   : > { %2113 = vst.msk [vmem:[#allocation3 + $0x88] sm:$0xff] %vm1580_vm9, %v2074_v61  ;;  %v1551_v37 = vpop.permute.xlu1 %1550  ;;  %v7161_v61 = vpack.c.bf16 %v2801_v46, %v2800_v12 }
 0x2be   : > { %1590 = vst.msk [vmem:[#allocation3 + $0x90] sm:$0xff] %vm1580_vm9, %v1551_v37  ;;  %v2290_v4 = vld [vmem:[#allocation3 + $0x80] sm:$0xff]  ;;  %v2802_v37 = vld [vmem:[%s9849_s7 + $0x30] sm:$0xff] }
 0x2bf   : > { %1687 = vst.msk [vmem:[#allocation3 + $0x90] sm:$0xff] %vm1677_vm10, %v1648_v52  ;;  %7162 = vmatpush1.bf16.msra.mxu1 %v7161_v61 }
 0x2c0   : > { %v2227_v47 = vpop.permute.xlu0 %2226  ;;  %7163 = vmatprep.subr.bf16.mxu1 %v7583_v57 }
 0x2c1   : > { %2266 = vst.msk [vmem:[#allocation3 + $0x88] sm:$0xff] %vm1677_vm10, %v2227_v47  ;;  %v1652_v34 = vpop.permute.xlu1 %1651  ;;  %v2803_v47 = vld [vmem:[%s9849_s7 + $0x38] sm:$0xff] }
 0x2c4   : > { %v1927_v59 = vpop.permute.xlu0 %1926 }
 0x2c5   : > { %1963 = vst.msk [vmem:[#allocation3 + $0xb8] sm:$0xff] %vm1426_vm8, %v1927_v59  ;;  %v1650_v63 = vpop.permute.xlu1 %1649  ;;  %v2804_v59 = vld [vmem:[%s9849_s7 + $0x40] sm:$0xff] }
 0x2c6   : > { %v2292_v25 = vld [vmem:[#allocation3 + $0x90] sm:$0xff] }
 0x2c8   : > { %v2080_v0 = vpop.permute.xlu0 %2079  ;;  %v2291_v1 = vld [vmem:[#allocation3 + $0x88] sm:$0xff] }
 0x2c9   : > { %2116 = vst.msk [vmem:[#allocation3 + $0xb8] sm:$0xff] %vm1580_vm9, %v2080_v0  ;;  %v1399_v2 = vpop.permute.xlu1 %1398  ;;  %2449 = vmatprep.mubr.f32.mxu0 %v2291_v1  ;;  %v2806_v1 = vld [vmem:[%s9849_s7 + $0x50] sm:$0xff] }
 0x2ca   : > { %1437 = vst.msk [vmem:[#allocation3 + $0xa0] sm:$0xff] %vm1426_vm8, %v1399_v2  ;;  %2450 = vmatmul.mubr.f32.gmra.mrb[32].mxu0 %v2290_v4  ;;  %v2807_v2 = vld [vmem:[%s9849_s7 + $0x58] sm:$0xff] }
 0x2cb   : > { %2454 = vmatprep.mubr.f32.mxu0 %v2293_v5  ;;  %v7170_v4 = vpack.c.bf16 %v2807_v2, %v2806_v1  ;;  %v2808_v5 = vld [vmem:[%s9849_s7 + $0x60] sm:$0xff] }
 0x2cc   : > { %v2233_v6 = vpop.permute.xlu0 %2232 }
 0x2cd   : > { %2269 = vst.msk [vmem:[#allocation3 + $0xb8] sm:$0xff] %vm1677_vm10, %v2233_v6  ;;  %v1553_v9 = vpop.permute.xlu1 %1552  ;;  %v2809_v6 = vld [vmem:[%s9849_s7 + $0x68] sm:$0xff] }
 0x2ce   : > { %1591 = vst.msk [vmem:[#allocation3 + $0xa0] sm:$0xff] %vm1580_vm9, %v1553_v9  ;;  %2455 = vmatmul.mubr.f32.gmra.mrb[34].mxu0 %v2292_v25  ;;  %v7173_v9 = vpack.c.bf16 %v2809_v6, %v2808_v5  ;;  %v8510_v25 = vld [vmem:[#allocation2 + $0x30] sm:$0xff] }
 0x2cf   : > { %1688 = vst.msk [vmem:[#allocation3 + $0xa0] sm:$0xff] %vm1677_vm10, %v1650_v63  ;;  %v2805_v63 = vld [vmem:[%s9849_s7 + $0x48] sm:$0xff] }
 0x2d0   : > { %v1925_v10 = vpop.permute.xlu0 %1924  ;;  %v7167_v0 = vpack.c.bf16 %v2805_v63, %v2804_v59  ;;  %1121 = vst.msk [vmem:[#allocation2 + $0x8] sm:$0xff] %vm1120_vm11, %v8510_v25  ;;  %1123 = vst.msk [vmem:[#allocation2 + $0x48] sm:$0xff] %vm1120_vm11, %v8510_v25 }
 0x2d1   : > { %1962 = vst.msk [vmem:[#allocation3 + $0xa8] sm:$0xff] %vm1426_vm8, %v1925_v10  ;;  %v1401_v14 = vpop.permute.xlu1 %1400 }
 0x2d2   : > { %1438 = vst.msk [vmem:[#allocation3 + $0xb0] sm:$0xff] %vm1426_vm8, %v1401_v14  ;;  %v8547_v14 = vld [vmem:[%s9884_s30] ss:$0 sm:$0xff] }
 0x2d3   : > { %1125 = vst.msk [vmem:[#allocation2 + $0x88] sm:$0xff] %vm1120_vm11, %v8510_v25  ;;  %1127 = vst.msk [vmem:[#allocation2 + $0xc8] sm:$0xff] %vm1120_vm11, %v8510_v25 }
 0x2d4   : > { %v2078_v15 = vpop.permute.xlu0 %2077  ;;  %v2297_v11 = vld [vmem:[#allocation3 + $0xb8] sm:$0xff]  ;;  %1129 = vst.msk [vmem:[#allocation2 + $0x108] sm:$0xff] %vm1120_vm11, %v8510_v25  ;;  %1131 = vst.msk [vmem:[#allocation2 + $0x148] sm:$0xff] %vm1120_vm11, %v8510_v25 }
 0x2d5   : > { %2115 = vst.msk [vmem:[#allocation3 + $0xa8] sm:$0xff] %vm1580_vm9, %v2078_v15  ;;  %v1555_v16 = vpop.permute.xlu1 %1554 }
 0x2d6   : > { %1592 = vst.msk [vmem:[#allocation3 + $0xb0] sm:$0xff] %vm1580_vm9, %v1555_v16  ;;  %v2294_v26 = vld [vmem:[#allocation3 + $0xa0] sm:$0xff] }
 0x2d7   : > { %1689 = vst.msk [vmem:[#allocation3 + $0xb0] sm:$0xff] %vm1677_vm10, %v1652_v34  ;;  %v7164_v34 = vpack.c.bf16 %v2803_v47, %v2802_v37 }
 0x2d8   : > { %v2231_v17 = vpop.permute.xlu0 %2230  ;;  %1133 = vst.msk [vmem:[#allocation2 + $0x188] sm:$0xff] %vm1120_vm11, %v8510_v25  ;;  %1135 = vst.msk [vmem:[#allocation2 + $0x1c8] sm:$0xff] %vm1120_vm11, %v8510_v25 }
 0x2d9   : > { %2268 = vst.msk [vmem:[#allocation3 + $0xa8] sm:$0xff] %vm1677_vm10, %v2231_v17  ;;  %v1656_v19 = vpop.permute.xlu1 %1655  ;;  %7165 = vmatpush1.bf16.msra.mxu1 %v7164_v34  ;;  %v2810_v17 = vld [vmem:[%s9849_s7 + $0x70] sm:$0xff] }
 0x2da   : > { %7166 = vmatprep.subr.bf16.mxu1 %v7583_v57  ;;  %1137 = vst.msk [vmem:[#allocation2 + $0x38] sm:$0xff] %vm1120_vm11, %v8510_v25  ;;  %1139 = vst.msk [vmem:[#allocation2 + $0x78] sm:$0xff] %vm1120_vm11, %v8510_v25 }
 0x2db   : > { %1141 = vst.msk [vmem:[#allocation2 + $0xb8] sm:$0xff] %vm1120_vm11, %v8510_v25  ;;  %1143 = vst.msk [vmem:[#allocation2 + $0xf8] sm:$0xff] %vm1120_vm11, %v8510_v25 }
 0x2dc   : > { %v1931_v21 = vpop.permute.xlu0 %1930  ;;  %1145 = vst.msk [vmem:[#allocation2 + $0x138] sm:$0xff] %vm1120_vm11, %v8510_v25  ;;  %1147 = vst.msk [vmem:[#allocation2 + $0x178] sm:$0xff] %vm1120_vm11, %v8510_v25 }
 0x2dd   : > { %1965 = vst.msk [vmem:[#allocation3 + $0xd8] sm:$0xff] %vm1426_vm8, %v1931_v21  ;;  %v1654_v55 = vpop.permute.xlu1 %1653  ;;  %7168 = vmatpush1.bf16.msra.mxu1 %v7167_v0  ;;  %v2812_v21 = vld [vmem:[%s9849_s7 + $0x80] sm:$0xff] }
 0x2de   : > { %v2296_v29 = vld [vmem:[#allocation3 + $0xb0] sm:$0xff]  ;;  %7169 = vmatprep.subr.bf16.mxu1 %v7583_v57  ;;  %1149 = vst.msk [vmem:[#allocation2 + $0x1b8] sm:$0xff] %vm1120_vm11, %v8510_v25  ;;  %1151 = vst.msk [vmem:[#allocation2 + $0x1f8] sm:$0xff] %vm1120_vm11, %v8510_v25 }
 0x2e0   : > { %v2084_v22 = vpop.permute.xlu0 %2083  ;;  %v2295_v23 = vld [vmem:[#allocation3 + $0xa8] sm:$0xff] }
 0x2e1   : > { %2118 = vst.msk [vmem:[#allocation3 + $0xd8] sm:$0xff] %vm1580_vm9, %v2084_v22  ;;  %v1403_v27 = vpop.permute.xlu1 %1402  ;;  %2459 = vmatprep.mubr.f32.mxu0 %v2295_v23  ;;  %7171 = vmatpush1.bf16.msra.mxu1 %v7170_v4  ;;  %v2813_v22 = vld [vmem:[%s9849_s7 + $0x88] sm:$0xff] }
 0x2e2   : > { %1439 = vst.msk [vmem:[#allocation3 + $0xc0] sm:$0xff] %vm1426_vm8, %v1403_v27  ;;  %2460 = vmatmul.mubr.f32.gmra.mrb[36].mxu0 %v2294_v26  ;;  %7172 = vmatprep.subr.bf16.mxu1 %v7583_v57 }
 0x2e3   : > { %2464 = vmatprep.mubr.f32.mxu0 %v2297_v11  ;;  %v7179_v11 = vpack.c.bf16 %v2813_v22, %v2812_v21  ;;  %v2604_v22 = vld [vmem:[#allocation2] sm:$0x80] }
 0x2e4   : > { %v2237_v28 = vpop.permute.xlu0 %2236 }
 0x2e5   : > { %2271 = vst.msk [vmem:[#allocation3 + $0xd8] sm:$0xff] %vm1677_vm10, %v2237_v28  ;;  %v1557_v62 = vpop.permute.xlu1 %1556  ;;  %7174 = vmatpush1.bf16.msra.mxu1 %v7173_v9 }
 0x2e6   : > { %1593 = vst.msk [vmem:[#allocation3 + $0xc0] sm:$0xff] %vm1580_vm9, %v1557_v62  ;;  %2465 = vmatmul.mubr.f32.gmra.mrb[38].mxu0 %v2296_v29  ;;  %7175 = vmatprep.subr.bf16.mxu1 %v7583_v57 }
 0x2e7   : > { %1690 = vst.msk [vmem:[#allocation3 + $0xc0] sm:$0xff] %vm1677_vm10, %v1654_v55 }
 0x2e8   : > { %v1929_v30 = vpop.permute.xlu0 %1928 }
 0x2e9   : > { %1964 = vst.msk [vmem:[#allocation3 + $0xc8] sm:$0xff] %vm1426_vm8, %v1929_v30  ;;  %v1405_v31 = vpop.permute.xlu1 %1404 }
 0x2ea   : > { %1440 = vst.msk [vmem:[#allocation3 + $0xd0] sm:$0xff] %vm1426_vm8, %v1405_v31  ;;  %v2814_v31 = vld [vmem:[%s9849_s7 + $0x90] sm:$0xff] }
 0x2ec   : > { %v2082_v13 = vpop.permute.xlu0 %2081  ;;  %v2301_v48 = vld [vmem:[#allocation3 + $0xd8] sm:$0xff] }
 0x2ed   : > { %2117 = vst.msk [vmem:[#allocation3 + $0xc8] sm:$0xff] %vm1580_vm9, %v2082_v13  ;;  %v1559_v33 = vpop.permute.xlu1 %1558 }
 0x2ee   : > { %1594 = vst.msk [vmem:[#allocation3 + $0xd0] sm:$0xff] %vm1580_vm9, %v1559_v33  ;;  %v2298_v3 = vld [vmem:[#allocation3 + $0xc0] sm:$0xff] }
 0x2ef   : > { %1691 = vst.msk [vmem:[#allocation3 + $0xd0] sm:$0xff] %vm1677_vm10, %v1656_v19  ;;  %v2811_v19 = vld [vmem:[%s9849_s7 + $0x78] sm:$0xff] }
 0x2f0   : > { %v2235_v35 = vpop.permute.xlu0 %2234  ;;  %v7176_v55 = vpack.c.bf16 %v2811_v19, %v2810_v17 }
 0x2f1   : > { %2270 = vst.msk [vmem:[#allocation3 + $0xc8] sm:$0xff] %vm1677_vm10, %v2235_v35  ;;  %v1658_v8 = vpop.permute.xlu1 %1657 }
 0x2f2   : > { %7177 = vmatpush1.bf16.msra.mxu1 %v7176_v55  ;;  %v2605_v55 = vld [vmem:[#allocation2 + $0x8] sm:$0x80] }
 0x2f3   : > { %7178 = vmatprep.subr.bf16.mxu1 %v7583_v57 }
 0x2f4   : > { %v1935_v24 = vpop.permute.xlu0 %1934 }
 0x2f5   : > { %1967 = vst.msk [vmem:[#allocation3 + $0xf8] sm:$0xff] %vm1426_vm8, %v1935_v24  ;;  %v1407_v36 = vpop.permute.xlu1 %1406 }
 0x2f6   : > { %1441 = vst.msk [vmem:[#allocation3 + $0xe0] sm:$0xff] %vm1426_vm8, %v1407_v36  ;;  %v2300_v43 = vld [vmem:[#allocation3 + $0xd0] sm:$0xff]  ;;  %7180 = vmatpush1.bf16.msra.mxu1 %v7179_v11  ;;  %v6160_v11 = vld [vmem:[%s9849_s7 + $0x98] sm:$0xff] }
 0x2f7   : > { %2883 = vmatprep.subr.mxu1 %v8510_v25 }
 0x2f8   : > { %v2088_v38 = vpop.permute.xlu0 %2087  ;;  %v2299_v40 = vld [vmem:[#allocation3 + $0xc8] sm:$0xff] }
 0x2f9   : > { %2120 = vst.msk [vmem:[#allocation3 + $0xf8] sm:$0xff] %vm1580_vm9, %v2088_v38  ;;  %v1561_v41 = vpop.permute.xlu1 %1560  ;;  %2469 = vmatprep.mubr.f32.mxu0 %v2299_v40 }
 0x2fa   : > { %1595 = vst.msk [vmem:[#allocation3 + $0xe0] sm:$0xff] %vm1580_vm9, %v1561_v41  ;;  %2470 = vmatmul.mubr.f32.gmra.mrb[40].mxu0 %v2298_v3  ;;  %2884 = vmatpush1.msra.mxu1 %v2814_v31 }
 0x2fb   : > { %1692 = vst.msk [vmem:[#allocation3 + $0xe0] sm:$0xff] %vm1677_vm10, %v1658_v8  ;;  %2474 = vmatprep.mubr.f32.mxu0 %v2301_v48  ;;  %7181 = vmatprep.subr.bf16.mxu1 %v7583_v57 }
 0x2fc   : > { %v1933_v20 = vpop.permute.xlu0 %1932 }
 0x2fd   : > { %1966 = vst.msk [vmem:[#allocation3 + $0xe8] sm:$0xff] %vm1426_vm8, %v1933_v20  ;;  %v1409_v42 = vpop.permute.xlu1 %1408 }
 0x2fe   : > { %1442 = vst.msk [vmem:[#allocation3 + $0xf0] sm:$0xff] %vm1426_vm8, %v1409_v42  ;;  %2475 = vmatmul.mubr.f32.gmra.mrb[42].mxu0 %v2300_v43 }
 0x300   : > { %v2086_v44 = vpop.permute.xlu0 %2085 }
 0x301   : > { %2119 = vst.msk [vmem:[#allocation3 + $0xe8] sm:$0xff] %vm1580_vm9, %v2086_v44  ;;  %v1563_v18 = vpop.permute.xlu1 %1562 }
 0x302   : > { %1596 = vst.msk [vmem:[#allocation3 + $0xf0] sm:$0xff] %vm1580_vm9, %v1563_v18  ;;  %v2302_v53 = vld [vmem:[#allocation3 + $0xe0] sm:$0xff] }
 0x304   : > { %v2239_v45 = vpop.permute.xlu0 %2238 }
 0x305   : > { %2272 = vst.msk [vmem:[#allocation3 + $0xe8] sm:$0xff] %vm1677_vm10, %v2239_v45  ;;  %v1660_v32 = vpop.permute.xlu1 %1659 }
 0x306   : > { %1693 = vst.msk [vmem:[#allocation3 + $0xf0] sm:$0xff] %vm1677_vm10, %v1660_v32 }
 0x308   : > { %v2241_v51 = vpop.permute.xlu0 %2240 }
 0x309   : > { %2273 = vst.msk [vmem:[#allocation3 + $0xf8] sm:$0xff] %vm1677_vm10, %v2241_v51 }
 0x30c   : > { %v2303_v52 = vld [vmem:[#allocation3 + $0xe8] sm:$0xff] }
 0x30d   : > { %2479 = vmatprep.mubr.f32.mxu0 %v2303_v52  ;;  %v2304_v49 = vld [vmem:[#allocation3 + $0xf0] sm:$0xff] }
 0x30e   : > { %2480 = vmatmul.mubr.f32.gmra.mrb[44].mxu0 %v2302_v53 }
 0x310   : > { %v2305_v54 = vld [vmem:[#allocation3 + $0xf8] sm:$0xff] }
 0x311   : > { %2484 = vmatprep.mubr.f32.mxu0 %v2305_v54 }
 0x312   : > { %2485 = vmatmul.mubr.f32.gmra.mrb[46].mxu0 %v2304_v49 }
 0x33d   : > { %v6457_v10 = vpop.f32.mrb[16].mxu0 }
 0x33e   : > { %v6458_v15 = vpop.f32.mrb[17].mxu0 }
 0x33f   : > { %v6459_v16 = vadd.f32 %v6458_v15, %v6457_v10 }
 0x341   : > { %v2412_v23 = vadd.f32 %v6459_v16, %v8547_v14  ;;  %v6460_v27 = vpop.f32.mrb[18].mxu0 }
 0x342   : > { %v6461_v26 = vpop.f32.mrb[19].mxu0 }
 0x343   : > { %v2490_v28 = vmax.f32 %v2412_v23, 0.0  ;;  %v6462_v62 = vadd.f32 %v6461_v26, %v6460_v27  ;;  %v2703_v27 = vrot.slane %v2605_v55, 7  ;;  %v2700_v26 = vrot.slane %v2604_v22, 7 }
 0x345   : > { %v2417_v29 = vadd.f32 %v6462_v62, %v8547_v14  ;;  %2522 = vrot.lane.b32.xlu0 %v2490_v28, %s7581_s0  ;;  %v6161_v28 = vld [vmem:[%s9849_s7 + $0xa0] sm:$0xff] }
 0x347   : > { %v2491_v30 = vmax.f32 %v2417_v29, 0.0 }
 0x349   : > { %2524 = vrot.lane.b32.xlu1 %v2491_v30, %s7581_s0 }
 0x355   : > { %v6463_v13 = vpop.f32.mrb[20].mxu0 }
 0x356   : > { %v6464_v33 = vpop.f32.mrb[21].mxu0 }
 0x357   : > { %v6465_v35 = vadd.f32 %v6464_v33, %v6463_v13  ;;  %v7182_v33 = vpack.c.bf16 %v6161_v28, %v6160_v11 }
 0x359   : > { %v2422_v8 = vadd.f32 %v6465_v35, %v8547_v14  ;;  %v6466_v24 = vpop.f32.mrb[22].mxu0 }
 0x35a   : > { %v6467_v36 = vpop.f32.mrb[23].mxu0 }
 0x35b   : > { %v2492_v38 = vmax.f32 %v2422_v8, 0.0  ;;  %v6468_v40 = vadd.f32 %v6467_v36, %v6466_v24  ;;  %v6162_v24 = vld [vmem:[%s9849_s7 + $0xa8] sm:$0xff]  ;;  %v6163_v36 = vld [vmem:[%s9849_s7 + $0xb0] sm:$0xff] }
 0x35d   : > { %v2427_v41 = vadd.f32 %v6468_v40, %v8547_v14  ;;  %2526 = vrot.lane.b32.xlu0 %v2492_v38, %s7581_s0 }
 0x35f   : > { %v2493_v3 = vmax.f32 %v2427_v41, 0.0 }
 0x361   : > { %2528 = vrot.lane.b32.xlu1 %v2493_v3, %s7581_s0 }
 0x36d   : > { %v6469_v48 = vpop.f32.mrb[24].mxu0 }
 0x36e   : > { %v6470_v20 = vpop.f32.mrb[25].mxu0 }
 0x36f   : > { %v6471_v42 = vadd.f32 %v6470_v20, %v6469_v48  ;;  %v7185_v48 = vpack.c.bf16 %v6163_v36, %v6162_v24 }
 0x371   : > { %v2432_v43 = vadd.f32 %v6471_v42, %v8547_v14  ;;  %v6472_v44 = vpop.f32.mrb[26].mxu0 }
 0x372   : > { %v6473_v18 = vpop.f32.mrb[27].mxu0 }
 0x373   : > { %v2494_v45 = vmax.f32 %v2432_v43, 0.0  ;;  %v6474_v32 = vadd.f32 %v6473_v18, %v6472_v44  ;;  %v6164_v43 = vld [vmem:[%s9849_s7 + $0xb8] sm:$0xff]  ;;  %v6165_v44 = vld [vmem:[%s9849_s7 + $0xc0] sm:$0xff] }
 0x374   : > { %v7188_v18 = vpack.c.bf16 %v6165_v44, %v6164_v43  ;;  %v2616_v43 = vld [vmem:[#allocation2 + $0x80] sm:$0x80]  ;;  %v6176_v44 = vld [vmem:[%s9849_s7 + $0x118] sm:$0xff] }
 0x375   : > { %v2437_v51 = vadd.f32 %v6474_v32, %v8547_v14  ;;  %2530 = vrot.lane.b32.xlu0 %v2494_v45, %s7581_s0  ;;  %v6166_v45 = vld [vmem:[%s9849_s7 + $0xc8] sm:$0xff]  ;;  %v6167_v32 = vld [vmem:[%s9849_s7 + $0xd0] sm:$0xff] }
 0x377   : > { %v2495_v52 = vmax.f32 %v2437_v51, 0.0 }
 0x379   : > { %2532 = vrot.lane.b32.xlu1 %v2495_v52, %s7581_s0  ;;  %v7191_v52 = vpack.c.bf16 %v6167_v32, %v6166_v45  ;;  %v2720_v32 = vrot.slane %v2616_v43, 7 }
 0x385   : > { %v6475_v53 = vpop.f32.mrb[28].mxu0 }
 0x386   : > { %v6476_v54 = vpop.f32.mrb[29].mxu0 }
 0x387   : > { %v6477_v49 = vadd.f32 %v6476_v54, %v6475_v53 }
 0x389   : > { %v2442_v39 = vadd.f32 %v6477_v49, %v8547_v14  ;;  %v6478_v56 = vpop.f32.mrb[30].mxu0 }
 0x38a   : > { %v6479_v58 = vpop.f32.mrb[31].mxu0 }
 0x38b   : > { %v2496_v60 = vmax.f32 %v2442_v39, 0.0  ;;  %v6480_v7 = vadd.f32 %v6479_v58, %v6478_v56 }
 0x38d   : > { %v2447_v12 = vadd.f32 %v6480_v7, %v8547_v14  ;;  %2534 = vrot.lane.b32.xlu0 %v2496_v60, %s7581_s0 }
 0x38f   : > { %v2497_v50 = vmax.f32 %v2447_v12, 0.0 }
 0x391   : > { %2536 = vrot.lane.b32.xlu1 %v2497_v50, %s7581_s0  ;;  %v2611_v50 = vld [vmem:[#allocation2 + $0x48] sm:$0x80] }
 0x39d   : > { %v6481_v46 = vpop.f32.mrb[32].mxu0 }
 0x39e   : > { %v6482_v61 = vpop.f32.mrb[33].mxu0 }
 0x39f   : > { %v6483_v37 = vadd.f32 %v6482_v61, %v6481_v46  ;;  %v2610_v46 = vld [vmem:[#allocation2 + $0x40] sm:$0x80]  ;;  %v6168_v61 = vld [vmem:[%s9849_s7 + $0xd8] sm:$0xff] }
 0x3a1   : > { %v2452_v47 = vadd.f32 %v6483_v37, %v8547_v14  ;;  %v6484_v34 = vpop.f32.mrb[34].mxu0  ;;  %v6169_v37 = vld [vmem:[%s9849_s7 + $0xe0] sm:$0xff] }
 0x3a2   : > { %v6485_v59 = vpop.f32.mrb[35].mxu0 }
 0x3a3   : > { %v2498_v63 = vmax.f32 %v2452_v47, 0.0  ;;  %v6486_v0 = vadd.f32 %v6485_v59, %v6484_v34  ;;  %v7194_v34 = vpack.c.bf16 %v6169_v37, %v6168_v61  ;;  %v2713_v59 = vrot.slane %v2611_v50, 7  ;;  %v2623_v37 = vld [vmem:[#allocation2 + $0xc8] sm:$0x80] }
 0x3a5   : > { %v2457_v1 = vadd.f32 %v6486_v0, %v8547_v14  ;;  %2538 = vrot.lane.b32.xlu0 %v2498_v63, %s7581_s0  ;;  %v2710_v63 = vrot.slane %v2610_v46, 7 }
 0x3a7   : > { %v2499_v2 = vmax.f32 %v2457_v1, 0.0 }
 0x3a9   : > { %2540 = vrot.lane.b32.xlu1 %v2499_v2, %s7581_s0 }
 0x3b5   : > { %v6487_v4 = vpop.f32.mrb[36].mxu0 }
 0x3b6   : > { %v6488_v5 = vpop.f32.mrb[37].mxu0 }
 0x3b7   : > { %v6489_v6 = vadd.f32 %v6488_v5, %v6487_v4  ;;  %v2523_v9 = vpop.permute.xlu0 %2522 }
 0x3b8   : > { %2571 = vst.msk [vmem:[#allocation2 + $0x10] sm:$0xff] %vm2570_vm12, %v2523_v9 }
 0x3b9   : > { %2572 = vst.msk [vmem:[#allocation2 + $0x18] sm:$0xff] %vm1120_vm11, %v2523_v9  ;;  %v2462_v10 = vadd.f32 %v6489_v6, %v8547_v14  ;;  %v6490_v15 = vpop.f32.mrb[38].mxu0 }
 0x3ba   : > { %v6491_v16 = vpop.f32.mrb[39].mxu0 }
 0x3bb   : > { %v2500_v17 = vmax.f32 %v2462_v10, 0.0  ;;  %v6492_v19 = vadd.f32 %v6491_v16, %v6490_v15  ;;  %v2525_v21 = vpop.permute.xlu1 %2524 }
 0x3bc   : > { %2573 = vst.msk [vmem:[#allocation2 + $0x20] sm:$0xff] %vm2570_vm12, %v2525_v21 }
 0x3bd   : > { %2574 = vst.msk [vmem:[#allocation2 + $0x28] sm:$0xff] %vm1120_vm11, %v2525_v21  ;;  %v2467_v23 = vadd.f32 %v6492_v19, %v8547_v14  ;;  %2542 = vrot.lane.b32.xlu0 %v2500_v17, %s7581_s0  ;;  %v6170_v19 = vld [vmem:[%s9849_s7 + $0xe8] sm:$0xff]  ;;  %v6171_v21 = vld [vmem:[%s9849_s7 + $0xf0] sm:$0xff] }
 0x3be   : > { %v7197_v55 = vpack.c.bf16 %v6171_v21, %v6170_v19 }
 0x3bf   : > { %v2501_v62 = vmax.f32 %v2467_v23, 0.0  ;;  %v8603_v30 = vld [vmem:[#allocation2 + $0x10] sm:$0xff] }
 0x3c0   : > { %v8601_v29 = vld [vmem:[#allocation2 + $0x18] sm:$0xff]  ;;  %v2701_v13 = vrot.slane %v8603_v30, 7 }
 0x3c1   : > { %v2704_v31 = vrot.slane %v8601_v29, 7  ;;  %2544 = vrot.lane.b32.xlu1 %v2501_v62, %s7581_s0 }
 0x3c2   : > { %v2702_v8 = vsel %vm1491_vm4, %v2700_v26, %v2701_v13  ;;  %v6173_v26 = vld [vmem:[%s9849_s7 + $0x100] sm:$0xff] }
 0x3c3   : > { %v2705_v35 = vsel %vm1491_vm4, %v2703_v27, %v2704_v31  ;;  %v2608_v40 = vld [vmem:[#allocation2 + $0x20] sm:$0x7f]  ;;  %v6172_v27 = vld [vmem:[%s9849_s7 + $0xf8] sm:$0xff] }
 0x3c4   : > { %6143 = vmatprep.mubr.msk.f32.mxu1 %vm1120_vm11, %v2705_v35  ;;  %v2609_v38 = vld [vmem:[#allocation2 + $0x28] sm:$0x7f]  ;;  %v2706_v3 = vrot.slane %v2608_v40, 7  ;;  %v7200_v28 = vpack.c.bf16 %v6173_v26, %v6172_v27  ;;  %v6175_v40 = vld [vmem:[%s9849_s7 + $0x110] sm:$0xff]  ;;  %v2628_v27 = vld [vmem:[#allocation2 + $0x100] sm:$0x80] }
 0x3c5   : > { %2912 = vmatmul.mubr.f32.vlgmr.msra.gmra.mrb[16].mxu1 %v2702_v8  ;;  %v2708_v41 = vrot.slane %v2609_v38, 7  ;;  %v6174_v38 = vld [vmem:[%s9849_s7 + $0x108] sm:$0xff] }
 0x3c6   : > { %7183 = vmatpush1.bf16.msra.mxu1 %v7182_v33  ;;  %v2707_v42 = vsel %vm1491_vm4, %v2701_v13, %v2706_v3 }
 0x3c7   : > { %v2709_v20 = vsel %vm1491_vm4, %v2704_v31, %v2708_v41  ;;  %7184 = vmatprep.subr.bf16.mxu1 %v7583_v57  ;;  %v7203_v41 = vpack.c.bf16 %v6175_v40, %v6174_v38 }
 0x3c8   : > { %6144 = vmatprep.mubr.msk.f32.mxu1 %vm1120_vm11, %v2709_v20 }
 0x3c9   : > { %2917 = vmatmul.mubr.f32.gmra.mrb[18].mxu1 %v2707_v42 }
 0x3ca   : > { %7186 = vmatpush1.bf16.msra.mxu1 %v7185_v48  ;;  %v2617_v48 = vld [vmem:[#allocation2 + $0x88] sm:$0x80] }
 0x3cb   : > { %7187 = vmatprep.subr.bf16.mxu1 %v7583_v57  ;;  %v2723_v45 = vrot.slane %v2617_v48, 7 }
 0x3cd   : > { %v6493_v51 = vpop.f32.mrb[40].mxu0 }
 0x3ce   : > { %7189 = vmatpush1.bf16.msra.mxu1 %v7188_v18  ;;  %v6494_v53 = vpop.f32.mrb[41].mxu0  ;;  %v6177_v18 = vld [vmem:[%s9849_s7 + $0x120] sm:$0xff] }
 0x3cf   : > { %7190 = vmatprep.subr.bf16.mxu1 %v7583_v57  ;;  %v6495_v54 = vadd.f32 %v6494_v53, %v6493_v51  ;;  %v2527_v49 = vpop.permute.xlu0 %2526  ;;  %v6178_v53 = vld [vmem:[%s9849_s7 + $0x128] sm:$0xff] }
 0x3d0   : > { %2575 = vst.msk [vmem:[#allocation2 + $0x50] sm:$0xff] %vm2570_vm12, %v2527_v49 }
 0x3d1   : > { %2576 = vst.msk [vmem:[#allocation2 + $0x58] sm:$0xff] %vm1120_vm11, %v2527_v49  ;;  %v2472_v39 = vadd.f32 %v6495_v54, %v8547_v14  ;;  %v6496_v56 = vpop.f32.mrb[42].mxu0 }
 0x3d2   : > { %7192 = vmatpush1.bf16.msra.mxu1 %v7191_v52  ;;  %v6497_v58 = vpop.f32.mrb[43].mxu0 }
 0x3d3   : > { %7193 = vmatprep.subr.bf16.mxu1 %v7583_v57  ;;  %v2502_v60 = vmax.f32 %v2472_v39, 0.0  ;;  %v6498_v7 = vadd.f32 %v6497_v58, %v6496_v56  ;;  %v2529_v12 = vpop.permute.xlu1 %2528 }
 0x3d4   : > { %2577 = vst.msk [vmem:[#allocation2 + $0x60] sm:$0xff] %vm2570_vm12, %v2529_v12 }
 0x3d5   : > { %2578 = vst.msk [vmem:[#allocation2 + $0x68] sm:$0xff] %vm1120_vm11, %v2529_v12  ;;  %v2477_v47 = vadd.f32 %v6498_v7, %v8547_v14  ;;  %2546 = vrot.lane.b32.xlu0 %v2502_v60, %s7581_s0 }
 0x3d6   : > { %7195 = vmatpush1.bf16.msra.mxu1 %v7194_v34  ;;  %v2733_v34 = vrot.slane %v2623_v37, 7  ;;  %v2641_v37 = vld [vmem:[#allocation2 + $0x188] sm:$0x80] }
 0x3d7   : > { %v2503_v0 = vmax.f32 %v2477_v47, 0.0  ;;  %v8651_v2 = vld [vmem:[#allocation2 + $0x50] sm:$0xff]  ;;  %7196 = vmatprep.subr.bf16.mxu1 %v7583_v57  ;;  %v2622_v47 = vld [vmem:[#allocation2 + $0xc0] sm:$0x80] }
 0x3d8   : > { %v8649_v1 = vld [vmem:[#allocation2 + $0x58] sm:$0xff]  ;;  %v2711_v5 = vrot.slane %v8651_v2, 7 }
 0x3d9   : > { %v2714_v4 = vrot.slane %v8649_v1, 7  ;;  %2548 = vrot.lane.b32.xlu1 %v2503_v0, %s7581_s0 }
 0x3da   : > { %v2712_v9 = vsel %vm1491_vm4, %v2710_v63, %v2711_v5  ;;  %7198 = vmatpush1.bf16.msra.mxu1 %v7197_v55 }
 0x3db   : > { %v2715_v6 = vsel %vm1491_vm4, %v2713_v59, %v2714_v4  ;;  %v2614_v15 = vld [vmem:[#allocation2 + $0x60] sm:$0x7f]  ;;  %7199 = vmatprep.subr.bf16.mxu1 %v7583_v57  ;;  %v2730_v59 = vrot.slane %v2622_v47, 7  ;;  %v2640_v47 = vld [vmem:[#allocation2 + $0x180] sm:$0x80] }
 0x3dc   : > { %6145 = vmatprep.mubr.msk.f32.mxu1 %vm1120_vm11, %v2715_v6  ;;  %v2615_v10 = vld [vmem:[#allocation2 + $0x68] sm:$0x7f]  ;;  %v2716_v17 = vrot.slane %v2614_v15, 7 }
 0x3dd   : > { %2922 = vmatmul.mubr.f32.gmra.mrb[20].mxu1 %v2712_v9  ;;  %v2718_v16 = vrot.slane %v2615_v10, 7 }
 0x3de   : > { %v2717_v23 = vsel %vm1491_vm4, %v2711_v5, %v2716_v17  ;;  %7201 = vmatpush1.bf16.msra.mxu1 %v7200_v28 }
 0x3df   : > { %v2719_v22 = vsel %vm1491_vm4, %v2714_v4, %v2718_v16  ;;  %7202 = vmatprep.subr.bf16.mxu1 %v7583_v57 }
 0x3e0   : > { %6146 = vmatprep.mubr.msk.f32.mxu1 %vm1120_vm11, %v2719_v22 }
 0x3e1   : > { %2927 = vmatmul.mubr.f32.gmra.mrb[22].mxu1 %v2717_v23  ;;  %v6499_v11 = vpop.f32.mrb[44].mxu0  ;;  %v2629_v23 = vld [vmem:[#allocation2 + $0x108] sm:$0x80] }
 0x3e2   : > { %v6500_v62 = vpop.f32.mrb[45].mxu0  ;;  %7204 = vmatpush1.bf16.msra.mxu1 %v7203_v41  ;;  %v2743_v26 = vrot.slane %v2629_v23, 7 }
 0x3e3   : > { %v6501_v31 = vadd.f32 %v6500_v62, %v6499_v11  ;;  %7205 = vmatprep.subr.bf16.mxu1 %v7583_v57  ;;  %v2740_v11 = vrot.slane %v2628_v27, 7 }
 0x3e5   : > { %v2482_v13 = vadd.f32 %v6501_v31, %v8547_v14  ;;  %v6502_v33 = vpop.f32.mrb[46].mxu0 }
 0x3e6   : > { %v6503_v35 = vpop.f32.mrb[47].mxu0 }
 0x3e7   : > { %v2504_v8 = vmax.f32 %v2482_v13, 0.0  ;;  %v6504_v24 = vadd.f32 %v6503_v35, %v6502_v33  ;;  %v2531_v36 = vpop.permute.xlu0 %2530 }
 0x3e8   : > { %2579 = vst.msk [vmem:[#allocation2 + $0x90] sm:$0xff] %vm2570_vm12, %v2531_v36 }
 0x3e9   : > { %2580 = vst.msk [vmem:[#allocation2 + $0x98] sm:$0xff] %vm1120_vm11, %v2531_v36  ;;  %v2487_v3 = vadd.f32 %v6504_v24, %v8547_v14  ;;  %2550 = vrot.lane.b32.xlu0 %v2504_v8, %s7581_s0  ;;  %v7206_v14 = vpack.c.bf16 %v6177_v18, %v6176_v44 }
 0x3eb   : > { %v2505_v20 = vmax.f32 %v2487_v3, 0.0  ;;  %v2533_v42 = vpop.permute.xlu1 %2532  ;;  %7207 = vmatpush1.bf16.msra.mxu1 %v7206_v14 }
 0x3ec   : > { %2581 = vst.msk [vmem:[#allocation2 + $0xa0] sm:$0xff] %vm2570_vm12, %v2533_v42  ;;  %3126 = vmatprep.subr.mxu1 %v8510_v25 }
 0x3ed   : > { %2582 = vst.msk [vmem:[#allocation2 + $0xa8] sm:$0xff] %vm1120_vm11, %v2533_v42  ;;  %2552 = vrot.lane.b32.xlu1 %v2505_v20, %s7581_s0  ;;  %v2635_v20 = vld [vmem:[#allocation2 + $0x148] sm:$0x80]  ;;  %v2634_v42 = vld [vmem:[#allocation2 + $0x140] sm:$0x80] }
 0x3ee   : > { %v2753_v43 = vrot.slane %v2635_v20, 7  ;;  %v2750_v44 = vrot.slane %v2634_v42, 7 }
 0x3ef   : > { %v8700_v52 = vld [vmem:[#allocation2 + $0x90] sm:$0xff]  ;;  %3127 = vmatpush1.msra.mxu1 %v6178_v53 }
 0x3f0   : > { %v8698_v51 = vld [vmem:[#allocation2 + $0x98] sm:$0xff]  ;;  %v2721_v49 = vrot.slane %v8700_v52, 7  ;;  %7208 = vmatprep.subr.bf16.mxu1 %v7583_v57 }
 0x3f1   : > { %v2724_v54 = vrot.slane %v8698_v51, 7 }
 0x3f2   : > { %v2722_v56 = vsel %vm1491_vm4, %v2720_v32, %v2721_v49 }
 0x3f3   : > { %v2725_v39 = vsel %vm1491_vm4, %v2723_v45, %v2724_v54  ;;  %v2620_v60 = vld [vmem:[#allocation2 + $0xa0] sm:$0x7f] }
 0x3f4   : > { %6147 = vmatprep.mubr.msk.f32.mxu1 %vm1120_vm11, %v2725_v39  ;;  %v2621_v58 = vld [vmem:[#allocation2 + $0xa8] sm:$0x7f]  ;;  %v2726_v7 = vrot.slane %v2620_v60, 7 }
 0x3f5   : > { %2932 = vmatmul.mubr.f32.gmra.mrb[24].mxu1 %v2722_v56  ;;  %v2728_v25 = vrot.slane %v2621_v58, 7 }
 0x3f6   : > { %v2727_v50 = vsel %vm1491_vm4, %v2721_v49, %v2726_v7 }
 0x3f7   : > { %v2729_v12 = vsel %vm1491_vm4, %v2724_v54, %v2728_v25 }
 0x3f8   : > { %6148 = vmatprep.mubr.msk.f32.mxu1 %vm1120_vm11, %v2729_v12  ;;  %v3657_v12 = vld [vmem:[%s9851_s9 + $0x8] sm:$0xff] }
 0x3f9   : > { %2937 = vmatmul.mubr.f32.gmra.mrb[26].mxu1 %v2727_v50  ;;  %v3656_v50 = vld [vmem:[%s9851_s9] sm:$0xff] }
 0x3ff   : > { %v2535_v46 = vpop.permute.xlu0 %2534 }
 0x400   : > { %2583 = vst.msk [vmem:[#allocation2 + $0xd0] sm:$0xff] %vm2570_vm12, %v2535_v46 }
 0x401   : > { %2584 = vst.msk [vmem:[#allocation2 + $0xd8] sm:$0xff] %vm1120_vm11, %v2535_v46  ;;  %v7584_v46 = vmov 0  }
 0x402   : > { %7430 = vset.pattern.permute.xlu1 %v7584_v46  ;;  %7429 = vset.pattern.permute.xlu0 %v7584_v46 }
 0x403   : > { %v2537_v61 = vpop.permute.xlu1 %2536  ;;  %3679 = vperm.xlu1 %7430, %v3657_v12   ;;  %3674 = vperm.xlu0 %7429, %v3656_v50   ;;  %v3665_v12 = vld [vmem:[%s9851_s9 + $0x48] sm:$0xff] }
 0x404   : > { %2585 = vst.msk [vmem:[#allocation2 + $0xe0] sm:$0xff] %vm2570_vm12, %v2537_v61 }
 0x405   : > { %2586 = vst.msk [vmem:[#allocation2 + $0xe8] sm:$0xff] %vm1120_vm11, %v2537_v61 }
 0x407   : > { %v8721_v0 = vld [vmem:[#allocation2 + $0xd0] sm:$0xff] }
 0x408   : > { %v8719_v63 = vld [vmem:[#allocation2 + $0xd8] sm:$0xff]  ;;  %v2731_v5 = vrot.slane %v8721_v0, 7 }
 0x409   : > { %v2734_v4 = vrot.slane %v8719_v63, 7 }
 0x40a   : > { %v2732_v9 = vsel %vm1491_vm4, %v2730_v59, %v2731_v5  ;;  %v3769_v59 = vld [vmem:[%s9852_s10 + $0x8] sm:$0xff] }
 0x40b   : > { %v2735_v6 = vsel %vm1491_vm4, %v2733_v34, %v2734_v4  ;;  %v2626_v15 = vld [vmem:[#allocation2 + $0xe0] sm:$0x7f]  ;;  %3791 = vperm.xlu0 %7429, %v3769_v59   ;;  %v3777_v59 = vld [vmem:[%s9852_s10 + $0x48] sm:$0xff] }
 0x40c   : > { %6149 = vmatprep.mubr.msk.f32.mxu1 %vm1120_vm11, %v2735_v6  ;;  %v2627_v10 = vld [vmem:[#allocation2 + $0xe8] sm:$0x7f]  ;;  %v2736_v17 = vrot.slane %v2626_v15, 7  ;;  %v3768_v34 = vld [vmem:[%s9852_s10] sm:$0xff] }
 0x40d   : > { %2942 = vmatmul.mubr.f32.gmra.mrb[28].mxu1 %v2732_v9  ;;  %v2738_v16 = vrot.slane %v2627_v10, 7  ;;  %3786 = vperm.xlu1 %7430, %v3768_v34  }
 0x40e   : > { %v2737_v21 = vsel %vm1491_vm4, %v2731_v5, %v2736_v17  ;;  %v2760_v5 = vrot.slane %v2640_v47, 7  ;;  %v3659_v17 = vld [vmem:[%s9851_s9 + $0x18] sm:$0xff]  ;;  %v3776_v47 = vld [vmem:[%s9852_s10 + $0x40] sm:$0xff] }
 0x40f   : > { %v2739_v19 = vsel %vm1491_vm4, %v2734_v4, %v2738_v16  ;;  %v2763_v4 = vrot.slane %v2641_v37, 7  ;;  %v3658_v16 = vld [vmem:[%s9851_s9 + $0x10] sm:$0xff]  ;;  %3689 = vperm.xlu0 %7429, %v3659_v17   ;;  %v6196_v37 = vld [vmem:[%s9849_s7 + $0x138] sm:$0xff] }
 0x410   : > { %6150 = vmatprep.mubr.msk.f32.mxu1 %vm1120_vm11, %v2739_v19  ;;  %v6200_v17 = vld [vmem:[%s9849_s7 + $0x158] sm:$0xff] }
 0x411   : > { %2947 = vmatmul.mubr.f32.gmra.mrb[30].mxu1 %v2737_v21  ;;  %3684 = vperm.xlu1 %7430, %v3658_v16   ;;  %v3667_v16 = vld [vmem:[%s9851_s9 + $0x58] sm:$0xff] }
 0x417   : > { %v2539_v55 = vpop.permute.xlu0 %2538 }
 0x418   : > { %2587 = vst.msk [vmem:[#allocation2 + $0x110] sm:$0xff] %vm2570_vm12, %v2539_v55 }
 0x419   : > { %2588 = vst.msk [vmem:[#allocation2 + $0x118] sm:$0xff] %vm1120_vm11, %v2539_v55 }
 0x41b   : > { %v2541_v22 = vpop.permute.xlu1 %2540 }
 0x41c   : > { %2589 = vst.msk [vmem:[#allocation2 + $0x120] sm:$0xff] %vm2570_vm12, %v2541_v22 }
 0x41d   : > { %2590 = vst.msk [vmem:[#allocation2 + $0x128] sm:$0xff] %vm1120_vm11, %v2541_v22 }
 0x41f   : > { %v8737_v62 = vld [vmem:[#allocation2 + $0x110] sm:$0xff] }
 0x420   : > { %v8735_v28 = vld [vmem:[#allocation2 + $0x118] sm:$0xff]  ;;  %v2741_v13 = vrot.slane %v8737_v62, 7 }
 0x421   : > { %v2744_v31 = vrot.slane %v8735_v28, 7 }
 0x422   : > { %v2742_v35 = vsel %vm1491_vm4, %v2740_v11, %v2741_v13  ;;  %v3771_v11 = vld [vmem:[%s9852_s10 + $0x18] sm:$0xff] }
 0x423   : > { %v2745_v33 = vsel %vm1491_vm4, %v2743_v26, %v2744_v31  ;;  %v2632_v24 = vld [vmem:[#allocation2 + $0x120] sm:$0x7f]  ;;  %v3770_v26 = vld [vmem:[%s9852_s10 + $0x10] sm:$0xff]  ;;  %3801 = vperm.xlu0 %7429, %v3771_v11  }
 0x424   : > { %6151 = vmatprep.mubr.msk.f32.mxu1 %vm1120_vm11, %v2745_v33  ;;  %v2633_v8 = vld [vmem:[#allocation2 + $0x128] sm:$0x7f]  ;;  %v2746_v38 = vrot.slane %v2632_v24, 7  ;;  %3796 = vperm.xlu1 %7430, %v3770_v26   ;;  %v3660_v33 = vld [vmem:[%s9851_s9 + $0x20] sm:$0xff] }
 0x425   : > { %2952 = vmatmul.mubr.f32.gmra.mrb[32].mxu1 %v2742_v35  ;;  %v2748_v36 = vrot.slane %v2633_v8, 7  ;;  %v3661_v35 = vld [vmem:[%s9851_s9 + $0x28] sm:$0xff]  ;;  %v3772_v24 = vld [vmem:[%s9852_s10 + $0x20] sm:$0xff] }
 0x426   : > { %v2747_v41 = vsel %vm1491_vm4, %v2741_v13, %v2746_v38  ;;  %v3668_v26 = vld [vmem:[%s9851_s9 + $0x60] sm:$0xff] }
 0x427   : > { %v2749_v40 = vsel %vm1491_vm4, %v2744_v31, %v2748_v36  ;;  %3699 = vperm.xlu0 %7429, %v3661_v35   ;;  %v3773_v36 = vld [vmem:[%s9852_s10 + $0x28] sm:$0xff]  ;;  %v3780_v35 = vld [vmem:[%s9852_s10 + $0x60] sm:$0xff] }
 0x428   : > { %6152 = vmatprep.mubr.msk.f32.mxu1 %vm1120_vm11, %v2749_v40  ;;  %3694 = vperm.xlu1 %7430, %v3660_v33   ;;  %v2647_v40 = vld [vmem:[#allocation2 + $0x1c8] sm:$0x80]  ;;  %v8923_v33 = vld [vmem:[#allocation2 + $0x60] sm:$0xff] }
 0x429   : > { %2957 = vmatmul.mubr.f32.gmra.mrb[34].mxu1 %v2747_v41  ;;  %v2646_v41 = vld [vmem:[#allocation2 + $0x1c0] sm:$0x80]  ;;  %v2773_v20 = vrot.slane %v2647_v40, 7  ;;  %v3670_v40 = vld [vmem:[%s9851_s9 + $0x70] sm:$0xff] }
 0x42a   : > { %v2770_v42 = vrot.slane %v2646_v41, 7 }
 0x42b   : > { %3811 = vperm.xlu0 %7429, %v3773_v36   ;;  %v6205_v36 = vld [vmem:[%s9849_s7 + $0x180] sm:$0xff] }
 0x42c   : > { %3806 = vperm.xlu1 %7430, %v3772_v24   ;;  %v3781_v24 = vld [vmem:[%s9852_s10 + $0x68] sm:$0xff] }
 0x42f   : > { %v2543_v3 = vpop.permute.xlu0 %2542 }
 0x430   : > { %2591 = vst.msk [vmem:[#allocation2 + $0x150] sm:$0xff] %vm2570_vm12, %v2543_v3 }
 0x431   : > { %2592 = vst.msk [vmem:[#allocation2 + $0x158] sm:$0xff] %vm1120_vm11, %v2543_v3  ;;  %v3662_v3 = vld [vmem:[%s9851_s9 + $0x30] sm:$0xff] }
 0x432   : > { %3704 = vperm.xlu1 %7430, %v3662_v3   ;;  %v3671_v3 = vld [vmem:[%s9851_s9 + $0x78] sm:$0xff] }
 0x433   : > { %v2545_v48 = vpop.permute.xlu1 %2544 }
 0x434   : > { %2593 = vst.msk [vmem:[#allocation2 + $0x160] sm:$0xff] %vm2570_vm12, %v2545_v48 }
 0x435   : > { %2594 = vst.msk [vmem:[#allocation2 + $0x168] sm:$0xff] %vm1120_vm11, %v2545_v48  ;;  %v3663_v48 = vld [vmem:[%s9851_s9 + $0x38] sm:$0xff] }
 0x436   : > { %3709 = vperm.xlu0 %7429, %v3663_v48   ;;  %v6208_v48 = vld [vmem:[%s9849_s7 + $0x198] sm:$0xff] }
 0x437   : > { %v8753_v14 = vld [vmem:[#allocation2 + $0x150] sm:$0xff] }
 0x438   : > { %v8751_v18 = vld [vmem:[#allocation2 + $0x158] sm:$0xff]  ;;  %v2751_v32 = vrot.slane %v8753_v14, 7 }
 0x439   : > { %v2754_v45 = vrot.slane %v8751_v18, 7 }
 0x43a   : > { %v2752_v54 = vsel %vm1491_vm4, %v2750_v44, %v2751_v32 }
 0x43b   : > { %v2755_v53 = vsel %vm1491_vm4, %v2753_v43, %v2754_v45  ;;  %v2638_v39 = vld [vmem:[#allocation2 + $0x160] sm:$0x7f] }
 0x43c   : > { %6153 = vmatprep.mubr.msk.f32.mxu1 %vm1120_vm11, %v2755_v53  ;;  %v2639_v49 = vld [vmem:[#allocation2 + $0x168] sm:$0x7f]  ;;  %v2756_v58 = vrot.slane %v2638_v39, 7  ;;  %v3774_v53 = vld [vmem:[%s9852_s10 + $0x30] sm:$0xff] }
 0x43d   : > { %2962 = vmatmul.mubr.f32.gmra.mrb[36].mxu1 %v2752_v54  ;;  %v2758_v56 = vrot.slane %v2639_v49, 7  ;;  %v3775_v54 = vld [vmem:[%s9852_s10 + $0x38] sm:$0xff]  ;;  %3816 = vperm.xlu1 %7430, %v3774_v53   ;;  %v6209_v53 = vld [vmem:[%s9849_s7 + $0x1a0] sm:$0xff] }
 0x43e   : > { %v2757_v25 = vsel %vm1491_vm4, %v2751_v32, %v2756_v58  ;;  %3821 = vperm.xlu0 %7429, %v3775_v54   ;;  %v6210_v54 = vld [vmem:[%s9849_s7 + $0x1a8] sm:$0xff] }
 0x43f   : > { %v2759_v60 = vsel %vm1491_vm4, %v2754_v45, %v2758_v56 }
 0x440   : > { %6154 = vmatprep.mubr.msk.f32.mxu1 %vm1120_vm11, %v2759_v60 }
 0x441   : > { %2967 = vmatmul.mubr.f32.gmra.mrb[38].mxu1 %v2757_v25 }
 0x442   : > { %3719 = vperm.xlu0 %7429, %v3665_v12   ;;  %v9003_v12 = vld [vmem:[#allocation2 + $0x120] sm:$0xff] }
 0x446   : > { %3831 = vperm.xlu0 %7429, %v3777_v59  }
 0x447   : > { %v2547_v7 = vpop.permute.xlu0 %2546 }
 0x448   : > { %2595 = vst.msk [vmem:[#allocation2 + $0x190] sm:$0xff] %vm2570_vm12, %v2547_v7 }
 0x449   : > { %2596 = vst.msk [vmem:[#allocation2 + $0x198] sm:$0xff] %vm1120_vm11, %v2547_v7  ;;  %v3664_v7 = vld [vmem:[%s9851_s9 + $0x40] sm:$0xff] }
 0x44a   : > { %3714 = vperm.xlu1 %7430, %v3664_v7   ;;  %3729 = vperm.xlu0 %7429, %v3667_v16   ;;  %v6213_v7 = vld [vmem:[%s9849_s7 + $0x1c0] sm:$0xff] }
 0x44b   : > { %v2549_v61 = vpop.permute.xlu1 %2548 }
 0x44c   : > { %2597 = vst.msk [vmem:[#allocation2 + $0x1a0] sm:$0xff] %vm2570_vm12, %v2549_v61 }
 0x44d   : > { %2598 = vst.msk [vmem:[#allocation2 + $0x1a8] sm:$0xff] %vm1120_vm11, %v2549_v61  ;;  %v6195_v61 = vld [vmem:[%s9849_s7 + $0x130] sm:$0xff] }
 0x44e   : > { %v7209_v34 = vpack.c.bf16 %v6196_v37, %v6195_v61  ;;  %3826 = vperm.xlu1 %7430, %v3776_v47   ;;  %v3251_v37 = vld [vmem:[#allocation2 + $0x10] sm:$0xfe] }
 0x44f   : > { %v8781_v9 = vld [vmem:[#allocation2 + $0x190] sm:$0xff] }
 0x450   : > { %v8779_v6 = vld [vmem:[#allocation2 + $0x198] sm:$0xff]  ;;  %v2761_v15 = vrot.slane %v8781_v9, 7 }
 0x451   : > { %v2764_v10 = vrot.slane %v8779_v6, 7 }
 0x452   : > { %v2762_v21 = vsel %vm1491_vm4, %v2760_v5, %v2761_v15  ;;  %v6198_v5 = vld [vmem:[%s9849_s7 + $0x148] sm:$0xff] }
 0x453   : > { %v2765_v19 = vsel %vm1491_vm4, %v2763_v4, %v2764_v10  ;;  %v2644_v22 = vld [vmem:[#allocation2 + $0x1a0] sm:$0x7f] }
 0x454   : > { %6155 = vmatprep.mubr.msk.f32.mxu1 %vm1120_vm11, %v2765_v19  ;;  %v2645_v55 = vld [vmem:[#allocation2 + $0x1a8] sm:$0x7f]  ;;  %v2766_v27 = vrot.slane %v2644_v22, 7  ;;  %v6197_v4 = vld [vmem:[%s9849_s7 + $0x140] sm:$0xff]  ;;  %v3779_v22 = vld [vmem:[%s9852_s10 + $0x58] sm:$0xff] }
 0x455   : > { %2972 = vmatmul.mubr.f32.gmra.mrb[40].mxu1 %v2762_v21  ;;  %v2768_v23 = vrot.slane %v2645_v55, 7  ;;  %v8887_v19 = vld [vmem:[#allocation2 + $0x20] sm:$0xff]  ;;  %v3778_v21 = vld [vmem:[%s9852_s10 + $0x50] sm:$0xff]  ;;  %3841 = vperm.xlu0 %7429, %v3779_v22  }
 0x456   : > { %v2767_v13 = vsel %vm1491_vm4, %v2761_v15, %v2766_v27  ;;  %v7212_v15 = vpack.c.bf16 %v6198_v5, %v6197_v4  ;;  %v6202_v27 = vld [vmem:[%s9849_s7 + $0x168] sm:$0xff]  ;;  %v3347_v4 = vrot.slane %v3251_v37, 1  ;;  %v3275_v37 = vld [vmem:[#allocation2 + $0x110] sm:$0xfe] }
 0x457   : > { %v2769_v31 = vsel %vm1491_vm4, %v2764_v10, %v2768_v23  ;;  %v8870_v10 = vld [vmem:[#allocation2 + $0x28] sm:$0xff]  ;;  %v6201_v23 = vld [vmem:[%s9849_s7 + $0x160] sm:$0xff] }
 0x458   : > { %6156 = vmatprep.mubr.msk.f32.mxu1 %vm1120_vm11, %v2769_v31  ;;  %v7218_v11 = vpack.c.bf16 %v6202_v27, %v6201_v23  ;;  %v3669_v31 = vld [vmem:[%s9851_s9 + $0x68] sm:$0xff]  ;;  %v3261_v27 = vld [vmem:[#allocation2 + $0x70] sm:$0x1] }
 0x459   : > { %2977 = vmatmul.mubr.f32.gmra.mrb[42].mxu1 %v2767_v13  ;;  %v6204_v13 = vld [vmem:[%s9849_s7 + $0x178] sm:$0xff]  ;;  %3739 = vperm.xlu0 %7429, %v3669_v31  }
 0x45a   : > { %v3264_v31 = vld [vmem:[#allocation2 + $0x98] sm:$0xfe] }
 0x45b   : > { %v2551_v8 = vpop.permute.xlu0 %2550 }
 0x45c   : > { %2599 = vst.msk [vmem:[#allocation2 + $0x1d0] sm:$0xff] %vm2570_vm12, %v2551_v8 }
 0x45d   : > { %2600 = vst.msk [vmem:[#allocation2 + $0x1d8] sm:$0xff] %vm1120_vm11, %v2551_v8  ;;  %3851 = vperm.xlu0 %7429, %v3781_v24  }
 0x45f   : > { %v2553_v38 = vpop.permute.xlu1 %2552 }
 0x460   : > { %2601 = vst.msk [vmem:[#allocation2 + $0x1e0] sm:$0xff] %vm2570_vm12, %v2553_v38 }
 0x461   : > { %2602 = vst.msk [vmem:[#allocation2 + $0x1e8] sm:$0xff] %vm1120_vm11, %v2553_v38  ;;  %v6206_v38 = vld [vmem:[%s9849_s7 + $0x188] sm:$0xff]  ;;  %3749 = vperm.xlu0 %7429, %v3671_v3  }
 0x462   : > { %v7224_v41 = vpack.c.bf16 %v6206_v38, %v6205_v36 }
 0x463   : > { %v8827_v44 = vld [vmem:[#allocation2 + $0x1d0] sm:$0xff] }
 0x464   : > { %v8825_v43 = vld [vmem:[#allocation2 + $0x1d8] sm:$0xff]  ;;  %v2771_v32 = vrot.slane %v8827_v44, 7 }
 0x465   : > { %v2774_v45 = vrot.slane %v8825_v43, 7 }
 0x466   : > { %v2772_v39 = vsel %vm1491_vm4, %v2770_v42, %v2771_v32  ;;  %v3782_v42 = vld [vmem:[%s9852_s10 + $0x70] sm:$0xff] }
 0x467   : > { %v2775_v49 = vsel %vm1491_vm4, %v2773_v20, %v2774_v45  ;;  %v2650_v58 = vld [vmem:[#allocation2 + $0x1e0] sm:$0x7f] }
 0x468   : > { %6157 = vmatprep.mubr.msk.f32.mxu1 %vm1120_vm11, %v2775_v49  ;;  %v2651_v56 = vld [vmem:[#allocation2 + $0x1e8] sm:$0x7f]  ;;  %v2776_v25 = vrot.slane %v2650_v58, 7  ;;  %v8959_v20 = vld [vmem:[#allocation2 + $0xa0] sm:$0xff]  ;;  %v7230_v49 = vpack.c.bf16 %v6210_v54, %v6209_v53  ;;  %v3269_v53 = vld [vmem:[#allocation2 + $0xd0] sm:$0xfe] }
 0x469   : > { %2982 = vmatmul.mubr.f32.gmra.mrb[44].mxu1 %v2772_v39  ;;  %v2778_v60 = vrot.slane %v2651_v56, 7  ;;  %v6211_v39 = vld [vmem:[%s9849_s7 + $0x1b0] sm:$0xff]  ;;  %v6212_v56 = vld [vmem:[%s9849_s7 + $0x1b8] sm:$0xff]  ;;  %v8989_v58 = vld [vmem:[#allocation2 + $0xe0] sm:$0xff]  ;;  %v3368_v36 = vrot.slane %v8959_v20, 1 }
 0x46a   : > { %v2777_v46 = vsel %vm1491_vm4, %v2771_v32, %v2776_v25  ;;  %v3783_v32 = vld [vmem:[%s9852_s10 + $0x78] sm:$0xff]  ;;  %v7568_v25 = vld [vmem:[#allocation2 + $0x30] sm:$0xff]  ;;  %v9035_v47 = vld [vmem:[#allocation2 + $0x1e0] sm:$0xff] }
 0x46b   : > { %v2779_v50 = vsel %vm1491_vm4, %v2774_v45, %v2778_v60  ;;  %3861 = vperm.xlu0 %7429, %v3783_v32   ;;  %v8996_v60 = vld [vmem:[#allocation2 + $0x128] sm:$0xff] }
 0x46c   : > { %6158 = vmatprep.mubr.msk.f32.mxu1 %vm1120_vm11, %v2779_v50  ;;  %v3252_v50 = vld [vmem:[#allocation2 + $0x18] sm:$0xfe] }
 0x46d   : > { %2987 = vmatmul.mubr.f32.gmra.mrb[46].mxu1 %v2777_v46  ;;  %v9030_v46 = vld [vmem:[#allocation2 + $0x1e8] sm:$0xff]  ;;  %v3350_v61 = vrot.slane %v3252_v50, 1  ;;  %v3276_v50 = vld [vmem:[#allocation2 + $0x118] sm:$0xfe] }
 0x46e   : > { %6179 = vmatprep.mubr.msk.f32.mxu1 %vm1120_vm11, %v8601_v29  ;;  %v3666_v29 = vld [vmem:[%s9851_s9 + $0x50] sm:$0xff] }
 0x46f   : > { %3724 = vperm.xlu1 %7430, %v3666_v29   ;;  %v3258_v29 = vld [vmem:[#allocation2 + $0x58] sm:$0xfe] }
 0x471   : > { %3155 = vmatmul.mubr.f32.vlgmr.msra.gmra.mrb[16].mxu1 %v8603_v30  ;;  %v6199_v30 = vld [vmem:[%s9849_s7 + $0x150] sm:$0xff] }
 0x472   : > { %6180 = vmatprep.mubr.msk.f32.mxu1 %vm1120_vm11, %v8870_v10  ;;  %7210 = vmatpush1.bf16.msra.mxu1 %v7209_v34  ;;  %v7215_v55 = vpack.c.bf16 %v6200_v17, %v6199_v30  ;;  %v3348_v34 = vrot.slane %v8887_v19, 1  ;;  %v3262_v30 = vld [vmem:[#allocation2 + $0x78] sm:$0x1]  ;;  %v3360_v17 = vrot.slane %v3258_v29, 1  ;;  %v3282_v29 = vld [vmem:[#allocation2 + $0x158] sm:$0xfe] }
 0x473   : > { %7211 = vmatprep.subr.bf16.mxu1 %v7583_v57  ;;  %3836 = vperm.xlu1 %7430, %v3778_v21   ;;  %v3365_v23 = vrot.slane %v3262_v30, 1  ;;  %v3400_v30 = vrot.slane %v3282_v29, 1  ;;  %v9123_v29 = vld [vmem:[%s9850_s8] ss:$0 sm:$0xff] }
 0x474   : > { %v3349_v5 = vsel %vm1742_vm6, %v3347_v4, %v3348_v34  ;;  %v3279_v4 = vld [vmem:[#allocation2 + $0x130] sm:$0x1] }
 0x475   : > { %3160 = vmatmul.mubr.f32.gmra.mrb[18].mxu1 %v8887_v19  ;;  %v3257_v19 = vld [vmem:[#allocation2 + $0x50] sm:$0xfe] }
 0x476   : > { %6181 = vmatprep.mubr.msk.f32.mxu1 %vm1120_vm11, %v8649_v1  ;;  %7213 = vmatpush1.bf16.msra.mxu1 %v7212_v15  ;;  %v8906_v1 = vld [vmem:[#allocation2 + $0x68] sm:$0xff] }
 0x477   : > { %7214 = vmatprep.subr.bf16.mxu1 %v7583_v57  ;;  %3734 = vperm.xlu1 %7430, %v3668_v26   ;;  %v3361_v16 = vrot.slane %v8906_v1, 1  ;;  %v3357_v26 = vrot.slane %v3257_v19, 1 }
 0x479   : > { %3165 = vmatmul.mubr.f32.gmra.mrb[20].mxu1 %v8651_v2  ;;  %v6203_v2 = vld [vmem:[%s9849_s7 + $0x170] sm:$0xff]  ;;  %v3362_v22 = vsel %vm1742_vm6, %v3360_v17, %v3361_v16 }
 0x47a   : > { %6182 = vmatprep.mubr.msk.f32.mxu1 %vm1120_vm11, %v8906_v1  ;;  %7216 = vmatpush1.bf16.msra.mxu1 %v7215_v55  ;;  %v7221_v8 = vpack.c.bf16 %v6204_v13, %v6203_v2  ;;  %v3358_v55 = vrot.slane %v8923_v33, 1  ;;  %v3363_v1 = vrot.slane %v3261_v27, 1  ;;  %v3366_v2 = vsel %vm1742_vm6, %v3361_v16, %v3365_v23  ;;  %v3281_v17 = vld [vmem:[#allocation2 + $0x150] sm:$0xfe]  ;;  %v3285_v23 = vld [vmem:[#allocation2 + $0x170] sm:$0x1] }
 0x47b   : > { %7217 = vmatprep.subr.bf16.mxu1 %v7583_v57  ;;  %3846 = vperm.xlu1 %7430, %v3780_v35   ;;  %v3370_v35 = vrot.slane %v3264_v31, 1  ;;  %v3397_v27 = vrot.slane %v3281_v17, 1 }
 0x47c   : > { %v3364_v24 = vsel %vm1742_vm6, %v3358_v55, %v3363_v1 }
 0x47d   : > { %3170 = vmatmul.mubr.f32.gmra.mrb[22].mxu1 %v8923_v33  ;;  %v3268_v33 = vld [vmem:[#allocation2 + $0xb8] sm:$0x1] }
 0x47e   : > { %6183 = vmatprep.mubr.msk.f32.mxu1 %vm1120_vm11, %v8698_v51  ;;  %7219 = vmatpush1.bf16.msra.mxu1 %v7218_v11  ;;  %v8942_v51 = vld [vmem:[#allocation2 + $0xa8] sm:$0xff]  ;;  %v3359_v11 = vsel %vm1742_vm6, %v3357_v26, %v3358_v55 }
 0x47f   : > { %7220 = vmatprep.subr.bf16.mxu1 %v7583_v57  ;;  %3744 = vperm.xlu1 %7430, %v3670_v40   ;;  %v3371_v13 = vrot.slane %v8942_v51, 1  ;;  %v3375_v40 = vrot.slane %v3268_v33, 1 }
 0x481   : > { %3175 = vmatmul.mubr.f32.gmra.mrb[24].mxu1 %v8700_v52  ;;  %v6207_v52 = vld [vmem:[%s9849_s7 + $0x190] sm:$0xff]  ;;  %v3372_v38 = vsel %vm1742_vm6, %v3370_v35, %v3371_v13 }
 0x482   : > { %6184 = vmatprep.mubr.msk.f32.mxu1 %vm1120_vm11, %v8942_v51  ;;  %7222 = vmatpush1.bf16.msra.mxu1 %v7221_v8  ;;  %v7227_v45 = vpack.c.bf16 %v6208_v48, %v6207_v52  ;;  %v3263_v8 = vld [vmem:[#allocation2 + $0x90] sm:$0xfe]  ;;  %v3270_v48 = vld [vmem:[#allocation2 + $0xd8] sm:$0xfe] }
 0x483   : > { %7223 = vmatprep.subr.bf16.mxu1 %v7583_v57  ;;  %3856 = vperm.xlu1 %7430, %v3782_v42   ;;  %v3367_v3 = vrot.slane %v3263_v8, 1  ;;  %v3376_v42 = vsel %vm1742_vm6, %v3371_v13, %v3375_v40  ;;  %v3380_v32 = vrot.slane %v3270_v48, 1  ;;  %v3287_v13 = vld [vmem:[#allocation2 + $0x190] sm:$0xfe] }
 0x484   : > { %v3293_v48 = vld [vmem:[#allocation2 + $0x1d0] sm:$0xfe] }
 0x485   : > { %3180 = vmatmul.mubr.f32.gmra.mrb[26].mxu1 %v8959_v20  ;;  %v3369_v52 = vsel %vm1742_vm6, %v3367_v3, %v3368_v36  ;;  %v3274_v20 = vld [vmem:[#allocation2 + $0xf8] sm:$0x1] }
 0x486   : > { %6185 = vmatprep.mubr.msk.f32.mxu1 %vm1120_vm11, %v8719_v63  ;;  %7225 = vmatpush1.bf16.msra.mxu1 %v7224_v41  ;;  %v8978_v63 = vld [vmem:[#allocation2 + $0xe8] sm:$0xff]  ;;  %v3267_v41 = vld [vmem:[#allocation2 + $0xb0] sm:$0x1] }
 0x487   : > { %7226 = vmatprep.subr.bf16.mxu1 %v7583_v57  ;;  %v3373_v51 = vrot.slane %v3267_v41, 1  ;;  %v3294_v41 = vld [vmem:[#allocation2 + $0x1d8] sm:$0xfe] }
 0x489   : > { %3185 = vmatmul.mubr.f32.gmra.mrb[28].mxu1 %v8721_v0  ;;  %v7233_v0 = vpack.c.bf16 %v6212_v56, %v6211_v39  ;;  %v3374_v54 = vsel %vm1742_vm6, %v3368_v36, %v3373_v51  ;;  %v3385_v56 = vrot.slane %v3274_v20, 1  ;;  %v3291_v36 = vld [vmem:[#allocation2 + $0x1b0] sm:$0x1]  ;;  %v3420_v51 = vrot.slane %v3294_v41, 1 }
 0x48a   : > { %6186 = vmatprep.mubr.msk.f32.mxu1 %vm1120_vm11, %v8978_v63  ;;  %7228 = vmatpush1.bf16.msra.mxu1 %v7227_v45  ;;  %v3381_v45 = vrot.slane %v8978_v63, 1 }
 0x48b   : > { %7229 = vmatprep.subr.bf16.mxu1 %v7583_v57 }
 0x48c   : > { %v3382_v39 = vsel %vm1742_vm6, %v3380_v32, %v3381_v45 }
 0x48d   : > { %3190 = vmatmul.mubr.f32.gmra.mrb[30].mxu1 %v8989_v58 }
 0x48e   : > { %6187 = vmatprep.mubr.msk.f32.mxu1 %vm1120_vm11, %v8735_v28  ;;  %7231 = vmatpush1.bf16.msra.mxu1 %v7230_v49  ;;  %v9010_v28 = vld [vmem:[#allocation2 + $0x168] sm:$0xff]  ;;  %v3378_v49 = vrot.slane %v8989_v58, 1  ;;  %v3280_v58 = vld [vmem:[#allocation2 + $0x138] sm:$0x1] }
 0x48f   : > { %7232 = vmatprep.subr.bf16.mxu1 %v7583_v57  ;;  %v3401_v16 = vrot.slane %v9010_v28, 1 }
 0x491   : > { %3195 = vmatmul.mubr.f32.gmra.mrb[32].mxu1 %v8737_v62  ;;  %v9014_v62 = vld [vmem:[#allocation2 + $0x160] sm:$0xff]  ;;  %v3402_v55 = vsel %vm1742_vm6, %v3400_v30, %v3401_v16 }
 0x492   : > { %6188 = vmatprep.mubr.msk.f32.mxu1 %vm1120_vm11, %v8996_v60  ;;  %7234 = vmatpush1.bf16.msra.mxu1 %v7233_v0  ;;  %v3273_v0 = vld [vmem:[#allocation2 + $0xf0] sm:$0x1] }
 0x493   : > { %3531 = vmatprep.subr.mxu1 %v7568_v25  ;;  %v3377_v25 = vrot.slane %v3269_v53, 1  ;;  %v3383_v63 = vrot.slane %v3273_v0, 1  ;;  %v3297_v53 = vld [vmem:[#allocation2 + $0x1f0] sm:$0x1]  ;;  %v4009_v0 = vld [vmem:[%s9853_s11 + $0x8] sm:$0xff] }
 0x495   : > { %3200 = vmatmul.mubr.f32.gmra.mrb[34].mxu1 %v9003_v12 }
 0x496   : > { %6189 = vmatprep.mubr.msk.f32.mxu1 %vm1120_vm11, %v8751_v18  ;;  %3532 = vmatpush1.msra.mxu1 %v6213_v7  ;;  %v9020_v18 = vld [vmem:[#allocation2 + $0x1a8] sm:$0xff]  ;;  %v3379_v7 = vsel %vm1742_vm6, %v3377_v25, %v3378_v49 }
 0x497   : > { %7290 = vmatprep.subr.bf16.mxu1 %v7583_v57  ;;  %v3411_v31 = vrot.slane %v9020_v18, 1 }
 0x499   : > { %3205 = vmatmul.mubr.f32.gmra.mrb[36].mxu1 %v8753_v14  ;;  %v9024_v14 = vld [vmem:[#allocation2 + $0x1a0] sm:$0xff] }
 0x49a   : > { %6190 = vmatprep.mubr.msk.f32.mxu1 %vm1120_vm11, %v9010_v28  ;;  %v3403_v28 = vrot.slane %v3285_v23, 1  ;;  %v3408_v35 = vrot.slane %v9024_v14, 1 }
 0x49d   : > { %3210 = vmatmul.mubr.f32.gmra.mrb[38].mxu1 %v9014_v62 }
 0x49e   : > { %6191 = vmatprep.mubr.msk.f32.mxu1 %vm1120_vm11, %v8779_v6  ;;  %v3351_v6 = vrot.slane %v8870_v10, 1 }
 0x4a1   : > { %3215 = vmatmul.mubr.f32.gmra.mrb[40].mxu1 %v8781_v9  ;;  %v3256_v9 = vld [vmem:[#allocation2 + $0x38] sm:$0x1] }
 0x4a2   : > { %6192 = vmatprep.mubr.msk.f32.mxu1 %vm1120_vm11, %v9020_v18  ;;  %v3355_v59 = vrot.slane %v3256_v9, 1  ;;  %v3391_v9 = vrot.slane %v8996_v60, 1  ;;  %v3393_v60 = vrot.slane %v3279_v4, 1  ;;  %v3413_v18 = vrot.slane %v3291_v36, 1 }
 0x4a4   : > { %v3356_v15 = vsel %vm1742_vm6, %v3351_v6, %v3355_v59 }
 0x4a5   : > { %3220 = vmatmul.mubr.f32.gmra.mrb[42].mxu1 %v9024_v14  ;;  %v3298_v14 = vld [vmem:[#allocation2 + $0x1f8] sm:$0x1] }
 0x4a6   : > { %6193 = vmatprep.mubr.msk.f32.mxu1 %vm1120_vm11, %v8825_v43  ;;  %v3352_v43 = vsel %vm1742_vm6, %v3350_v61, %v3351_v6  ;;  %v3386_v6 = vsel %vm1742_vm6, %v3381_v45, %v3385_v56  ;;  %v3390_v61 = vrot.slane %v3276_v50, 1  ;;  %v3418_v45 = vrot.slane %v9035_v47, 1 }
 0x4a7   : > { %v3425_v32 = vrot.slane %v3298_v14, 1 }
 0x4a8   : > { %v3392_v59 = vsel %vm1742_vm6, %v3390_v61, %v3391_v9  ;;  %v3680_v61 = vpop.permute.xlu1 %3679 }
 0x4a9   : > { %3225 = vmatmul.mubr.f32.gmra.mrb[44].mxu1 %v8827_v44  ;;  %v3255_v44 = vld [vmem:[#allocation2 + $0x30] sm:$0x1] }
 0x4aa   : > { %6194 = vmatprep.mubr.msk.f32.mxu1 %vm1120_vm11, %v9030_v46  ;;  %v3353_v10 = vrot.slane %v3255_v44, 1  ;;  %v3395_v44 = vrot.slane %v3280_v58, 1 }
 0x4ac   : > { %v3354_v21 = vsel %vm1742_vm6, %v3348_v34, %v3353_v10  ;;  %v3384_v34 = vsel %vm1742_vm6, %v3378_v49, %v3383_v63  ;;  %v4011_v63 = vld [vmem:[%s9853_s11 + $0x18] sm:$0xff] }
 0x4ad   : > { %3230 = vmatmul.mubr.f32.gmra.mrb[46].mxu1 %v9035_v47  ;;  %v4008_v47 = vld [vmem:[%s9853_s11] sm:$0xff] }
 0x4ae   : > { %6214 = vmatprep.mubr.msk.f32.mxu1 %vm1120_vm11, %v3352_v43  ;;  %v3388_v43 = vrot.slane %v9003_v12, 1  ;;  %v3286_v12 = vld [vmem:[#allocation2 + $0x178] sm:$0x1]  ;;  %v7235_v25 = vpack.c.bf16 %v4009_v0, %v4008_v47 }
 0x4b0   : > { %v3394_v19 = vsel %vm1742_vm6, %v3388_v43, %v3393_v60  ;;  %7236 = vmatprep.subr.bf16.mxu0 %v7235_v25 }
 0x4b1   : > { %3560 = vmatmul.mubr.f32.vlgmr.msra.gmra.mrb[16].mxu1 %v3349_v5  ;;  %v3387_v5 = vrot.slane %v3275_v37, 1  ;;  %7238 = vmatpush3.bf16.msra.mxu0 %v7235_v25  ;;  %v3675_v37 = vpop.permute.xlu0 %3674 }
 0x4b2   : > { %6215 = vmatprep.mubr.msk.f32.mxu1 %vm1120_vm11, %v3356_v15  ;;  %v3396_v15 = vsel %vm1742_vm6, %v3391_v9, %v3395_v44  ;;  %v4013_v9 = vld [vmem:[%s9853_s11 + $0x28] sm:$0xff] }
 0x4b3   : > { %v3389_v10 = vsel %vm1742_vm6, %v3387_v5, %v3388_v43 }
 0x4b5   : > { %3565 = vmatmul.mubr.f32.gmra.mrb[18].mxu1 %v3354_v21  ;;  %v3398_v21 = vrot.slane %v9014_v62, 1  ;;  %v3292_v62 = vld [vmem:[#allocation2 + $0x1b8] sm:$0x1]  ;;  %v3792_v43 = vpop.permute.xlu0 %3791 }
 0x4b6   : > { %6216 = vmatprep.mubr.msk.f32.mxu1 %vm1120_vm11, %v3362_v22  ;;  %v3405_v22 = vrot.slane %v3286_v12, 1 }
 0x4b7   : > { %v3399_v26 = vsel %vm1742_vm6, %v3397_v27, %v3398_v21  ;;  %v3404_v33 = vsel %vm1742_vm6, %v3398_v21, %v3403_v28 }
 0x4b8   : > { %v3406_v1 = vsel %vm1742_vm6, %v3401_v16, %v3405_v22 }
 0x4b9   : > { %3570 = vmatmul.mubr.f32.gmra.mrb[20].mxu1 %v3359_v11  ;;  %v3288_v11 = vld [vmem:[#allocation2 + $0x198] sm:$0xfe]  ;;  %v3690_v44 = vpop.permute.xlu0 %3689 }
 0x4ba   : > { %6217 = vmatprep.mubr.msk.f32.mxu1 %vm1120_vm11, %v3366_v2  ;;  %v3410_v2 = vrot.slane %v3288_v11, 1 }
 0x4bc   : > { %v3412_v8 = vsel %vm1742_vm6, %v3410_v2, %v3411_v31 }
 0x4bd   : > { %3575 = vmatmul.mubr.f32.gmra.mrb[22].mxu1 %v3364_v24  ;;  %v3415_v24 = vrot.slane %v3292_v62, 1  ;;  %v3802_v5 = vpop.permute.xlu0 %3801 }
 0x4be   : > { %6218 = vmatprep.mubr.msk.f32.mxu1 %vm1120_vm11, %v3372_v38  ;;  %v3407_v38 = vrot.slane %v3287_v13, 1 }
 0x4bf   : > { %v3416_v3 = vsel %vm1742_vm6, %v3411_v31, %v3415_v24 }
 0x4c0   : > { %v3409_v40 = vsel %vm1742_vm6, %v3407_v38, %v3408_v35 }
 0x4c1   : > { %3580 = vmatmul.mubr.f32.gmra.mrb[24].mxu1 %v3369_v52  ;;  %v3421_v52 = vrot.slane %v9030_v46, 1  ;;  %v3423_v46 = vrot.slane %v3297_v53, 1  ;;  %v3700_v60 = vpop.permute.xlu0 %3699 }
 0x4c2   : > { %6219 = vmatprep.mubr.msk.f32.mxu1 %vm1120_vm11, %v3376_v42  ;;  %v3414_v42 = vsel %vm1742_vm6, %v3408_v35, %v3413_v18 }
 0x4c3   : > { %v3422_v20 = vsel %vm1742_vm6, %v3420_v51, %v3421_v52  ;;  %v3424_v56 = vsel %vm1742_vm6, %v3418_v45, %v3423_v46 }
 0x4c5   : > { %3585 = vmatmul.mubr.f32.gmra.mrb[26].mxu1 %v3374_v54  ;;  %v3417_v54 = vrot.slane %v3293_v48, 1 }
 0x4c6   : > { %6220 = vmatprep.mubr.msk.f32.mxu1 %vm1120_vm11, %v3382_v39  ;;  %v3426_v39 = vsel %vm1742_vm6, %v3421_v52, %v3425_v32 }
 0x4c7   : > { %v3419_v49 = vsel %vm1742_vm6, %v3417_v54, %v3418_v45 }
 0x4c9   : > { %3590 = vmatmul.mubr.f32.gmra.mrb[28].mxu1 %v3379_v7  ;;  %v4010_v7 = vld [vmem:[%s9853_s11 + $0x10] sm:$0xff] }
 0x4ca   : > { %6221 = vmatprep.mubr.msk.f32.mxu1 %vm1120_vm11, %v3386_v6  ;;  %v7239_v50 = vpack.c.bf16 %v4011_v63, %v4010_v7  ;;  %v4012_v6 = vld [vmem:[%s9853_s11 + $0x20] sm:$0xff] }
 0x4cb   : > { %v7243_v58 = vpack.c.bf16 %v4013_v9, %v4012_v6 }
 0x4cc   : > { %7240 = vmatprep.subr.bf16.mxu0 %v7239_v50 }
 0x4cd   : > { %3595 = vmatmul.mubr.f32.gmra.mrb[30].mxu1 %v3384_v34  ;;  %7242 = vmatpush3.bf16.msra.mxu0 %v7239_v50  ;;  %v3787_v34 = vpop.permute.xlu1 %3786 }
 0x4ce   : > { %6222 = vmatprep.mubr.msk.f32.mxu1 %vm1120_vm11, %v3392_v59  ;;  %7244 = vmatprep.subr.bf16.mxu0 %v7243_v58 }
 0x4d1   : > { %3600 = vmatmul.mubr.f32.gmra.mrb[32].mxu1 %v3389_v10  ;;  %7246 = vmatpush3.bf16.msra.mxu0 %v7243_v58  ;;  %v3685_v59 = vpop.permute.xlu1 %3684 }
 0x4d2   : > { %6223 = vmatprep.mubr.msk.f32.mxu1 %vm1120_vm11, %v3396_v15  ;;  %7247 = vmatprep.subr.bf16.mxu0 %v7583_v57 }
 0x4d5   : > { %3605 = vmatmul.mubr.f32.gmra.mrb[34].mxu1 %v3394_v19  ;;  %v3797_v4 = vpop.permute.xlu1 %3796  ;;  %v3812_v19 = vpop.permute.xlu0 %3811 }
 0x4d6   : > { %6224 = vmatprep.mubr.msk.f32.mxu1 %vm1120_vm11, %v3402_v55 }
 0x4d9   : > { %3610 = vmatmul.mubr.f32.gmra.mrb[36].mxu1 %v3399_v26  ;;  %v3695_v10 = vpop.permute.xlu1 %3694  ;;  %v3710_v2 = vpop.permute.xlu0 %3709 }
 0x4da   : > { %6225 = vmatprep.mubr.msk.f32.mxu1 %vm1120_vm11, %v3406_v1 }
 0x4dd   : > { %3615 = vmatmul.mubr.f32.gmra.mrb[38].mxu1 %v3404_v33  ;;  %v3807_v15 = vpop.permute.xlu1 %3806  ;;  %v3822_v41 = vpop.permute.xlu0 %3821 }
 0x4de   : > { %6226 = vmatprep.mubr.msk.f32.mxu1 %vm1120_vm11, %v3412_v8 }
 0x4e1   : > { %3620 = vmatmul.mubr.f32.gmra.mrb[40].mxu1 %v3409_v40  ;;  %v3705_v27 = vpop.permute.xlu1 %3704 }
 0x4e2   : > { %6227 = vmatprep.mubr.msk.f32.mxu1 %vm1120_vm11, %v3416_v3 }
 0x4e5   : > { %3625 = vmatmul.mubr.f32.gmra.mrb[42].mxu1 %v3414_v42  ;;  %v3817_v35 = vpop.permute.xlu1 %3816 }
 0x4e6   : > { %6228 = vmatprep.mubr.msk.f32.mxu1 %vm1120_vm11, %v3422_v20 }
 0x4e9   : > { %3630 = vmatmul.mubr.f32.gmra.mrb[44].mxu1 %v3419_v49  ;;  %v3715_v48 = vpop.permute.xlu1 %3714 }
 0x4ea   : > { %6229 = vmatprep.mubr.msk.f32.mxu1 %vm1120_vm11, %v3426_v39  ;;  %v3720_v39 = vpop.permute.xlu0 %3719 }
 0x4ed   : > { %3635 = vmatmul.mubr.f32.gmra.mrb[46].mxu1 %v3424_v56  ;;  %v3827_v25 = vpop.permute.xlu1 %3826 }
 0x584   : > { %v3561_v16 = vpop.f32.mrb[16].mxu1 }
 0x585   : > { %v9126_v12 = vadd.f32 %v9123_v29, %v3561_v16  ;;  %v3563_v30 = vpop.f32.mrb[17].mxu1 }
 0x587   : > { %v3752_v17 = vmul.f32 %v9126_v12, %v3675_v37 }
 0x588   : > { %v3566_v21 = vpop.f32.mrb[18].mxu1 }
 0x589   : > { %v3864_v55 = vadd.f32 %v3787_v34, %v3752_v17  ;;  %v9130_v22 = vadd.f32 %v9123_v29, %v3566_v21  ;;  %v3568_v23 = vpop.f32.mrb[19].mxu1  ;;  %v3832_v34 = vpop.permute.xlu0 %3831 }
 0x58b   : > { %v6230_v26 = vmul.f32 -1.442695, %v3864_v55  ;;  %v3753_v28 = vmul.f32 %v9130_v22, %v3680_v61 }
 0x58c   : > { %v3571_v11 = vpop.f32.mrb[20].mxu1 }
 0x58d   : > { %7471 = vpow2.f32 %v6230_v26  ;;  %v3865_v1 = vadd.f32 %v3792_v43, %v3753_v28  ;;  %v9134_v31 = vadd.f32 %v9123_v29, %v3571_v11  ;;  %v3573_v62 = vpop.f32.mrb[21].mxu1  ;;  %v3730_v26 = vpop.permute.xlu0 %3729 }
 0x58f   : > { %v6231_v13 = vmul.f32 -1.442695, %v3865_v1  ;;  %v3754_v33 = vmul.f32 %v9134_v31, %v3685_v59 }
 0x590   : > { %v3576_v8 = vpop.f32.mrb[22].mxu1 }
 0x591   : > { %7473 = vpow2.f32 %v6231_v13  ;;  %v3866_v24 = vadd.f32 %v3797_v4, %v3754_v33  ;;  %v9138_v36 = vadd.f32 %v9123_v29, %v3576_v8  ;;  %v3578_v38 = vpop.f32.mrb[23].mxu1 }
 0x593   : > { %v6232_v40 = vmul.f32 -1.442695, %v3866_v24  ;;  %v3755_v18 = vmul.f32 %v9138_v36, %v3690_v44 }
 0x594   : > { %v3581_v3 = vpop.f32.mrb[24].mxu1 }
 0x595   : > { %7475 = vpow2.f32 %v6232_v40  ;;  %v3867_v52 = vadd.f32 %v3802_v5, %v3755_v18  ;;  %v9142_v14 = vadd.f32 %v9123_v29, %v3581_v3  ;;  %v3583_v51 = vpop.f32.mrb[25].mxu1 }
 0x597   : > { %v7472_v42 = vpop.eup %7471  ;;  %v6233_v45 = vmul.f32 -1.442695, %v3867_v52  ;;  %v3756_v20 = vmul.f32 %v9142_v14, %v3695_v10  ;;  %v3725_v10 = vpop.permute.xlu1 %3724 }
 0x598   : > { %v3928_v32 = vadd.f32 1.0, %v7472_v42  ;;  %v3586_v53 = vpop.f32.mrb[26].mxu1 }
 0x599   : > { %7477 = vpow2.f32 %v6233_v45  ;;  %v3868_v54 = vadd.f32 %v3807_v15, %v3756_v20  ;;  %v9146_v49 = vadd.f32 %v9123_v29, %v3586_v53  ;;  %v3588_v46 = vpop.f32.mrb[27].mxu1 }
 0x59a   : > { %7479 = vrcp.f32 %v3928_v32 }
 0x59b   : > { %v7474_v56 = vpop.eup %7473  ;;  %v6234_v47 = vmul.f32 -1.442695, %v3868_v54  ;;  %v3757_v0 = vmul.f32 %v9146_v49, %v3700_v60 }
 0x59c   : > { %v3929_v7 = vadd.f32 1.0, %v7474_v56  ;;  %v3591_v63 = vpop.f32.mrb[28].mxu1 }
 0x59d   : > { %7481 = vpow2.f32 %v6234_v47  ;;  %v3869_v50 = vadd.f32 %v3812_v19, %v3757_v0  ;;  %v9150_v6 = vadd.f32 %v9123_v29, %v3591_v63  ;;  %v3593_v9 = vpop.f32.mrb[29].mxu1 }
 0x59e   : > { %7483 = vrcp.f32 %v3929_v7 }
 0x59f   : > { %v7476_v58 = vpop.eup %7475  ;;  %v6235_v61 = vmul.f32 -1.442695, %v3869_v50  ;;  %v3758_v37 = vmul.f32 %v9150_v6, %v3705_v27 }
 0x5a0   : > { %v3930_v43 = vadd.f32 1.0, %v7476_v58  ;;  %v3596_v59 = vpop.f32.mrb[30].mxu1 }
 0x5a1   : > { %7485 = vpow2.f32 %v6235_v61  ;;  %v3870_v44 = vadd.f32 %v3817_v35, %v3758_v37  ;;  %v9154_v4 = vadd.f32 %v9123_v29, %v3596_v59  ;;  %v3598_v5 = vpop.f32.mrb[31].mxu1 }
 0x5a2   : > { %7487 = vrcp.f32 %v3930_v43 }
 0x5a3   : > { %v7478_v60 = vpop.eup %7477  ;;  %v6236_v15 = vmul.f32 -1.442695, %v3870_v44  ;;  %v3759_v16 = vmul.f32 %v9154_v4, %v3710_v2  ;;  %v3837_v2 = vpop.permute.xlu1 %3836 }
 0x5a4   : > { %v7480_v30 = vpop.eup %7479  ;;  %v3931_v17 = vadd.f32 1.0, %v7478_v60  ;;  %v3601_v19 = vpop.f32.mrb[32].mxu1 }
 0x5a5   : > { %7489 = vpow2.f32 %v6236_v15  ;;  %v3871_v21 = vadd.f32 %v3822_v41, %v3759_v16  ;;  %v9158_v55 = vadd.f32 %v9123_v29, %v3601_v19  ;;  %v3603_v23 = vpop.f32.mrb[33].mxu1  ;;  %v6246_v27 = vadd.f32 -0.5, %v7480_v30 }
 0x5a6   : > { %7491 = vrcp.f32 %v3931_v17 }
 0x5a7   : > { %v7482_v28 = vpop.eup %7481  ;;  %v6237_v11 = vmul.f32 -1.442695, %v3871_v21  ;;  %v3760_v1 = vmul.f32 %v9158_v55, %v3715_v48  ;;  %v3992_v62 = vmul.f32 %v6246_v27, %v6246_v27  ;;  %v3842_v48 = vpop.permute.xlu0 %3841 }
 0x5a8   : > { %v7484_v13 = vpop.eup %7483  ;;  %v3932_v33 = vadd.f32 1.0, %v7482_v28  ;;  %v3606_v35 = vpop.f32.mrb[34].mxu1 }
 0x5a9   : > { %v6247_v8 = vadd.f32 -0.5, %v7484_v13  ;;  %7493 = vpow2.f32 %v6237_v11  ;;  %v3872_v24 = vadd.f32 %v3827_v25, %v3760_v1  ;;  %v9162_v38 = vadd.f32 %v9123_v29, %v3606_v35  ;;  %v3608_v40 = vpop.f32.mrb[35].mxu1  ;;  %6750 = vmatprep.mubr.msk.f32.mxu0 %vm4014_vm13, %v3992_v62  ;;  %v3735_v46 = vpop.permute.xlu1 %3734 }
 0x5aa   : > { %7495 = vrcp.f32 %v3932_v33 }
 0x5ab   : > { %v7486_v18 = vpop.eup %7485  ;;  %v3993_v41 = vmul.f32 %v6247_v8, %v6247_v8  ;;  %v6238_v3 = vmul.f32 -1.442695, %v3872_v24  ;;  %v3761_v52 = vmul.f32 %v9162_v38, %v3720_v39  ;;  %v3740_v37 = vpop.permute.xlu0 %3739 }
 0x5ac   : > { %v7488_v51 = vpop.eup %7487  ;;  %v3933_v42 = vadd.f32 1.0, %v7486_v18  ;;  %v3611_v45 = vpop.f32.mrb[36].mxu1 }
 0x5ad   : > { %7497 = vpow2.f32 %v6238_v3  ;;  %v3873_v20 = vadd.f32 %v3832_v34, %v3761_v52  ;;  %v9167_v32 = vadd.f32 %v9123_v29, %v3611_v45  ;;  %v3613_v53 = vpop.f32.mrb[37].mxu1  ;;  %6751 = vmatmul.mubr.msk.f32.vlgmr.msra.gmra.mrb[48].mxu0 %vm4014_vm13, %v3993_v41  ;;  %v6248_v54 = vadd.f32 -0.5, %v7488_v51 }
 0x5ae   : > { %7499 = vrcp.f32 %v3933_v42 }
 0x5af   : > { %v7490_v56 = vpop.eup %7489  ;;  %v6239_v47 = vmul.f32 -1.442695, %v3873_v20  ;;  %v3762_v0 = vmul.f32 %v9167_v32, %v3725_v10  ;;  %v3994_v39 = vmul.f32 %v6248_v54, %v6248_v54  ;;  %v3847_v10 = vpop.permute.xlu1 %3846 }
 0x5b0   : > { %v7492_v25 = vpop.eup %7491  ;;  %v3934_v7 = vadd.f32 1.0, %v7490_v56  ;;  %v3616_v63 = vpop.f32.mrb[38].mxu1 }
 0x5b1   : > { %7501 = vpow2.f32 %v6239_v47  ;;  %v3874_v50 = vadd.f32 %v3837_v2, %v3762_v0  ;;  %v9172_v9 = vadd.f32 %v9123_v29, %v3616_v63  ;;  %v3618_v58 = vpop.f32.mrb[39].mxu1  ;;  %6753 = vmatprep.mubr.msk.f32.mxu0 %vm4014_vm13, %v3994_v39  ;;  %v6249_v61 = vadd.f32 -0.5, %v7492_v25  ;;  %v3852_v11 = vpop.permute.xlu0 %3851 }
 0x5b2   : > { %7503 = vrcp.f32 %v3934_v7 }
 0x5b3   : > { %v7494_v34 = vpop.eup %7493  ;;  %v6240_v43 = vmul.f32 -1.442695, %v3874_v50  ;;  %v3763_v59 = vmul.f32 %v9172_v9, %v3730_v26  ;;  %v3995_v44 = vmul.f32 %v6249_v61, %v6249_v61  ;;  %v3745_v8 = vpop.permute.xlu1 %3744 }
 0x5b4   : > { %v7496_v5 = vpop.eup %7495  ;;  %v3935_v60 = vadd.f32 1.0, %v7494_v34  ;;  %v3621_v15 = vpop.f32.mrb[40].mxu1 }
 0x5b5   : > { %7505 = vpow2.f32 %v6240_v43  ;;  %v3875_v16 = vadd.f32 %v3842_v48, %v3763_v59  ;;  %v9177_v30 = vadd.f32 %v9123_v29, %v3621_v15  ;;  %v3623_v17 = vpop.f32.mrb[41].mxu1  ;;  %6754 = vmatmul.mubr.msk.f32.gmra.mrb[50].mxu0 %vm4014_vm13, %v3995_v44  ;;  %v6250_v19 = vadd.f32 -0.5, %v7496_v5  ;;  %v3750_v53 = vpop.permute.xlu0 %3749 }
 0x5b6   : > { %7507 = vrcp.f32 %v3935_v60 }
 0x5b7   : > { %v7498_v21 = vpop.eup %7497  ;;  %v6241_v23 = vmul.f32 -1.442695, %v3875_v16  ;;  %v3764_v27 = vmul.f32 %v9177_v30, %v3735_v46  ;;  %v3996_v26 = vmul.f32 %v6250_v19, %v6250_v19  ;;  %v3857_v39 = vpop.permute.xlu1 %3856 }
 0x5b8   : > { %v7500_v28 = vpop.eup %7499  ;;  %v3936_v1 = vadd.f32 1.0, %v7498_v21  ;;  %v3626_v62 = vpop.f32.mrb[42].mxu1 }
 0x5b9   : > { %7509 = vpow2.f32 %v6241_v23  ;;  %v3876_v13 = vadd.f32 %v3847_v10, %v3764_v27  ;;  %v9182_v2 = vadd.f32 %v9123_v29, %v3626_v62  ;;  %v3628_v33 = vpop.f32.mrb[43].mxu1  ;;  %6756 = vmatprep.mubr.msk.f32.mxu0 %vm4014_vm13, %v3996_v26  ;;  %v6251_v35 = vadd.f32 -0.5, %v7500_v28  ;;  %v3862_v5 = vpop.permute.xlu0 %3861 }
 0x5ba   : > { %7511 = vrcp.f32 %v3936_v1 }
 0x5bb   : > { %v7502_v24 = vpop.eup %7501  ;;  %v6242_v40 = vmul.f32 -1.442695, %v3876_v13  ;;  %v3765_v18 = vmul.f32 %v9182_v2, %v3740_v37  ;;  %v3997_v41 = vmul.f32 %v6251_v35, %v6251_v35 }
 0x5bc   : > { %v7504_v3 = vpop.eup %7503  ;;  %v3937_v52 = vadd.f32 1.0, %v7502_v24  ;;  %v3631_v51 = vpop.f32.mrb[44].mxu1 }
 0x5bd   : > { %7513 = vpow2.f32 %v6242_v40  ;;  %v3877_v48 = vadd.f32 %v3852_v11, %v3765_v18  ;;  %v9187_v42 = vadd.f32 %v9123_v29, %v3631_v51  ;;  %v3633_v45 = vpop.f32.mrb[45].mxu1  ;;  %6757 = vmatmul.mubr.msk.f32.gmra.mrb[52].mxu0 %vm4014_vm13, %v3997_v41  ;;  %v6252_v20 = vadd.f32 -0.5, %v7504_v3 }
 0x5be   : > { %7515 = vrcp.f32 %v3937_v52 }
 0x5bf   : > { %v7506_v54 = vpop.eup %7505  ;;  %v6243_v46 = vmul.f32 -1.442695, %v3877_v48  ;;  %v3766_v56 = vmul.f32 %v9187_v42, %v3745_v8  ;;  %v3998_v47 = vmul.f32 %v6252_v20, %v6252_v20 }
 0x5c0   : > { %v7508_v0 = vpop.eup %7507  ;;  %v3938_v25 = vadd.f32 1.0, %v7506_v54  ;;  %v3636_v7 = vpop.f32.mrb[46].mxu1 }
 0x5c1   : > { %7517 = vpow2.f32 %v6243_v46  ;;  %v3878_v63 = vadd.f32 %v3857_v39, %v3766_v56  ;;  %v9192_v50 = vadd.f32 %v9123_v29, %v3636_v7  ;;  %v3638_v58 = vpop.f32.mrb[47].mxu1  ;;  %6759 = vmatprep.mubr.msk.f32.mxu0 %vm4014_vm13, %v3998_v47  ;;  %v6253_v61 = vadd.f32 -0.5, %v7508_v0 }
 0x5c2   : > { %7519 = vrcp.f32 %v3938_v25 }
 0x5c3   : > { %v7510_v37 = vpop.eup %7509  ;;  %v6244_v34 = vmul.f32 -1.442695, %v3878_v63  ;;  %v3767_v43 = vmul.f32 %v9192_v50, %v3750_v53  ;;  %v3999_v59 = vmul.f32 %v6253_v61, %v6253_v61 }
 0x5c4   : > { %v7512_v44 = vpop.eup %7511  ;;  %v3939_v10 = vadd.f32 1.0, %v7510_v37 }
 0x5c5   : > { %7521 = vpow2.f32 %v6244_v34  ;;  %v3879_v60 = vadd.f32 %v3862_v5, %v3767_v43  ;;  %6760 = vmatmul.mubr.msk.f32.gmra.mrb[54].mxu0 %vm4014_vm13, %v3999_v59  ;;  %v6254_v15 = vadd.f32 -0.5, %v7512_v44 }
 0x5c6   : > { %7523 = vrcp.f32 %v3939_v10 }
 0x5c7   : > { %v7514_v29 = vpop.eup %7513  ;;  %v6245_v16 = vmul.f32 -1.442695, %v3879_v60  ;;  %v4000_v17 = vmul.f32 %v6254_v15, %v6254_v15 }
 0x5c8   : > { %v7516_v19 = vpop.eup %7515  ;;  %v3940_v21 = vadd.f32 1.0, %v7514_v29 }
 0x5c9   : > { %7525 = vpow2.f32 %v6245_v16  ;;  %6762 = vmatprep.mubr.msk.f32.mxu0 %vm4014_vm13, %v4000_v17  ;;  %v6255_v23 = vadd.f32 -0.5, %v7516_v19 }
 0x5ca   : > { %7527 = vrcp.f32 %v3940_v21 }
 0x5cb   : > { %v7518_v27 = vpop.eup %7517  ;;  %v4001_v26 = vmul.f32 %v6255_v23, %v6255_v23 }
 0x5cc   : > { %v7520_v28 = vpop.eup %7519  ;;  %v3941_v11 = vadd.f32 1.0, %v7518_v27 }
 0x5cd   : > { %6763 = vmatmul.mubr.msk.f32.gmra.mrb[56].mxu0 %vm4014_vm13, %v4001_v26  ;;  %v6256_v1 = vadd.f32 -0.5, %v7520_v28 }
 0x5ce   : > { %7529 = vrcp.f32 %v3941_v11 }
 0x5cf   : > { %v7522_v62 = vpop.eup %7521  ;;  %v4002_v13 = vmul.f32 %v6256_v1, %v6256_v1 }
 0x5d0   : > { %v7524_v33 = vpop.eup %7523  ;;  %v3942_v35 = vadd.f32 1.0, %v7522_v62 }
 0x5d1   : > { %6765 = vmatprep.mubr.msk.f32.mxu0 %vm4014_vm13, %v4002_v13  ;;  %v6257_v8 = vadd.f32 -0.5, %v7524_v33 }
 0x5d2   : > { %7531 = vrcp.f32 %v3942_v35 }
 0x5d3   : > { %v7526_v24 = vpop.eup %7525  ;;  %v4003_v40 = vmul.f32 %v6257_v8, %v6257_v8 }
 0x5d4   : > { %v7528_v18 = vpop.eup %7527  ;;  %v3943_v41 = vadd.f32 1.0, %v7526_v24 }
 0x5d5   : > { %6766 = vmatmul.mubr.msk.f32.gmra.mrb[58].mxu0 %vm4014_vm13, %v4003_v40  ;;  %v6258_v3 = vadd.f32 -0.5, %v7528_v18 }
 0x5d6   : > { %7533 = vrcp.f32 %v3943_v41 }
 0x5d7   : > { %v4004_v52 = vmul.f32 %v6258_v3, %v6258_v3 }
 0x5d8   : > { %v7530_v51 = vpop.eup %7529 }
 0x5d9   : > { %6768 = vmatprep.mubr.msk.f32.mxu0 %vm4014_vm13, %v4004_v52  ;;  %v6259_v48 = vadd.f32 -0.5, %v7530_v51 }
 0x5db   : > { %v4005_v45 = vmul.f32 %v6259_v48, %v6259_v48 }
 0x5dc   : > { %v7532_v20 = vpop.eup %7531 }
 0x5dd   : > { %6769 = vmatmul.mubr.msk.f32.gmra.mrb[60].mxu0 %vm4014_vm13, %v4005_v45  ;;  %v6260_v53 = vadd.f32 -0.5, %v7532_v20 }
 0x5df   : > { %v4006_v54 = vmul.f32 %v6260_v53, %v6260_v53 }
 0x5e0   : > { %v7534_v46 = vpop.eup %7533 }
 0x5e1   : > { %6771 = vmatprep.mubr.msk.f32.mxu0 %vm4014_vm13, %v4006_v54  ;;  %v6261_v56 = vadd.f32 -0.5, %v7534_v46 }
 0x5e3   : > { %v4007_v47 = vmul.f32 %v6261_v56, %v6261_v56 }
 0x5e5   : > { %6772 = vmatmul.mubr.msk.f32.gmra.mrb[62].mxu0 %vm4014_vm13, %v4007_v47 }
 0x680   : > { %v6752_v0 = vpop.f32.mrb[48].mxu0 }
 0x681   : > { %v4209_v39 = vmul.f32 0.25, %v6752_v0  ;;  %v4129_v25 = vpop.f32.mrb[49].mxu0 }
 0x682   : > { %v4208_v7 = vmul.f32 0.25, %v4129_v25 }
 0x683   : > { %7535 = vrsqrt.f32 %v4209_v39  ;;  %vm4233_vm14 = vcmp.eq.f32.partialorder %v4209_v39, inf  ;;  %v4236_v5 = vand.u32 2147483648, %v4209_v39  ;;  %vm4235_vm3 = vcmp.eq.f32.partialorder %v4209_v39, 0.0 }
 0x684   : > { %7537 = vrsqrt.f32 %v4208_v7  ;;  %vm4226_vm2 = vcmp.eq.f32.partialorder %v4208_v7, inf  ;;  %v4229_v60 = vand.u32 2147483648, %v4208_v7  ;;  %vm4228_vm4 = vcmp.eq.f32.partialorder %v4208_v7, 0.0 }
 0x688   : > { %v6755_v63 = vpop.f32.mrb[50].mxu0 }
 0x689   : > { %v4211_v58 = vmul.f32 0.25, %v6755_v63  ;;  %v4139_v61 = vpop.f32.mrb[51].mxu0 }
 0x68a   : > { %v4210_v37 = vmul.f32 0.25, %v4139_v61 }
 0x68b   : > { %7539 = vrsqrt.f32 %v4211_v58  ;;  %vm4247_vm5 = vcmp.eq.f32.partialorder %v4211_v58, inf  ;;  %v4250_v8 = vand.u32 2147483648, %v4211_v58  ;;  %vm4249_vm9 = vcmp.eq.f32.partialorder %v4211_v58, 0.0 }
 0x68c   : > { %7541 = vrsqrt.f32 %v4210_v37  ;;  %vm4240_vm8 = vcmp.eq.f32.partialorder %v4210_v37, inf  ;;  %v4243_v40 = vand.u32 2147483648, %v4210_v37  ;;  %vm4242_vm10 = vcmp.eq.f32.partialorder %v4210_v37, 0.0 }
 0x68d   : > { %v7536_v34 = vpop.eup %7535 }
 0x68e   : > { %v7538_v43 = vpop.eup %7537  ;;  %v4232_v59 = vmul.f32 %v7536_v34, %v4209_v39 }
 0x68f   : > { %v4225_v44 = vmul.f32 %v7538_v43, %v4208_v7 }
 0x690   : > { %v6758_v10 = vpop.f32.mrb[52].mxu0  ;;  %v4234_v15 = vsel %vm4233_vm14, %v4209_v39, %v4232_v59 }
 0x691   : > { %v9212_v29 = vmul.f32 0.25, %v6758_v10  ;;  %v4149_v16 = vpop.f32.mrb[53].mxu0  ;;  %v4227_v17 = vsel %vm4226_vm2, %v4208_v7, %v4225_v44  ;;  %v4237_v19 = vsel %vm4235_vm3, %v4236_v5, %v4234_v15 }
 0x692   : > { %v4212_v21 = vmul.f32 0.25, %v4149_v16  ;;  %v4230_v23 = vsel %vm4228_vm4, %v4229_v60, %v4227_v17  ;;  %4338 = vst.msk [vmem:[%s9210_s5 + $0x8] sm:$0xff] %vm4336_vm15, %v4237_v19  ;;  %v4370_v27 = vsub.f32 1.0, %v4237_v19 }
 0x693   : > { %7543 = vrsqrt.f32 %v9212_v29  ;;  %v4369_v26 = vsub.f32 1.0, %v4230_v23  ;;  %4337 = vst.msk [vmem:[%s9210_s5] sm:$0xff] %vm4336_vm15, %v4230_v23  ;;  %vm4261_vm11 = vcmp.eq.f32.partialorder %v9212_v29, inf  ;;  %v4264_v7 = vand.u32 2147483648, %v9212_v29 }
 0x694   : > { %7545 = vrsqrt.f32 %v4212_v21  ;;  %v4386_v28 = vmax.f32 %v4370_v27, 0.0  ;;  %vm4254_vm12 = vcmp.eq.f32.partialorder %v4212_v21, inf  ;;  %vm4263_vm14 = vcmp.eq.f32.partialorder %v9212_v29, 0.0 }
 0x695   : > { %v7540_v11 = vpop.eup %7539  ;;  %v4385_v1 = vmax.f32 %v4369_v26, 0.0  ;;  %vm4256_vm2 = vcmp.eq.f32.partialorder %v4212_v21, 0.0 }
 0x696   : > { %v7542_v62 = vpop.eup %7541  ;;  %v4246_v13 = vmul.f32 %v7540_v11, %v4211_v58 }
 0x697   : > { %v7431_v33 = vpack.i.bf16 %v4386_v28, %v4385_v1  ;;  %v4239_v35 = vmul.f32 %v7542_v62, %v4210_v37 }
 0x698   : > { %v6761_v24 = vpop.f32.mrb[54].mxu0  ;;  %v4248_v18 = vsel %vm4247_vm5, %v4211_v58, %v4246_v13  ;;  %v4257_v58 = vand.u32 2147483648, %v4212_v21 }
 0x699   : > { %v9219_v41 = vmul.f32 0.25, %v6761_v24  ;;  %7432 = vrot.lane.b32.xlu1 %v7431_v33, %s7585_s24  ;;  %v4159_v3 = vpop.f32.mrb[55].mxu0  ;;  %v4241_v52 = vsel %vm4240_vm8, %v4210_v37, %v4239_v35  ;;  %v4251_v51 = vsel %vm4249_vm9, %v4250_v8, %v4248_v18 }
 0x69a   : > { %v4214_v48 = vmul.f32 0.25, %v4159_v3  ;;  %v4244_v45 = vsel %vm4242_vm10, %v4243_v40, %v4241_v52  ;;  %4340 = vst.msk [vmem:[%s9210_s5 + $0x18] sm:$0xff] %vm4336_vm15, %v4251_v51  ;;  %v4372_v20 = vsub.f32 1.0, %v4251_v51 }
 0x69b   : > { %7547 = vrsqrt.f32 %v9219_v41  ;;  %v4371_v53 = vsub.f32 1.0, %v4244_v45  ;;  %4339 = vst.msk [vmem:[%s9210_s5 + $0x10] sm:$0xff] %vm4336_vm15, %v4244_v45  ;;  %vm4275_vm3 = vcmp.eq.f32.partialorder %v9219_v41, inf  ;;  %v4278_v27 = vand.u32 2147483648, %v9219_v41 }
 0x69c   : > { %7549 = vrsqrt.f32 %v4214_v48  ;;  %v4388_v54 = vmax.f32 %v4372_v20, 0.0  ;;  %vm4268_vm4 = vcmp.eq.f32.partialorder %v4214_v48, inf  ;;  %v4271_v28 = vand.u32 2147483648, %v4214_v48 }
 0x69d   : > { %v7544_v46 = vpop.eup %7543  ;;  %v4387_v56 = vmax.f32 %v4371_v53, 0.0  ;;  %vm4277_vm5 = vcmp.eq.f32.partialorder %v9219_v41, 0.0  ;;  %vm4270_vm8 = vcmp.eq.f32.partialorder %v4214_v48, 0.0 }
 0x69e   : > { %v7546_v47 = vpop.eup %7545  ;;  %v4260_v0 = vmul.f32 %v7544_v46, %v9212_v29 }
 0x69f   : > { %v7436_v39 = vpack.i.bf16 %v4388_v54, %v4387_v56  ;;  %v4253_v25 = vmul.f32 %v7546_v47, %v4212_v21 }
 0x6a0   : > { %v6764_v63 = vpop.f32.mrb[56].mxu0  ;;  %v4262_v61 = vsel %vm4261_vm11, %v9212_v29, %v4260_v0 }
 0x6a1   : > { %v9232_v37 = vmul.f32 0.25, %v6764_v63  ;;  %7437 = vrot.lane.b32.xlu0 %v7436_v39, %s7585_s24  ;;  %v4169_v34 = vpop.f32.mrb[57].mxu0  ;;  %v4255_v43 = vsel %vm4254_vm12, %v4212_v21, %v4253_v25  ;;  %v4265_v59 = vsel %vm4263_vm14, %v4264_v7, %v4262_v61 }
 0x6a2   : > { %v4216_v44 = vmul.f32 0.25, %v4169_v34  ;;  %v4258_v5 = vsel %vm4256_vm2, %v4257_v58, %v4255_v43  ;;  %4342 = vst.msk [vmem:[%s9210_s5 + $0x28] sm:$0xff] %vm4336_vm15, %v4265_v59  ;;  %v4374_v10 = vsub.f32 1.0, %v4265_v59 }
 0x6a3   : > { %7551 = vrsqrt.f32 %v9232_v37  ;;  %v4373_v60 = vsub.f32 1.0, %v4258_v5  ;;  %4341 = vst.msk [vmem:[%s9210_s5 + $0x20] sm:$0xff] %vm4336_vm15, %v4258_v5  ;;  %vm4289_vm9 = vcmp.eq.f32.partialorder %v9232_v37, inf  ;;  %v4292_v20 = vand.u32 2147483648, %v9232_v37 }
 0x6a4   : > { %7553 = vrsqrt.f32 %v4216_v44  ;;  %v4390_v15 = vmax.f32 %v4374_v10, 0.0  ;;  %vm4282_vm10 = vcmp.eq.f32.partialorder %v4216_v44, inf  ;;  %v4285_v54 = vand.u32 2147483648, %v4216_v44 }
 0x6a5   : > { %v7548_v29 = vpop.eup %7547  ;;  %v4389_v16 = vmax.f32 %v4373_v60, 0.0  ;;  %vm4291_vm11 = vcmp.eq.f32.partialorder %v9232_v37, 0.0  ;;  %vm4284_vm12 = vcmp.eq.f32.partialorder %v4216_v44, 0.0 }
 0x6a6   : > { %v7550_v17 = vpop.eup %7549  ;;  %v4274_v19 = vmul.f32 %v7548_v29, %v9219_v41 }
 0x6a7   : > { %v7441_v23 = vpack.i.bf16 %v4390_v15, %v4389_v16  ;;  %v4267_v21 = vmul.f32 %v7550_v17, %v4214_v48 }
 0x6a8   : > { %v6767_v26 = vpop.f32.mrb[58].mxu0  ;;  %v4276_v11 = vsel %vm4275_vm3, %v9219_v41, %v4274_v19 }
 0x6a9   : > { %v9245_v1 = vmul.f32 0.25, %v6767_v26  ;;  %7442 = vrot.lane.b32.xlu1 %v7441_v23, %s7585_s24  ;;  %v4179_v62 = vpop.f32.mrb[59].mxu0  ;;  %v4269_v13 = vsel %vm4268_vm4, %v4214_v48, %v4267_v21  ;;  %v4279_v33 = vsel %vm4277_vm5, %v4278_v27, %v4276_v11 }
 0x6aa   : > { %v4218_v35 = vmul.f32 0.25, %v4179_v62  ;;  %v4272_v8 = vsel %vm4270_vm8, %v4271_v28, %v4269_v13  ;;  %4344 = vst.msk [vmem:[%s9210_s5 + $0x38] sm:$0xff] %vm4336_vm15, %v4279_v33  ;;  %v4376_v24 = vsub.f32 1.0, %v4279_v33 }
 0x6ab   : > { %7555 = vrsqrt.f32 %v9245_v1  ;;  %v4375_v40 = vsub.f32 1.0, %v4272_v8  ;;  %4343 = vst.msk [vmem:[%s9210_s5 + $0x30] sm:$0xff] %vm4336_vm15, %v4272_v8  ;;  %vm4303_vm14 = vcmp.eq.f32.partialorder %v9245_v1, inf  ;;  %vm4305_vm3 = vcmp.eq.f32.partialorder %v9245_v1, 0.0 }
 0x6ac   : > { %7557 = vrsqrt.f32 %v4218_v35  ;;  %v4392_v18 = vmax.f32 %v4376_v24, 0.0  ;;  %vm4296_vm2 = vcmp.eq.f32.partialorder %v4218_v35, inf  ;;  %v4299_v15 = vand.u32 2147483648, %v4218_v35 }
 0x6ad   : > { %v7552_v41 = vpop.eup %7551  ;;  %v4391_v3 = vmax.f32 %v4375_v40, 0.0  ;;  %vm4298_vm4 = vcmp.eq.f32.partialorder %v4218_v35, 0.0 }
 0x6ae   : > { %v7554_v52 = vpop.eup %7553  ;;  %v4288_v51 = vmul.f32 %v7552_v41, %v9232_v37 }
 0x6af   : > { %v7446_v45 = vpack.i.bf16 %v4392_v18, %v4391_v3  ;;  %v4281_v48 = vmul.f32 %v7554_v52, %v4216_v44 }
 0x6b0   : > { %v6770_v53 = vpop.f32.mrb[60].mxu0  ;;  %v4290_v46 = vsel %vm4289_vm9, %v9232_v37, %v4288_v51 }
 0x6b1   : > { %v4221_v56 = vmul.f32 0.25, %v6770_v53  ;;  %7447 = vrot.lane.b32.xlu0 %v7446_v45, %s7585_s24  ;;  %v4189_v47 = vpop.f32.mrb[61].mxu0  ;;  %v4283_v0 = vsel %vm4282_vm10, %v4216_v44, %v4281_v48  ;;  %v4293_v39 = vsel %vm4291_vm11, %v4292_v20, %v4290_v46  ;;  %v4306_v44 = vand.u32 2147483648, %v9245_v1 }
 0x6b2   : > { %v4220_v25 = vmul.f32 0.25, %v4189_v47  ;;  %v4286_v7 = vsel %vm4284_vm12, %v4285_v54, %v4283_v0  ;;  %4346 = vst.msk [vmem:[%s9210_s5 + $0x48] sm:$0xff] %vm4336_vm15, %v4293_v39  ;;  %v4378_v63 = vsub.f32 1.0, %v4293_v39 }
 0x6b3   : > { %7559 = vrsqrt.f32 %v4221_v56  ;;  %v4377_v58 = vsub.f32 1.0, %v4286_v7  ;;  %4345 = vst.msk [vmem:[%s9210_s5 + $0x40] sm:$0xff] %vm4336_vm15, %v4286_v7  ;;  %vm4317_vm5 = vcmp.eq.f32.partialorder %v4221_v56, inf  ;;  %v4320_v24 = vand.u32 2147483648, %v4221_v56 }
 0x6b4   : > { %7561 = vrsqrt.f32 %v4220_v25  ;;  %v4394_v61 = vmax.f32 %v4378_v63, 0.0  ;;  %vm4310_vm8 = vcmp.eq.f32.partialorder %v4220_v25, inf  ;;  %v4313_v40 = vand.u32 2147483648, %v4220_v25 }
 0x6b5   : > { %v7556_v34 = vpop.eup %7555  ;;  %v4393_v37 = vmax.f32 %v4377_v58, 0.0  ;;  %vm4319_vm9 = vcmp.eq.f32.partialorder %v4221_v56, 0.0  ;;  %vm4312_vm10 = vcmp.eq.f32.partialorder %v4220_v25, 0.0 }
 0x6b6   : > { %v7558_v43 = vpop.eup %7557  ;;  %v4302_v59 = vmul.f32 %v7556_v34, %v9245_v1 }
 0x6b7   : > { %v7451_v5 = vpack.i.bf16 %v4394_v61, %v4393_v37  ;;  %v4295_v10 = vmul.f32 %v7558_v43, %v4218_v35 }
 0x6b8   : > { %v6773_v60 = vpop.f32.mrb[62].mxu0  ;;  %v4304_v29 = vsel %vm4303_vm14, %v9245_v1, %v4302_v59 }
 0x6b9   : > { %v4223_v16 = vmul.f32 0.25, %v6773_v60  ;;  %7452 = vrot.lane.b32.xlu1 %v7451_v5, %s7585_s24  ;;  %v4199_v17 = vpop.f32.mrb[63].mxu0  ;;  %v4297_v19 = vsel %vm4296_vm2, %v4218_v35, %v4295_v10  ;;  %v4307_v23 = vsel %vm4305_vm3, %v4306_v44, %v4304_v29  ;;  %v9284_v5 = vld [vmem:[#allocation2 + $0x30] sm:$0xff]  ;;  %vm7586_vm3 = vmmov 0  }
 0x6ba   : > { %v4222_v21 = vmul.f32 0.25, %v4199_v17  ;;  %v4300_v27 = vsel %vm4298_vm4, %v4299_v15, %v4297_v19  ;;  %4348 = vst.msk [vmem:[%s9210_s5 + $0x58] sm:$0xff] %vm4336_vm15, %v4307_v23  ;;  %v4380_v26 = vsub.f32 1.0, %v4307_v23  ;;  %6806 = vmatprep.mubr.msk.f32.mxu0 %vm7586_vm3, %v9284_v5  ;;  %6953 = vmatprep.mubr.msk.f32.mxu1 %vm7586_vm3, %v9284_v5  ;;  %v4353_v44 = vmax.f32 %v9126_v12, 0.0 }
 0x6bb   : > { %7563 = vrsqrt.f32 %v4223_v16  ;;  %v4379_v28 = vsub.f32 1.0, %v4300_v27  ;;  %4347 = vst.msk [vmem:[%s9210_s5 + $0x50] sm:$0xff] %vm4336_vm15, %v4300_v27  ;;  %vm4331_vm11 = vcmp.eq.f32.partialorder %v4223_v16, inf  ;;  %v4334_v0 = vand.u32 2147483648, %v4223_v16 }
 0x6bc   : > { %7565 = vrsqrt.f32 %v4222_v21  ;;  %v4396_v11 = vmax.f32 %v4380_v26, 0.0  ;;  %vm4324_vm12 = vcmp.eq.f32.partialorder %v4222_v21, inf  ;;  %v4327_v39 = vand.u32 2147483648, %v4222_v21 }
 0x6bd   : > { %v7560_v62 = vpop.eup %7559  ;;  %v4395_v1 = vmax.f32 %v4379_v28, 0.0  ;;  %vm4333_vm14 = vcmp.eq.f32.partialorder %v4223_v16, 0.0  ;;  %vm4326_vm2 = vcmp.eq.f32.partialorder %v4222_v21, 0.0  ;;  %v4354_v60 = vmax.f32 %v9130_v22, 0.0 }
 0x6be   : > { %v7562_v13 = vpop.eup %7561  ;;  %v4316_v33 = vmul.f32 %v7560_v62, %v4221_v56  ;;  %v4355_v28 = vmax.f32 %v9134_v31, 0.0  ;;  %v4358_v31 = vmax.f32 %v9146_v49, 0.0  ;;  %vm4660_vm4 = vcmask 1031168  }
 0x6bf   : > { %v7456_v8 = vpack.i.bf16 %v4396_v11, %v4395_v1  ;;  %v4309_v35 = vmul.f32 %v7562_v13, %v4220_v25  ;;  %v4356_v11 = vmax.f32 %v9138_v36, 0.0 }
 0x6c0   : > { %v4318_v18 = vsel %vm4317_vm5, %v4221_v56, %v4316_v33  ;;  %vm4912_vm5 = vcmask 416768  }
 0x6c1   : > { %7457 = vrot.lane.b32.xlu0 %v7456_v8, %s7585_s24  ;;  %v4311_v41 = vsel %vm4310_vm8, %v4220_v25, %v4309_v35  ;;  %v4321_v3 = vsel %vm4319_vm9, %v4320_v24, %v4318_v18  ;;  %v4357_v18 = vmax.f32 %v9142_v14, 0.0 }
 0x6c2   : > { %v4314_v52 = vsel %vm4312_vm10, %v4313_v40, %v4311_v41  ;;  %4350 = vst.msk [vmem:[%s9210_s5 + $0x68] sm:$0xff] %vm4336_vm15, %v4321_v3  ;;  %v4382_v51 = vsub.f32 1.0, %v4321_v3 }
 0x6c3   : > { %v4381_v45 = vsub.f32 1.0, %v4314_v52  ;;  %4349 = vst.msk [vmem:[%s9210_s5 + $0x60] sm:$0xff] %vm4336_vm15, %v4314_v52 }
 0x6c4   : > { %v4398_v48 = vmax.f32 %v4382_v51, 0.0 }
 0x6c5   : > { %v7564_v20 = vpop.eup %7563  ;;  %v4397_v53 = vmax.f32 %v4381_v45, 0.0 }
 0x6c6   : > { %v7566_v54 = vpop.eup %7565  ;;  %v4330_v46 = vmul.f32 %v7564_v20, %v4223_v16 }
 0x6c7   : > { %v7461_v47 = vpack.i.bf16 %v4398_v48, %v4397_v53  ;;  %v4323_v56 = vmul.f32 %v7566_v54, %v4222_v21 }
 0x6c8   : > { %v4332_v25 = vsel %vm4331_vm11, %v4223_v16, %v4330_v46 }
 0x6c9   : > { %7462 = vrot.lane.b32.xlu1 %v7461_v47, %s7585_s24  ;;  %v4325_v7 = vsel %vm4324_vm12, %v4222_v21, %v4323_v56  ;;  %v4335_v63 = vsel %vm4333_vm14, %v4334_v0, %v4332_v25 }
 0x6ca   : > { %v4328_v58 = vsel %vm4326_vm2, %v4327_v39, %v4325_v7  ;;  %4352 = vst.msk [vmem:[%s9210_s5 + $0x78] sm:$0xff] %vm4336_vm15, %v4335_v63  ;;  %v4384_v61 = vsub.f32 1.0, %v4335_v63  ;;  %v4359_v63 = vmax.f32 %v9150_v6, 0.0 }
 0x6cb   : > { %v4383_v34 = vsub.f32 1.0, %v4328_v58  ;;  %4351 = vst.msk [vmem:[%s9210_s5 + $0x70] sm:$0xff] %vm4336_vm15, %v4328_v58  ;;  %v4360_v58 = vmax.f32 %v9154_v4, 0.0 }
 0x6cc   : > { %v4400_v37 = vmax.f32 %v4384_v61, 0.0 }
 0x6cd   : > { %v4399_v43 = vmax.f32 %v4383_v34, 0.0 }
 0x6cf   : > { %v7466_v59 = vpack.i.bf16 %v4400_v37, %v4399_v43 }
 0x6d1   : > { %7467 = vrot.lane.b32.xlu0 %v7466_v59, %s7585_s24 }
 0x70b   : > { %v7433_v10 = vpop.permute.xlu1 %7432 }
 0x70c   : > { %v7435_v15 = vunpack.i.h.bf16 %v7433_v10  ;;  %v7434_v29 = vunpack.i.l.bf16 %v7433_v10 }
 0x70e   : > { %v4466_v16 = vsel %vm4014_vm13, %v4354_v60, %v7435_v15  ;;  %v4465_v17 = vsel %vm4014_vm13, %v4353_v44, %v7434_v29 }
 0x70f   : > { %v4519_v19 = vrot.slane %v4466_v16, 1  ;;  %v4518_v23 = vrot.slane %v4465_v17, 1 }
 0x711   : > { %v4520_v21 = vsel %vm1742_vm6, %v4518_v23, %v4519_v19 }
 0x712   : > { %v4565_v27 = vmax.f32 %v4465_v17, %v4520_v21 }
 0x713   : > { %v7438_v26 = vpop.permute.xlu0 %7437 }
 0x714   : > { %v7440_v62 = vunpack.i.h.bf16 %v7438_v26  ;;  %v7439_v12 = vunpack.i.l.bf16 %v7438_v26  ;;  %v4597_v41 = vrot.slane %v4565_v27, 1  ;;  %v4361_v26 = vmax.f32 %v9158_v55, 0.0 }
 0x716   : > { %v4468_v22 = vsel %vm4014_vm13, %v4356_v11, %v7440_v62  ;;  %v4467_v1 = vsel %vm4014_vm13, %v4355_v28, %v7439_v12  ;;  %v4362_v28 = vmax.f32 %v9162_v38, 0.0 }
 0x717   : > { %v4523_v13 = vrot.slane %v4468_v22, 1  ;;  %v4521_v33 = vrot.slane %v4467_v1, 1 }
 0x719   : > { %v4522_v8 = vsel %vm1742_vm6, %v4519_v19, %v4521_v33  ;;  %v4524_v35 = vsel %vm1742_vm6, %v4521_v33, %v4523_v13 }
 0x71a   : > { %v4566_v24 = vmax.f32 %v4466_v16, %v4522_v8  ;;  %v4567_v40 = vmax.f32 %v4467_v1, %v4524_v35 }
 0x71b   : > { %v7443_v36 = vpop.permute.xlu1 %7442 }
 0x71c   : > { %v4598_v3 = vrot.slane %v4566_v24, 1  ;;  %v4600_v52 = vrot.slane %v4567_v40, 1  ;;  %v7445_v51 = vunpack.i.h.bf16 %v7443_v36  ;;  %v7444_v45 = vunpack.i.l.bf16 %v7443_v36 }
 0x71e   : > { %v4470_v48 = vsel %vm4014_vm13, %v4358_v31, %v7445_v51  ;;  %v4469_v20 = vsel %vm4014_vm13, %v4357_v18, %v7444_v45  ;;  %v4599_v53 = vsel %vm1742_vm6, %v4597_v41, %v4598_v3  ;;  %v4601_v54 = vsel %vm1742_vm6, %v4598_v3, %v4600_v52 }
 0x71f   : > { %v4527_v46 = vrot.slane %v4470_v48, 1  ;;  %v4525_v47 = vrot.slane %v4469_v20, 1  ;;  %v4644_v56 = vmax.f32 %v4465_v17, %v4599_v53  ;;  %v4645_v14 = vmax.f32 %v4466_v16, %v4601_v54 }
 0x720   : > { %v4364_v51 = vmax.f32 %v9172_v9, 0.0 }
 0x721   : > { %v4526_v49 = vsel %vm1742_vm6, %v4523_v13, %v4525_v47  ;;  %v4528_v0 = vsel %vm1742_vm6, %v4525_v47, %v4527_v46  ;;  %v7248_v39 = vpack.c.bf16 %v4645_v14, %v4644_v56 }
 0x722   : > { %v4568_v25 = vmax.f32 %v4468_v22, %v4526_v49  ;;  %v4569_v7 = vmax.f32 %v4469_v20, %v4528_v0 }
 0x723   : > { %v7448_v61 = vpop.permute.xlu0 %7447  ;;  %7249 = vmatpush3.bf16.msra.mxu0 %v7248_v39 }
 0x724   : > { %v4602_v34 = vrot.slane %v4568_v25, 1  ;;  %v4604_v37 = vrot.slane %v4569_v7, 1  ;;  %v7450_v43 = vunpack.i.h.bf16 %v7448_v61  ;;  %v7449_v59 = vunpack.i.l.bf16 %v7448_v61  ;;  %7250 = vmatprep.subr.bf16.mxu0 %v7583_v57 }
 0x725   : > { %v4365_v61 = vmax.f32 %v9177_v30, 0.0 }
 0x726   : > { %v4472_v10 = vsel %vm4014_vm13, %v4360_v58, %v7450_v43  ;;  %v4471_v44 = vsel %vm4014_vm13, %v4359_v63, %v7449_v59  ;;  %v4603_v60 = vsel %vm1742_vm6, %v4600_v52, %v4602_v34  ;;  %v4605_v15 = vsel %vm1742_vm6, %v4602_v34, %v4604_v37 }
 0x727   : > { %v4531_v29 = vrot.slane %v4472_v10, 1  ;;  %v4529_v6 = vrot.slane %v4471_v44, 1  ;;  %v4646_v16 = vmax.f32 %v4467_v1, %v4603_v60  ;;  %v4647_v4 = vmax.f32 %v4468_v22, %v4605_v15 }
 0x728   : > { %v4363_v52 = vmax.f32 %v9167_v32, 0.0  ;;  %v4366_v34 = vmax.f32 %v9182_v2, 0.0 }
 0x729   : > { %v4530_v17 = vsel %vm1742_vm6, %v4527_v46, %v4529_v6  ;;  %v4532_v19 = vsel %vm1742_vm6, %v4529_v6, %v4531_v29  ;;  %v7251_v23 = vpack.c.bf16 %v4647_v4, %v4646_v16 }
 0x72a   : > { %v4570_v21 = vmax.f32 %v4470_v48, %v4530_v17  ;;  %v4571_v27 = vmax.f32 %v4471_v44, %v4532_v19 }
 0x72b   : > { %v7453_v11 = vpop.permute.xlu1 %7452  ;;  %7252 = vmatpush3.bf16.msra.mxu0 %v7251_v23 }
 0x72c   : > { %v4606_v62 = vrot.slane %v4570_v21, 1  ;;  %v4608_v12 = vrot.slane %v4571_v27, 1  ;;  %v7455_v13 = vunpack.i.h.bf16 %v7453_v11  ;;  %v7454_v33 = vunpack.i.l.bf16 %v7453_v11  ;;  %7253 = vmatprep.subr.bf16.mxu0 %v7583_v57 }
 0x72e   : > { %v4474_v22 = vsel %vm4014_vm13, %v4362_v28, %v7455_v13  ;;  %v4473_v1 = vsel %vm4014_vm13, %v4361_v26, %v7454_v33  ;;  %v4607_v8 = vsel %vm1742_vm6, %v4604_v37, %v4606_v62  ;;  %v4609_v35 = vsel %vm1742_vm6, %v4606_v62, %v4608_v12 }
 0x72f   : > { %v4535_v24 = vrot.slane %v4474_v22, 1  ;;  %v4533_v55 = vrot.slane %v4473_v1, 1  ;;  %v4648_v40 = vmax.f32 %v4469_v20, %v4607_v8  ;;  %v4649_v38 = vmax.f32 %v4470_v48, %v4609_v35 }
 0x730   : > { %v4367_v26 = vmax.f32 %v9187_v42, 0.0  ;;  %v4368_v28 = vmax.f32 %v9192_v50, 0.0 }
 0x731   : > { %v4534_v18 = vsel %vm1742_vm6, %v4531_v29, %v4533_v55  ;;  %v4536_v31 = vsel %vm1742_vm6, %v4533_v55, %v4535_v24  ;;  %v7254_v41 = vpack.c.bf16 %v4649_v38, %v4648_v40 }
 0x732   : > { %v4572_v36 = vmax.f32 %v4472_v10, %v4534_v18  ;;  %v4573_v3 = vmax.f32 %v4473_v1, %v4536_v31 }
 0x733   : > { %v7458_v45 = vpop.permute.xlu0 %7457  ;;  %7255 = vmatpush3.bf16.msra.mxu0 %v7254_v41 }
 0x734   : > { %v4610_v53 = vrot.slane %v4572_v36, 1  ;;  %v4612_v54 = vrot.slane %v4573_v3, 1  ;;  %v7460_v46 = vunpack.i.h.bf16 %v7458_v45  ;;  %v7459_v47 = vunpack.i.l.bf16 %v7458_v45  ;;  %7256 = vmatprep.subr.bf16.mxu0 %v7583_v57 }
 0x736   : > { %v4476_v48 = vsel %vm4014_vm13, %v4364_v51, %v7460_v46  ;;  %v4475_v20 = vsel %vm4014_vm13, %v4363_v52, %v7459_v47  ;;  %v4611_v56 = vsel %vm1742_vm6, %v4608_v12, %v4610_v53  ;;  %v4613_v14 = vsel %vm1742_vm6, %v4610_v53, %v4612_v54 }
 0x737   : > { %v4539_v49 = vrot.slane %v4476_v48, 1  ;;  %v4537_v32 = vrot.slane %v4475_v20, 1  ;;  %v4650_v0 = vmax.f32 %v4471_v44, %v4611_v56  ;;  %v4651_v9 = vmax.f32 %v4472_v10, %v4613_v14 }
 0x739   : > { %v4538_v39 = vsel %vm1742_vm6, %v4535_v24, %v4537_v32  ;;  %v4540_v25 = vsel %vm1742_vm6, %v4537_v32, %v4539_v49  ;;  %v7257_v7 = vpack.c.bf16 %v4651_v9, %v4650_v0  ;;  %v6301_v32 = vld [vmem:[%s9855_s13 + $0x40] sm:$0xff] }
 0x73a   : > { %v4574_v63 = vmax.f32 %v4474_v22, %v4538_v39  ;;  %v4575_v58 = vmax.f32 %v4475_v20, %v4540_v25  ;;  %v4481_v0 = vld [vmem:[%s9854_s12] sm:$0xff]  ;;  %v6302_v39 = vld [vmem:[%s9855_s13 + $0x48] sm:$0xff]  ;;  %v6303_v25 = vld [vmem:[%s9855_s13 + $0x50] sm:$0xff] }
 0x73b   : > { %v7463_v37 = vpop.permute.xlu1 %7462  ;;  %7258 = vmatpush3.bf16.msra.mxu0 %v7257_v7  ;;  %v4482_v7 = vld [vmem:[%s9854_s12 + $0x8] sm:$0xff] }
 0x73c   : > { %v4614_v43 = vrot.slane %v4574_v63, 1  ;;  %v4616_v59 = vrot.slane %v4575_v58, 1  ;;  %v7465_v60 = vunpack.i.h.bf16 %v7463_v37  ;;  %v7464_v15 = vunpack.i.l.bf16 %v7463_v37  ;;  %7259 = vmatprep.subr.bf16.mxu0 %v7583_v57  ;;  %v6304_v58 = vld [vmem:[%s9855_s13 + $0x58] sm:$0xff] }
 0x73d   : > { %v7276_v63 = vpack.c.bf16 %v6303_v25, %v6302_v39 }
 0x73e   : > { %v4478_v10 = vsel %vm4014_vm13, %v4366_v34, %v7465_v60  ;;  %v4477_v44 = vsel %vm4014_vm13, %v4365_v61, %v7464_v15  ;;  %v4615_v29 = vsel %vm1742_vm6, %v4612_v54, %v4614_v43  ;;  %v4617_v6 = vsel %vm1742_vm6, %v4614_v43, %v4616_v59  ;;  %v6305_v61 = vld [vmem:[%s9855_s13 + $0x60] sm:$0xff]  ;;  %v4483_v34 = vld [vmem:[%s9854_s12 + $0x10] sm:$0xff]  ;;  %v4484_v43 = vld [vmem:[%s9854_s12 + $0x18] sm:$0xff] }
 0x73f   : > { %v4543_v16 = vrot.slane %v4478_v10, 1  ;;  %v4541_v30 = vrot.slane %v4477_v44, 1  ;;  %v4652_v4 = vmax.f32 %v4473_v1, %v4615_v29  ;;  %v4653_v2 = vmax.f32 %v4474_v22, %v4617_v6  ;;  %v4486_v60 = vld [vmem:[%s9854_s12 + $0x28] sm:$0xff]  ;;  %v4487_v15 = vld [vmem:[%s9854_s12 + $0x30] sm:$0xff] }
 0x740   : > { %v7279_v37 = vpack.c.bf16 %v6305_v61, %v6304_v58  ;;  %v4490_v29 = vld [vmem:[%s9854_s12 + $0x48] sm:$0xff]  ;;  %v4491_v6 = vld [vmem:[%s9854_s12 + $0x50] sm:$0xff] }
 0x741   : > { %v4542_v17 = vsel %vm1742_vm6, %v4539_v49, %v4541_v30  ;;  %v4544_v19 = vsel %vm1742_vm6, %v4541_v30, %v4543_v16  ;;  %v7260_v23 = vpack.c.bf16 %v4653_v2, %v4652_v4  ;;  %v6300_v49 = vld [vmem:[%s9855_s13 + $0x38] sm:$0xff]  ;;  %v4493_v30 = vld [vmem:[%s9854_s12 + $0x60] sm:$0xff]  ;;  %v4494_v4 = vld [vmem:[%s9854_s12 + $0x68] sm:$0xff] }
 0x742   : > { %v4576_v21 = vmax.f32 %v4476_v48, %v4542_v17  ;;  %v4577_v27 = vmax.f32 %v4477_v44, %v4544_v19  ;;  %v7273_v9 = vpack.c.bf16 %v6301_v32, %v6300_v49  ;;  %v4495_v2 = vld [vmem:[%s9854_s12 + $0x70] sm:$0xff]  ;;  %v4496_v17 = vld [vmem:[%s9854_s12 + $0x78] sm:$0xff]  ;;  %v4497_v19 = vld [vmem:[%s9854_s12 + $0x80] sm:$0xff] }
 0x743   : > { %v7468_v11 = vpop.permute.xlu0 %7467  ;;  %7261 = vmatpush3.bf16.msra.mxu0 %v7260_v23  ;;  %v4498_v23 = vld [vmem:[%s9854_s12 + $0x88] sm:$0xff]  ;;  %v4901_v32 = vld [vmem:[%s9855_s13 + $0x20] sm:$0xff]  ;;  %v4903_v58 = vld [vmem:[%s9855_s13 + $0x30] sm:$0x7] }
 0x744   : > { %v4618_v62 = vrot.slane %v4576_v21, 1  ;;  %v4620_v12 = vrot.slane %v4577_v27, 1  ;;  %v7470_v13 = vunpack.i.h.bf16 %v7468_v11  ;;  %v7469_v33 = vunpack.i.l.bf16 %v7468_v11  ;;  %7262 = vmatprep.subr.bf16.mxu0 %v7583_v57  ;;  %v4499_v21 = vld [vmem:[%s9854_s12 + $0x90] sm:$0xff]  ;;  %v4500_v27 = vld [vmem:[%s9854_s12 + $0x98] sm:$0xff] }
 0x745   : > { %v6324_v11 = vld [vmem:[%s9855_s13 + $0x78] sm:$0xff] }
 0x746   : > { %v4480_v22 = vsel %vm4014_vm13, %v4368_v28, %v7470_v13  ;;  %v4479_v1 = vsel %vm4014_vm13, %v4367_v26, %v7469_v33  ;;  %v4619_v8 = vsel %vm1742_vm6, %v4616_v59, %v4618_v62  ;;  %v4621_v35 = vsel %vm1742_vm6, %v4618_v62, %v4620_v12  ;;  %v4485_v59 = vld [vmem:[%s9854_s12 + $0x20] sm:$0xff]  ;;  %v6323_v28 = vld [vmem:[%s9855_s13 + $0x70] sm:$0xff]  ;;  %v6326_v33 = vld [vmem:[%s9855_s13 + $0x88] sm:$0xff] }
 0x747   : > { %v4547_v24 = vrot.slane %v4480_v22, 1  ;;  %v4545_v42 = vrot.slane %v4479_v1, 1  ;;  %v4654_v55 = vmax.f32 %v4475_v20, %v4619_v8  ;;  %v4655_v50 = vmax.f32 %v4476_v48, %v4621_v35  ;;  %v4501_v26 = vld [vmem:[%s9854_s12 + $0xa0] sm:$0xff]  ;;  %v6328_v8 = vld [vmem:[%s9855_s13 + $0x98] sm:$0xff] }
 0x748   : > { %vm7587_vm13 = vmmov 1   ;;  %v7291_v62 = vpack.c.bf16 %v6324_v11, %v6323_v28  ;;  %v6325_v13 = vld [vmem:[%s9855_s13 + $0x80] sm:$0xff] }
 0x749   : > { %v4580_v40 = vmax.f32 %v4480_v22, %v4547_v24  ;;  %v4546_v38 = vsel %vm1742_vm6, %v4543_v16, %v4545_v42  ;;  %v4548_v18 = vsel %vm1742_vm6, %v4545_v42, %v4547_v24  ;;  %v7263_v31 = vpack.c.bf16 %v4655_v50, %v4654_v55  ;;  %vm7270_vm15 = vmpackc.low %vm1863_vm1, %vm7587_vm13  ;;  %v4492_v16 = vld [vmem:[%s9854_s12 + $0x58] sm:$0xff]  ;;  %v6329_v24 = vld [vmem:[%s9855_s13 + $0xa0] sm:$0x7] }
 0x74a   : > { %v4578_v41 = vmax.f32 %v4478_v10, %v4546_v38  ;;  %v4579_v36 = vmax.f32 %v4479_v1, %v4548_v18  ;;  %7292 = vmatpush3.bf16.msra.mxu1 %v7291_v62  ;;  %v6349_v11 = vld [vmem:[%s9858_s16 + $0x20] sm:$0xff]  ;;  %v6350_v62 = vld [vmem:[%s9858_s16 + $0x28] sm:$0xff] }
 0x74b   : > { %v4626_v3 = vrot.slane %v4580_v40, 1  ;;  %7264 = vmatpush3.bf16.msra.mxu0 %v7263_v31  ;;  %7293 = vmatprep.subr.bf16.mxu1 %v7583_v57 }
 0x74c   : > { %v4622_v52 = vrot.slane %v4578_v41, 1  ;;  %v4624_v51 = vrot.slane %v4579_v36, 1  ;;  %7265 = vmatprep.subr.bf16.mxu0 %v7583_v57 }
 0x74d   : > { %v4659_v46 = vmax.f32 %v4480_v22, %v4626_v3  ;;  %v7294_v22 = vpack.c.bf16 %v6326_v33, %v6325_v13 }
 0x74e   : > { %v4627_v45 = vsel %vm1742_vm6, %v4624_v51, %v4626_v3  ;;  %v4623_v53 = vsel %vm1742_vm6, %v4620_v12, %v4622_v52  ;;  %v4625_v54 = vsel %vm1742_vm6, %v4622_v52, %v4624_v51  ;;  %v6306_v12 = vld [vmem:[%s9855_s13 + $0x68] sm:$0x7] }
 0x74f   : > { %v4658_v47 = vmax.f32 %v4479_v1, %v4627_v45  ;;  %v4656_v48 = vmax.f32 %v4477_v44, %v4623_v53  ;;  %v4657_v20 = vmax.f32 %v4478_v10, %v4625_v54  ;;  %v4488_v10 = vld [vmem:[%s9854_s12 + $0x38] sm:$0xff]  ;;  %v4489_v44 = vld [vmem:[%s9854_s12 + $0x40] sm:$0xff]  ;;  %7295 = vmatpush3.bf16.msra.mxu1 %v7294_v22  ;;  %v6327_v1 = vld [vmem:[%s9855_s13 + $0x90] sm:$0xff] }
 0x750   : > { %7296 = vmatprep.subr.bf16.mxu1 %v7583_v57  ;;  %v7297_v35 = vpack.c.bf16 %v6328_v8, %v6327_v1  ;;  %v4897_v45 = vld [vmem:[%s9855_s13] sm:$0xff]  ;;  %v4898_v53 = vld [vmem:[%s9855_s13 + $0x8] sm:$0xff] }
 0x751   : > { %v7269_v56 = vpack.c.bf16 %v4659_v46, %v4658_v47  ;;  %v7266_v14 = vpack.c.bf16 %v4657_v20, %v4656_v48  ;;  %v7282_v47 = vpack.c.bf16 %v4898_v53, %v4897_v45  ;;  %v4899_v48 = vld [vmem:[%s9855_s13 + $0x10] sm:$0xff]  ;;  %v4900_v20 = vld [vmem:[%s9855_s13 + $0x18] sm:$0xff]  ;;  %v9658_v45 = vld [vmem:[%s9856_s14] ss:$0 sm:$0xff] }
 0x752   : > { %v7285_v49 = vpack.c.bf16 %v4900_v20, %v4899_v48 }
 0x753   : > { %7267 = vmatpush3.bf16.msra.mxu0 %v7266_v14  ;;  %7298 = vmatpush3.bf16.msra.mxu1 %v7297_v35 }
 0x754   : > { %7268 = vmatprep.subr.bf16.mxu0 %v7583_v57  ;;  %6951 = vmatprep.subr.mxu1 %v9284_v5 }
 0x757   : > { %7271 = vmatpush3.bf16.msk.msra.mxu0 %vm7270_vm15, %v7269_v56  ;;  %6952 = vmatpush3.msk.msra.mxu1 %vm1216_vm7, %v6329_v24 }
 0x758   : > { %7272 = vmatprep.subr.bf16.mxu0 %v7583_v57  ;;  %7308 = vmatprep.subr.bf16.mxu1 %v7583_v57 }
 0x75a   : > { %6807 = vmatmul.mubr.msk.f32.vlgmr.msra.gmra.mrb[64].mxu0 %vm4660_vm4, %v4481_v0  ;;  %v4902_v0 = vld [vmem:[%s9855_s13 + $0x28] sm:$0xff] }
 0x75b   : > { %6809 = vmatprep.mubr.msk.f32.mxu0 %vm7586_vm3, %v9284_v5  ;;  %7274 = vmatpush3.bf16.msra.mxu0 %v7273_v9  ;;  %v7288_v25 = vpack.c.bf16 %v4902_v0, %v4901_v32 }
 0x75c   : > { %7275 = vmatprep.subr.bf16.mxu0 %v7583_v57 }
 0x75e   : > { %6810 = vmatmul.mubr.msk.f32.gmra.mrb[66].mxu0 %vm4660_vm4, %v4482_v7 }
 0x75f   : > { %6812 = vmatprep.mubr.msk.f32.mxu0 %vm7586_vm3, %v9284_v5  ;;  %7277 = vmatpush3.bf16.msra.mxu0 %v7276_v63 }
 0x760   : > { %7278 = vmatprep.subr.bf16.mxu0 %v7583_v57 }
 0x762   : > { %6813 = vmatmul.mubr.msk.f32.gmra.mrb[68].mxu0 %vm4660_vm4, %v4483_v34 }
 0x763   : > { %6815 = vmatprep.mubr.msk.f32.mxu0 %vm7586_vm3, %v9284_v5  ;;  %7280 = vmatpush3.bf16.msra.mxu0 %v7279_v37 }
 0x764   : > { %6881 = vmatprep.subr.mxu0 %v9284_v5 }
 0x766   : > { %6816 = vmatmul.mubr.msk.f32.gmra.mrb[70].mxu0 %vm4660_vm4, %v4484_v43 }
 0x767   : > { %6818 = vmatprep.mubr.msk.f32.mxu0 %vm7586_vm3, %v9284_v5  ;;  %6882 = vmatpush3.msk.msra.mxu0 %vm1216_vm7, %v6306_v12  ;;  %v7309_v12 = vpack.c.bf16 %v6350_v62, %v6349_v11 }
 0x768   : > { %7281 = vmatprep.subr.bf16.mxu0 %v7583_v57 }
 0x76a   : > { %6819 = vmatmul.mubr.msk.f32.gmra.mrb[72].mxu0 %vm4660_vm4, %v4485_v59 }
 0x76b   : > { %6821 = vmatprep.mubr.msk.f32.mxu0 %vm7586_vm3, %v9284_v5 }
 0x76e   : > { %6822 = vmatmul.mubr.msk.f32.gmra.mrb[74].mxu0 %vm4660_vm4, %v4486_v60 }
 0x76f   : > { %6824 = vmatprep.mubr.msk.f32.mxu0 %vm7586_vm3, %v9284_v5 }
 0x772   : > { %6825 = vmatmul.mubr.msk.f32.gmra.mrb[76].mxu0 %vm4660_vm4, %v4487_v15 }
 0x773   : > { %6827 = vmatprep.mubr.msk.f32.mxu0 %vm7586_vm3, %v9284_v5 }
 0x776   : > { %6828 = vmatmul.mubr.msk.f32.gmra.mrb[78].mxu0 %vm4660_vm4, %v4488_v10 }
 0x777   : > { %6830 = vmatprep.mubr.msk.f32.mxu0 %vm7586_vm3, %v9284_v5 }
 0x77a   : > { %6831 = vmatmul.mubr.msk.f32.gmra.mrb[80].mxu0 %vm4660_vm4, %v4489_v44 }
 0x77b   : > { %6833 = vmatprep.mubr.msk.f32.mxu0 %vm7586_vm3, %v9284_v5 }
 0x77e   : > { %6834 = vmatmul.mubr.msk.f32.gmra.mrb[82].mxu0 %vm4660_vm4, %v4490_v29 }
 0x77f   : > { %6836 = vmatprep.mubr.msk.f32.mxu0 %vm7586_vm3, %v9284_v5 }
 0x782   : > { %6837 = vmatmul.mubr.msk.f32.gmra.mrb[84].mxu0 %vm4660_vm4, %v4491_v6 }
 0x783   : > { %6839 = vmatprep.mubr.msk.f32.mxu0 %vm7586_vm3, %v9284_v5 }
 0x786   : > { %6840 = vmatmul.mubr.msk.f32.gmra.mrb[86].mxu0 %vm4660_vm4, %v4492_v16 }
 0x787   : > { %6842 = vmatprep.mubr.msk.f32.mxu0 %vm7586_vm3, %v9284_v5 }
 0x78a   : > { %6843 = vmatmul.mubr.msk.f32.gmra.mrb[88].mxu0 %vm4660_vm4, %v4493_v30 }
 0x78b   : > { %6845 = vmatprep.mubr.msk.f32.mxu0 %vm7586_vm3, %v9284_v5 }
 0x78e   : > { %6846 = vmatmul.mubr.msk.f32.gmra.mrb[90].mxu0 %vm4660_vm4, %v4494_v4 }
 0x78f   : > { %6848 = vmatprep.mubr.msk.f32.mxu0 %vm7586_vm3, %v9284_v5 }
 0x792   : > { %6849 = vmatmul.mubr.msk.f32.gmra.mrb[92].mxu0 %vm4660_vm4, %v4495_v2 }
 0x793   : > { %6851 = vmatprep.mubr.msk.f32.mxu0 %vm7586_vm3, %v9284_v5 }
 0x796   : > { %6852 = vmatmul.mubr.msk.f32.gmra.mrb[94].mxu0 %vm4660_vm4, %v4496_v17 }
 0x797   : > { %6854 = vmatprep.mubr.msk.f32.mxu0 %vm7586_vm3, %v9284_v5 }
 0x79a   : > { %6855 = vmatmul.mubr.msk.f32.gmra.mrb[96].mxu0 %vm4660_vm4, %v4497_v19 }
 0x79b   : > { %6857 = vmatprep.mubr.msk.f32.mxu0 %vm7586_vm3, %v9284_v5 }
 0x79e   : > { %6858 = vmatmul.mubr.msk.f32.gmra.mrb[98].mxu0 %vm4660_vm4, %v4498_v23 }
 0x79f   : > { %6860 = vmatprep.mubr.msk.f32.mxu0 %vm7586_vm3, %v9284_v5 }
 0x7a2   : > { %6861 = vmatmul.mubr.msk.f32.gmra.mrb[100].mxu0 %vm4660_vm4, %v4499_v21 }
 0x7a3   : > { %6863 = vmatprep.mubr.msk.f32.mxu0 %vm7586_vm3, %v9284_v5 }
 0x7a6   : > { %6864 = vmatmul.mubr.msk.f32.gmra.mrb[102].mxu0 %vm4660_vm4, %v4500_v27 }
 0x7a7   : > { %6866 = vmatprep.mubr.msk.f32.mxu0 %vm7586_vm3, %v9284_v5 }
 0x7aa   : > { %6867 = vmatmul.mubr.msk.f32.gmra.mrb[104].mxu0 %vm4660_vm4, %v4501_v26 }
 0x7ab   : > { %6883 = vmatprep.mubr.msk.f32.mxu0 %vm7586_vm3, %v9284_v5 }
 0x82d   : > { %v4793_v42 = vpop.f32.mrb[64].mxu0 }
 0x82e   : > { %v6808_v55 = vpop.f32.mrb[65].mxu0 }
 0x831   : > { %v9539_v50 = vpop.f32.mrb[66].mxu0 }
 0x832   : > { %v6811_v40 = vpop.f32.mrb[67].mxu0 }
 0x835   : > { %v9541_v38 = vpop.f32.mrb[68].mxu0 }
 0x836   : > { %v6814_v18 = vpop.f32.mrb[69].mxu0 }
 0x839   : > { %v9543_v31 = vpop.f32.mrb[70].mxu0 }
 0x83a   : > { %v6817_v41 = vpop.f32.mrb[71].mxu0 }
 0x83d   : > { %v9545_v36 = vpop.f32.mrb[72].mxu0 }
 0x83e   : > { %v6820_v3 = vpop.f32.mrb[73].mxu0 }
 0x841   : > { %v9547_v52 = vpop.f32.mrb[74].mxu0 }
 0x842   : > { %v6823_v51 = vpop.f32.mrb[75].mxu0 }
 0x845   : > { %v9555_v54 = vpop.f32.mrb[76].mxu0 }
 0x846   : > { %v6826_v46 = vpop.f32.mrb[77].mxu0 }
 0x849   : > { %v4828_v56 = vpop.f32.mrb[78].mxu0 }
 0x84a   : > { %v6829_v14 = vpop.f32.mrb[79].mxu0  ;;  %6884 = vmatmul.mubr.msk.f32.vlgmr.msra.gmra.mrb[106].mxu0 %vm4912_vm5, %v4828_v56 }
 0x84b   : > { %6886 = vmatprep.mubr.msk.f32.mxu0 %vm7586_vm3, %v9284_v5  ;;  %7283 = vmatpush3.bf16.msra.mxu0 %v7282_v47 }
 0x84c   : > { %7284 = vmatprep.subr.bf16.mxu0 %v7583_v57 }
 0x84d   : > { %v4833_v9 = vpop.f32.mrb[80].mxu0 }
 0x84e   : > { %v6832_v39 = vpop.f32.mrb[81].mxu0  ;;  %6887 = vmatmul.mubr.msk.f32.gmra.mrb[108].mxu0 %vm4912_vm5, %v4833_v9 }
 0x84f   : > { %6889 = vmatprep.mubr.msk.f32.mxu0 %vm7586_vm3, %v9284_v5  ;;  %7286 = vmatpush3.bf16.msra.mxu0 %v7285_v49 }
 0x850   : > { %7287 = vmatprep.subr.bf16.mxu0 %v7583_v57 }
 0x851   : > { %v4838_v7 = vpop.f32.mrb[82].mxu0 }
 0x852   : > { %v6835_v63 = vpop.f32.mrb[83].mxu0  ;;  %6890 = vmatmul.mubr.msk.f32.gmra.mrb[110].mxu0 %vm4912_vm5, %v4838_v7 }
 0x853   : > { %6892 = vmatprep.mubr.msk.f32.mxu0 %vm7586_vm3, %v9284_v5  ;;  %7289 = vmatpush3.bf16.msra.mxu0 %v7288_v25 }
 0x854   : > { %6916 = vmatprep.subr.mxu0 %v9284_v5 }
 0x855   : > { %v4843_v61 = vpop.f32.mrb[84].mxu0 }
 0x856   : > { %v6838_v34 = vpop.f32.mrb[85].mxu0  ;;  %6893 = vmatmul.mubr.msk.f32.gmra.mrb[112].mxu0 %vm4912_vm5, %v4843_v61 }
 0x857   : > { %6895 = vmatprep.mubr.msk.f32.mxu0 %vm7586_vm3, %v9284_v5  ;;  %6917 = vmatpush3.msk.msra.mxu0 %vm1216_vm7, %v4903_v58  ;;  %vm5398_vm7 = vcmask 441344  }
 0x858   : > { %7299 = vmatprep.subr.bf16.mxu0 %v7583_v57 }
 0x859   : > { %v4848_v37 = vpop.f32.mrb[86].mxu0 }
 0x85a   : > { %v6841_v43 = vpop.f32.mrb[87].mxu0  ;;  %6896 = vmatmul.mubr.msk.f32.gmra.mrb[114].mxu0 %vm4912_vm5, %v4848_v37 }
 0x85b   : > { %6898 = vmatprep.mubr.msk.f32.mxu0 %vm7586_vm3, %v9284_v5 }
 0x85d   : > { %v4853_v59 = vpop.f32.mrb[88].mxu0 }
 0x85e   : > { %v6844_v60 = vpop.f32.mrb[89].mxu0  ;;  %6899 = vmatmul.mubr.msk.f32.gmra.mrb[116].mxu0 %vm4912_vm5, %v4853_v59 }
 0x85f   : > { %6901 = vmatprep.mubr.msk.f32.mxu0 %vm7586_vm3, %v9284_v5 }
 0x861   : > { %v4858_v15 = vpop.f32.mrb[90].mxu0 }
 0x862   : > { %v6847_v10 = vpop.f32.mrb[91].mxu0  ;;  %6902 = vmatmul.mubr.msk.f32.gmra.mrb[118].mxu0 %vm4912_vm5, %v4858_v15 }
 0x863   : > { %6918 = vmatprep.mubr.msk.f32.mxu0 %vm7586_vm3, %v9284_v5 }
 0x865   : > { %v4863_v44 = vpop.f32.mrb[92].mxu0 }
 0x866   : > { %6919 = vmatmul.mubr.msk.f32.vlgmr.msra.gmra.mrb[120].mxu0 %vm4912_vm5, %v4793_v42  ;;  %v6850_v29 = vpop.f32.mrb[93].mxu0  ;;  %6954 = vmatmul.mubr.msk.f32.vlgmr.msra.gmra.mrb[48].mxu1 %vm4912_vm5, %v4863_v44 }
 0x867   : > { %6921 = vmatprep.mubr.msk.f32.mxu0 %vm7586_vm3, %v9284_v5  ;;  %6956 = vmatprep.mubr.msk.f32.mxu1 %vm7586_vm3, %v9284_v5 }
 0x868   : > { %7310 = vmatpush3.bf16.msra.mxu1 %v7309_v12 }
 0x869   : > { %v4868_v6 = vpop.f32.mrb[94].mxu0  ;;  %7311 = vmatprep.subr.bf16.mxu1 %v7583_v57 }
 0x86a   : > { %6922 = vmatmul.mubr.msk.f32.gmra.mrb[122].mxu0 %vm4912_vm5, %v9539_v50  ;;  %v6853_v16 = vpop.f32.mrb[95].mxu0  ;;  %6957 = vmatmul.mubr.msk.f32.gmra.mrb[50].mxu1 %vm4912_vm5, %v4868_v6 }
 0x86b   : > { %6924 = vmatprep.mubr.msk.f32.mxu0 %vm7586_vm3, %v9284_v5  ;;  %6959 = vmatprep.mubr.msk.f32.mxu1 %vm7586_vm3, %v9284_v5 }
 0x86d   : > { %v4873_v30 = vpop.f32.mrb[96].mxu0 }
 0x86e   : > { %6925 = vmatmul.mubr.msk.f32.gmra.mrb[124].mxu0 %vm4912_vm5, %v9541_v38  ;;  %v6856_v4 = vpop.f32.mrb[97].mxu0  ;;  %6960 = vmatmul.mubr.msk.f32.gmra.mrb[52].mxu1 %vm4912_vm5, %v4873_v30 }
 0x86f   : > { %6927 = vmatprep.mubr.msk.f32.mxu0 %vm7586_vm3, %v9284_v5  ;;  %6962 = vmatprep.mubr.msk.f32.mxu1 %vm7586_vm3, %v9284_v5 }
 0x871   : > { %v4878_v2 = vpop.f32.mrb[98].mxu0 }
 0x872   : > { %6928 = vmatmul.mubr.msk.f32.gmra.mrb[126].mxu0 %vm4912_vm5, %v9543_v31  ;;  %v6859_v17 = vpop.f32.mrb[99].mxu0  ;;  %6963 = vmatmul.mubr.msk.f32.gmra.mrb[54].mxu1 %vm4912_vm5, %v4878_v2 }
 0x873   : > { %6930 = vmatprep.mubr.msk.f32.mxu0 %vm7586_vm3, %v9284_v5  ;;  %6965 = vmatprep.mubr.msk.f32.mxu1 %vm7586_vm3, %v9284_v5 }
 0x875   : > { %v4883_v19 = vpop.f32.mrb[100].mxu0 }
 0x876   : > { %6931 = vmatmul.mubr.msk.f32.gmra.mrb[128].mxu0 %vm4912_vm5, %v9545_v36  ;;  %v6862_v23 = vpop.f32.mrb[101].mxu0  ;;  %6966 = vmatmul.mubr.msk.f32.gmra.mrb[56].mxu1 %vm4912_vm5, %v4883_v19 }
 0x877   : > { %6933 = vmatprep.mubr.msk.f32.mxu0 %vm7586_vm3, %v9284_v5  ;;  %6968 = vmatprep.mubr.msk.f32.mxu1 %vm7586_vm3, %v9284_v5 }
 0x879   : > { %v4888_v21 = vpop.f32.mrb[102].mxu0 }
 0x87a   : > { %6934 = vmatmul.mubr.msk.f32.gmra.mrb[130].mxu0 %vm4912_vm5, %v9547_v52  ;;  %v6865_v27 = vpop.f32.mrb[103].mxu0  ;;  %6969 = vmatmul.mubr.msk.f32.gmra.mrb[58].mxu1 %vm4912_vm5, %v4888_v21 }
 0x87b   : > { %6936 = vmatprep.mubr.msk.f32.mxu0 %vm7586_vm3, %v9284_v5  ;;  %6971 = vmatprep.mubr.msk.f32.mxu1 %vm7586_vm3, %v9284_v5 }
 0x87d   : > { %v4893_v26 = vpop.f32.mrb[104].mxu0 }
 0x87e   : > { %6937 = vmatmul.mubr.msk.f32.gmra.mrb[132].mxu0 %vm4912_vm5, %v9555_v54  ;;  %6972 = vmatmul.mubr.msk.f32.gmra.mrb[60].mxu1 %vm4912_vm5, %v4893_v26  ;;  %v6868_v28 = vpop.f32.mrb[105].mxu0 }
 0x87f   : > { %6988 = vmatprep.mubr.msk.f32.mxu0 %vm7586_vm3, %v9284_v5  ;;  %7023 = vmatprep.mubr.msk.f32.mxu1 %vm7586_vm3, %v9284_v5 }
 0x91d   : > { %v5003_v13 = vpop.f32.mrb[106].mxu0 }
 0x91e   : > { %v6885_v33 = vpop.f32.mrb[107].mxu0 }
 0x921   : > { %v5008_v22 = vpop.f32.mrb[108].mxu0 }
 0x922   : > { %v6888_v1 = vpop.f32.mrb[109].mxu0 }
 0x925   : > { %v5013_v8 = vpop.f32.mrb[110].mxu0 }
 0x926   : > { %v6891_v35 = vpop.f32.mrb[111].mxu0 }
 0x929   : > { %v5018_v24 = vpop.f32.mrb[112].mxu0 }
 0x92a   : > { %v6894_v42 = vpop.f32.mrb[113].mxu0 }
 0x92d   : > { %v5023_v55 = vpop.f32.mrb[114].mxu0 }
 0x92e   : > { %v6897_v50 = vpop.f32.mrb[115].mxu0 }
 0x931   : > { %v5028_v40 = vpop.f32.mrb[116].mxu0 }
 0x932   : > { %v6900_v38 = vpop.f32.mrb[117].mxu0 }
 0x935   : > { %v9653_v18 = vpop.f32.mrb[118].mxu0 }
 0x936   : > { %v6903_v31 = vpop.f32.mrb[119].mxu0 }
 0x939   : > { %v5127_v41 = vpop.f32.mrb[120].mxu0  ;;  %v5259_v36 = vpop.f32.mrb[48].mxu1 }
 0x93a   : > { %v5128_v3 = vadd.f32 %v5127_v41, %v5003_v13  ;;  %v6920_v52 = vpop.f32.mrb[121].mxu0  ;;  %v6955_v51 = vpop.f32.mrb[49].mxu1 }
 0x93c   : > { %v5293_v53 = vadd.f32 %v5259_v36, %v5128_v3 }
 0x93d   : > { %v5132_v54 = vpop.f32.mrb[122].mxu0  ;;  %v5264_v46 = vpop.f32.mrb[50].mxu1 }
 0x93e   : > { %v5307_v47 = vadd.f32 %v9658_v45, %v5293_v53  ;;  %v5133_v48 = vadd.f32 %v5132_v54, %v5008_v22  ;;  %v6923_v20 = vpop.f32.mrb[123].mxu0  ;;  %v6958_v56 = vpop.f32.mrb[51].mxu1 }
 0x940   : > { %v5294_v14 = vadd.f32 %v5264_v46, %v5133_v48  ;;  %v9661_v0 = vmax.f32 %v5307_v47, 0.0 }
 0x941   : > { %v5137_v49 = vpop.f32.mrb[124].mxu0  ;;  %v5269_v32 = vpop.f32.mrb[52].mxu1 }
 0x942   : > { %v5308_v9 = vadd.f32 %v9658_v45, %v5294_v14  ;;  %v5138_v39 = vadd.f32 %v5137_v49, %v5013_v8  ;;  %v6926_v25 = vpop.f32.mrb[125].mxu0  ;;  %v6961_v7 = vpop.f32.mrb[53].mxu1  ;;  %v5337_v37 = vrot.slane %v9661_v0, 1 }
 0x944   : > { %v5315_v63 = vmax.f32 %v5308_v9, 0.0  ;;  %v5295_v58 = vadd.f32 %v5269_v32, %v5138_v39 }
 0x945   : > { %v5142_v61 = vpop.f32.mrb[126].mxu0  ;;  %v5274_v34 = vpop.f32.mrb[54].mxu1 }
 0x946   : > { %v5338_v43 = vrot.slane %v5315_v63, 1  ;;  %v5309_v59 = vadd.f32 %v9658_v45, %v5295_v58  ;;  %v5143_v60 = vadd.f32 %v5142_v61, %v5018_v24  ;;  %v6929_v15 = vpop.f32.mrb[127].mxu0  ;;  %v6964_v10 = vpop.f32.mrb[55].mxu1 }
 0x948   : > { %v5339_v44 = vsel %vm1742_vm6, %v5337_v37, %v5338_v43  ;;  %v9667_v29 = vmax.f32 %v5309_v59, 0.0  ;;  %v5296_v6 = vadd.f32 %v5274_v34, %v5143_v60 }
 0x949   : > { %v5357_v16 = vmax.f32 %v9661_v0, %v5339_v44  ;;  %v5147_v30 = vpop.f32.mrb[128].mxu0  ;;  %v5279_v4 = vpop.f32.mrb[56].mxu1 }
 0x94a   : > { %v5340_v2 = vrot.slane %v9667_v29, 1  ;;  %v5310_v17 = vadd.f32 %v9658_v45, %v5296_v6  ;;  %v5148_v19 = vadd.f32 %v5147_v30, %v5023_v55  ;;  %v6932_v23 = vpop.f32.mrb[129].mxu0  ;;  %v6967_v21 = vpop.f32.mrb[57].mxu1 }
 0x94b   : > { %v5371_v35 = vrot.slane %v5357_v16, 1  ;;  %v5321_v23 = vld [vmem:[%s9857_s15] sm:$0xff] }
 0x94c   : > { %v5341_v27 = vsel %vm1742_vm6, %v5338_v43, %v5340_v2  ;;  %v5317_v26 = vmax.f32 %v5310_v17, 0.0  ;;  %v5297_v28 = vadd.f32 %v5279_v4, %v5148_v19  ;;  %v6360_v17 = vld [vmem:[%s9858_s16 + $0x48] sm:$0xff] }
 0x94d   : > { %v5358_v11 = vmax.f32 %v5315_v63, %v5341_v27  ;;  %v5152_v62 = vpop.f32.mrb[130].mxu0  ;;  %v5284_v12 = vpop.f32.mrb[58].mxu1  ;;  %v9705_v27 = vld [vmem:[#allocation2 + $0x30] sm:$0xff] }
 0x94e   : > { %v5342_v13 = vrot.slane %v5317_v26, 1  ;;  %v5311_v33 = vadd.f32 %v9658_v45, %v5297_v28  ;;  %v5153_v22 = vadd.f32 %v5152_v62, %v5028_v40  ;;  %v6935_v1 = vpop.f32.mrb[131].mxu0  ;;  %v6970_v8 = vpop.f32.mrb[59].mxu1  ;;  %v5324_v28 = vld [vmem:[%s9857_s15 + $0x18] sm:$0xff]  ;;  %v5326_v62 = vld [vmem:[%s9857_s15 + $0x28] sm:$0xff] }
 0x94f   : > { %v5372_v24 = vrot.slane %v5358_v11, 1  ;;  %v5325_v11 = vld [vmem:[%s9857_s15 + $0x20] sm:$0xff]  ;;  %v6352_v1 = vld [vmem:[%s9858_s16 + $0x38] sm:$0xff] }
 0x950   : > { %v5343_v42 = vsel %vm1742_vm6, %v5340_v2, %v5342_v13  ;;  %v5318_v55 = vmax.f32 %v5311_v33, 0.0  ;;  %v5298_v50 = vadd.f32 %v5284_v12, %v5153_v22  ;;  %v6359_v2 = vld [vmem:[%s9858_s16 + $0x40] sm:$0xff]  ;;  %v5327_v12 = vld [vmem:[%s9857_s15 + $0x30] sm:$0xff] }
 0x951   : > { %v5359_v38 = vmax.f32 %v9667_v29, %v5343_v42  ;;  %v5157_v31 = vpop.f32.mrb[132].mxu0  ;;  %v5289_v41 = vpop.f32.mrb[60].mxu1  ;;  %v5373_v36 = vsel %vm1742_vm6, %v5371_v35, %v5372_v24  ;;  %v7321_v21 = vpack.c.bf16 %v6360_v17, %v6359_v2  ;;  %v5329_v33 = vld [vmem:[%s9857_s15 + $0x40] sm:$0xff]  ;;  %v6351_v22 = vld [vmem:[%s9858_s16 + $0x30] sm:$0xff] }
 0x952   : > { %v5344_v3 = vrot.slane %v5318_v55, 1  ;;  %v5312_v52 = vadd.f32 %v9658_v45, %v5298_v50  ;;  %v5158_v51 = vadd.f32 %v5157_v31, %v9653_v18  ;;  %v6938_v40 = vpop.f32.mrb[133].mxu0  ;;  %v6973_v53 = vpop.f32.mrb[61].mxu1  ;;  %v5391_v54 = vmax.f32 %v9661_v0, %v5373_v36  ;;  %v6361_v35 = vld [vmem:[%s9858_s16 + $0x50] sm:$0xff]  ;;  %v5540_v36 = vld [vmem:[%s9858_s16 + $0x8] sm:$0xff] }
 0x953   : > { %v5374_v46 = vrot.slane %v5359_v38, 1  ;;  %v7312_v8 = vpack.c.bf16 %v6352_v1, %v6351_v22  ;;  %v5541_v40 = vld [vmem:[%s9858_s16 + $0x10] sm:$0xff]  ;;  %v5542_v53 = vld [vmem:[%s9858_s16 + $0x18] sm:$0xff] }
 0x954   : > { %v5345_v47 = vsel %vm1742_vm6, %v5342_v13, %v5344_v3  ;;  %v5319_v48 = vmax.f32 %v5312_v52, 0.0  ;;  %v5299_v20 = vadd.f32 %v5289_v41, %v5158_v51  ;;  %v5328_v13 = vld [vmem:[%s9857_s15 + $0x38] sm:$0xff]  ;;  %v5539_v41 = vld [vmem:[%s9858_s16] sm:$0xff] }
 0x955   : > { %v5360_v56 = vmax.f32 %v5317_v26, %v5345_v47  ;;  %v5375_v14 = vsel %vm1742_vm6, %v5372_v24, %v5374_v46  ;;  %7313 = vmatpush3.bf16.msra.mxu1 %v7312_v8  ;;  %v6362_v24 = vld [vmem:[%s9858_s16 + $0x58] sm:$0xff]  ;;  %v7315_v51 = vpack.c.bf16 %v5540_v36, %v5539_v41  ;;  %v7318_v47 = vpack.c.bf16 %v5542_v53, %v5541_v40  ;;  %v5942_v40 = vld [vmem:[%s9861_s19] sm:$0xff]  ;;  %v5943_v53 = vld [vmem:[%s9861_s19 + $0x8] sm:$0xff] }
 0x956   : > { %v5346_v49 = vrot.slane %v5319_v48, 1  ;;  %v5313_v32 = vadd.f32 %v9658_v45, %v5299_v20  ;;  %v5392_v9 = vmax.f32 %v5315_v63, %v5375_v14  ;;  %7314 = vmatprep.subr.bf16.mxu1 %v7583_v57  ;;  %v7324_v42 = vpack.c.bf16 %v6362_v24, %v6361_v35 }
 0x957   : > { %v5376_v39 = vrot.slane %v5360_v56, 1 }
 0x958   : > { %v5347_v25 = vsel %vm1742_vm6, %v5344_v3, %v5346_v49  ;;  %v5320_v18 = vmax.f32 %v5313_v32, 0.0  ;;  %v7300_v7 = vpack.c.bf16 %v5392_v9, %v5391_v54 }
 0x959   : > { %v5361_v58 = vmax.f32 %v5318_v55, %v5347_v25  ;;  %v5377_v0 = vsel %vm1742_vm6, %v5374_v46, %v5376_v39 }
 0x95a   : > { %v5348_v61 = vrot.slane %v5320_v18, 1  ;;  %7301 = vmatpush3.bf16.msra.mxu0 %v7300_v7  ;;  %v5393_v34 = vmax.f32 %v9667_v29, %v5377_v0 }
 0x95b   : > { %v5378_v37 = vrot.slane %v5361_v58, 1  ;;  %7302 = vmatprep.subr.bf16.mxu0 %v7583_v57 }
 0x95c   : > { %v5349_v43 = vsel %vm1742_vm6, %v5346_v49, %v5348_v61  ;;  %v5363_v59 = vmax.f32 %v5320_v18, %v5348_v61 }
 0x95d   : > { %v5362_v45 = vmax.f32 %v5319_v48, %v5349_v43  ;;  %v5379_v63 = vsel %vm1742_vm6, %v5376_v39, %v5378_v37 }
 0x95e   : > { %v5382_v60 = vrot.slane %v5363_v59, 1  ;;  %v5394_v15 = vmax.f32 %v5317_v26, %v5379_v63  ;;  %v5323_v26 = vld [vmem:[%s9857_s15 + $0x10] sm:$0xff] }
 0x95f   : > { %v5380_v10 = vrot.slane %v5362_v45, 1 }
 0x960   : > { %v7303_v44 = vpack.c.bf16 %v5394_v15, %v5393_v34  ;;  %v5397_v19 = vmax.f32 %v5320_v18, %v5382_v60  ;;  %v6366_v15 = vld [vmem:[%s9859_s17] ss:$0 sm:$0xff] }
 0x961   : > { %v5381_v6 = vsel %vm1742_vm6, %v5378_v37, %v5380_v10  ;;  %v5383_v16 = vsel %vm1742_vm6, %v5380_v10, %v5382_v60 }
 0x962   : > { %7304 = vmatpush3.bf16.msra.mxu0 %v7303_v44  ;;  %v5395_v30 = vmax.f32 %v5318_v55, %v5381_v6  ;;  %v5396_v29 = vmax.f32 %v5319_v48, %v5383_v16 }
 0x963   : > { %7305 = vmatprep.subr.bf16.mxu0 %v7583_v57 }
 0x964   : > { %v7306_v4 = vpack.c.bf16 %v5396_v29, %v5395_v30 }
 0x966   : > { %7307 = vmatpush3.bf16.msra.mxu0 %v7306_v4 }
 0x967   : > { %6986 = vmatprep.subr.mxu0 %v9284_v5  ;;  %v5322_v5 = vld [vmem:[%s9857_s15 + $0x8] sm:$0xff] }
 0x96a   : > { %6987 = vmatpush3.msk.msra.mxu0 %vm1863_vm1, %v5397_v19 }
 0x96b   : > { %6989 = vmatmul.mubr.msk.f32.vlgmr.msra.gmra.mrb[134].mxu0 %vm5398_vm7, %v5321_v23  ;;  %7320 = vmatprep.subr.bf16.mxu0 %v7583_v57 }
 0x96c   : > { %6991 = vmatprep.mubr.msk.f32.mxu0 %vm7586_vm3, %v9705_v27  ;;  %7322 = vmatpush3.bf16.msra.mxu0 %v7321_v21 }
 0x96d   : > { %7323 = vmatprep.subr.bf16.mxu0 %v7583_v57 }
 0x96f   : > { %6992 = vmatmul.mubr.msk.f32.gmra.mrb[136].mxu0 %vm5398_vm7, %v5322_v5 }
 0x970   : > { %6994 = vmatprep.mubr.msk.f32.mxu0 %vm7586_vm3, %v9705_v27  ;;  %7325 = vmatpush3.bf16.msra.mxu0 %v7324_v42 }
 0x973   : > { %6995 = vmatmul.mubr.msk.f32.gmra.mrb[138].mxu0 %vm5398_vm7, %v5323_v26 }
 0x974   : > { %6997 = vmatprep.mubr.msk.f32.mxu0 %vm7586_vm3, %v9705_v27 }
 0x977   : > { %6998 = vmatmul.mubr.msk.f32.gmra.mrb[140].mxu0 %vm5398_vm7, %v5324_v28 }
 0x978   : > { %7000 = vmatprep.mubr.msk.f32.mxu0 %vm7586_vm3, %v9705_v27 }
 0x97b   : > { %7001 = vmatmul.mubr.msk.f32.gmra.mrb[142].mxu0 %vm5398_vm7, %v5325_v11 }
 0x97c   : > { %7003 = vmatprep.mubr.msk.f32.mxu0 %vm7586_vm3, %v9705_v27 }
 0x97f   : > { %7004 = vmatmul.mubr.msk.f32.gmra.mrb[144].mxu0 %vm5398_vm7, %v5326_v62 }
 0x980   : > { %7006 = vmatprep.mubr.msk.f32.mxu0 %vm7586_vm3, %v9705_v27 }
 0x983   : > { %7007 = vmatmul.mubr.msk.f32.gmra.mrb[146].mxu0 %vm5398_vm7, %v5327_v12 }
 0x984   : > { %7009 = vmatprep.mubr.msk.f32.mxu0 %vm7586_vm3, %v9705_v27 }
 0x987   : > { %7010 = vmatmul.mubr.msk.f32.gmra.mrb[148].mxu0 %vm5398_vm7, %v5328_v13 }
 0x988   : > { %7012 = vmatprep.mubr.msk.f32.mxu0 %vm7586_vm3, %v9705_v27 }
 0x98b   : > { %7013 = vmatmul.mubr.msk.f32.gmra.mrb[150].mxu0 %vm5398_vm7, %v5329_v33 }
 0x98c   : > { %7057 = vmatprep.mubr.msk.f32.mxu0 %vm7586_vm3, %v9705_v27 }
 0xa3e   : > { %v5495_v55 = vpop.f32.mrb[134].mxu0 }
 0xa3f   : > { %v6990_v50 = vpop.f32.mrb[135].mxu0 }
 0xa42   : > { %v5500_v38 = vpop.f32.mrb[136].mxu0 }
 0xa43   : > { %v6993_v31 = vpop.f32.mrb[137].mxu0 }
 0xa46   : > { %v5505_v3 = vpop.f32.mrb[138].mxu0 }
 0xa47   : > { %v6996_v52 = vpop.f32.mrb[139].mxu0 }
 0xa4a   : > { %v5510_v54 = vpop.f32.mrb[140].mxu0 }
 0xa4b   : > { %7024 = vmatmul.mubr.msk.f32.vlgmr.msra.gmra.mrb[62].mxu1 %vm725_vm0, %v5510_v54  ;;  %v6999_v46 = vpop.f32.mrb[141].mxu0 }
 0xa4c   : > { %7026 = vmatprep.mubr.msk.f32.mxu1 %vm7586_vm3, %v9705_v27  ;;  %7316 = vmatpush3.bf16.msra.mxu1 %v7315_v51  ;;  %v5836_v46 = vld [vmem:[%s9860_s18] sm:$0xff] }
 0xa4d   : > { %7317 = vmatprep.subr.bf16.mxu1 %v7583_v57 }
 0xa4e   : > { %v5515_v48 = vpop.f32.mrb[142].mxu0 }
 0xa4f   : > { %7027 = vmatmul.mubr.msk.f32.gmra.mrb[64].mxu1 %vm725_vm0, %v5515_v48  ;;  %v7002_v20 = vpop.f32.mrb[143].mxu0 }
 0xa50   : > { %7029 = vmatprep.mubr.msk.f32.mxu1 %vm7586_vm3, %v9705_v27  ;;  %7319 = vmatpush3.bf16.msra.mxu1 %v7318_v47  ;;  %v7330_v47 = vpack.c.bf16 %v5943_v53, %v5942_v40 }
 0xa51   : > { %7326 = vmatprep.subr.bf16.mxu1 %v7583_v57 }
 0xa52   : > { %v5520_v56 = vpop.f32.mrb[144].mxu0 }
 0xa53   : > { %7030 = vmatmul.mubr.msk.f32.gmra.mrb[66].mxu1 %vm725_vm0, %v5520_v56  ;;  %v7005_v14 = vpop.f32.mrb[145].mxu0  ;;  %v6369_v56 = vld [vmem:[%s9862_s20] ss:$0 sm:$0xff] }
 0xa54   : > { %7040 = vmatprep.mubr.msk.f32.mxu1 %vm7586_vm3, %v9705_v27 }
 0xa56   : > { %v5525_v49 = vpop.f32.mrb[146].mxu0 }
 0xa57   : > { %7041 = vmatmul.mubr.msk.f32.vlgmr.msra.gmra.mrb[68].mxu1 %vm725_vm0, %v5495_v55  ;;  %7058 = vmatmul.mubr.msk.f32.vlgmr.msra.gmra.mrb[152].mxu0 %vm725_vm0, %v5525_v49  ;;  %v7008_v32 = vpop.f32.mrb[147].mxu0 }
 0xa58   : > { %7043 = vmatprep.mubr.msk.f32.mxu1 %vm7586_vm3, %v9705_v27  ;;  %7060 = vmatprep.mubr.msk.f32.mxu0 %vm7586_vm3, %v9705_v27 }
 0xa5a   : > { %v5530_v9 = vpop.f32.mrb[148].mxu0 }
 0xa5b   : > { %7044 = vmatmul.mubr.msk.f32.gmra.mrb[70].mxu1 %vm725_vm0, %v5500_v38  ;;  %7061 = vmatmul.mubr.msk.f32.gmra.mrb[154].mxu0 %vm725_vm0, %v5530_v9  ;;  %v7011_v39 = vpop.f32.mrb[149].mxu0 }
 0xa5c   : > { %7046 = vmatprep.mubr.msk.f32.mxu1 %vm7586_vm3, %v9705_v27  ;;  %7063 = vmatprep.mubr.msk.f32.mxu0 %vm7586_vm3, %v9705_v27 }
 0xa5e   : > { %v5535_v25 = vpop.f32.mrb[150].mxu0 }
 0xa5f   : > { %7047 = vmatmul.mubr.msk.f32.gmra.mrb[72].mxu1 %vm725_vm0, %v5505_v3  ;;  %7064 = vmatmul.mubr.msk.f32.gmra.mrb[156].mxu0 %vm725_vm0, %v5535_v25  ;;  %v7014_v18 = vpop.f32.mrb[151].mxu0  ;;  %vm5865_vm0 = vcmask 179200  }
 0xa60   : > { %7072 = vmatprep.mubr.msk.f32.mxu1 %vm7586_vm3, %v9705_v27 }
 0xb1e   : > { %v5623_v7 = vpop.f32.mrb[62].mxu1 }
 0xb1f   : > { %v7025_v58 = vpop.f32.mrb[63].mxu1 }
 0xb22   : > { %v5628_v0 = vpop.f32.mrb[64].mxu1 }
 0xb23   : > { %v7028_v61 = vpop.f32.mrb[65].mxu1 }
 0xb26   : > { %v5633_v34 = vpop.f32.mrb[66].mxu1 }
 0xb27   : > { %v7031_v37 = vpop.f32.mrb[67].mxu1 }
 0xb2a   : > { %v5712_v43 = vpop.f32.mrb[68].mxu1  ;;  %v5806_v59 = vpop.f32.mrb[152].mxu0 }
 0xb2b   : > { %v5713_v45 = vadd.f32 %v5712_v43, %v5623_v7  ;;  %v7042_v63 = vpop.f32.mrb[69].mxu1  ;;  %v7059_v60 = vpop.f32.mrb[153].mxu0 }
 0xb2d   : > { %v5820_v10 = vadd.f32 %v5806_v59, %v5713_v45 }
 0xb2e   : > { %v5717_v44 = vpop.f32.mrb[70].mxu1  ;;  %v5811_v6 = vpop.f32.mrb[154].mxu0 }
 0xb2f   : > { %v5830_v16 = vadd.f32 %v6366_v15, %v5820_v10  ;;  %v5718_v30 = vadd.f32 %v5717_v44, %v5628_v0  ;;  %v7045_v29 = vpop.f32.mrb[71].mxu1  ;;  %v7062_v4 = vpop.f32.mrb[155].mxu0 }
 0xb31   : > { %v5821_v2 = vadd.f32 %v5811_v6, %v5718_v30  ;;  %v5833_v23 = vmax.f32 %v5830_v16, 0.0 }
 0xb32   : > { %v5722_v17 = vpop.f32.mrb[72].mxu1  ;;  %v5816_v19 = vpop.f32.mrb[156].mxu0 }
 0xb33   : > { %v5831_v21 = vadd.f32 %v6366_v15, %v5821_v2  ;;  %v5723_v5 = vadd.f32 %v5722_v17, %v5633_v34  ;;  %v7048_v26 = vpop.f32.mrb[73].mxu1  ;;  %v7065_v28 = vpop.f32.mrb[157].mxu0  ;;  %v5840_v12 = vrot.slane %v5833_v23, 1 }
 0xb35   : > { %v5834_v11 = vmax.f32 %v5831_v21, 0.0  ;;  %v5822_v62 = vadd.f32 %v5816_v19, %v5723_v5 }
 0xb37   : > { %v5841_v13 = vrot.slane %v5834_v11, 1  ;;  %v5832_v33 = vadd.f32 %v6366_v15, %v5822_v62 }
 0xb39   : > { %v5842_v22 = vsel %vm1742_vm6, %v5840_v12, %v5841_v13  ;;  %v5835_v1 = vmax.f32 %v5832_v33, 0.0 }
 0xb3a   : > { %v5848_v8 = vmax.f32 %v5833_v23, %v5842_v22 }
 0xb3b   : > { %v5843_v35 = vrot.slane %v5835_v1, 1 }
 0xb3c   : > { %v5854_v38 = vrot.slane %v5848_v8, 1 }
 0xb3d   : > { %v5844_v24 = vsel %vm1742_vm6, %v5841_v13, %v5843_v35  ;;  %v5850_v42 = vmax.f32 %v5835_v1, %v5843_v35 }
 0xb3e   : > { %v5849_v55 = vmax.f32 %v5834_v11, %v5844_v24 }
 0xb3f   : > { %v5857_v50 = vrot.slane %v5850_v42, 1 }
 0xb40   : > { %v5855_v31 = vrot.slane %v5849_v55, 1 }
 0xb41   : > { %v5864_v54 = vmax.f32 %v5835_v1, %v5857_v50 }
 0xb42   : > { %v5856_v41 = vsel %vm1742_vm6, %v5854_v38, %v5855_v31  ;;  %v5858_v36 = vsel %vm1742_vm6, %v5855_v31, %v5857_v50  ;;  %vm5951_vm6 = vcmask 130048  }
 0xb43   : > { %v5862_v3 = vmax.f32 %v5833_v23, %v5856_v41  ;;  %v5863_v52 = vmax.f32 %v5834_v11, %v5858_v36 }
 0xb45   : > { %v7327_v51 = vpack.c.bf16 %v5863_v52, %v5862_v3 }
 0xb47   : > { %7328 = vmatpush3.bf16.msra.mxu1 %v7327_v51 }
 0xb48   : > { %7070 = vmatprep.subr.mxu1 %v9705_v27 }
 0xb4b   : > { %7071 = vmatpush3.msk.msra.mxu1 %vm1863_vm1, %v5864_v54  ;;  %vm6025_vm1 = vcmask 203776  }
 0xb4c   : > { %7073 = vmatmul.mubr.msk.f32.vlgmr.msra.gmra.mrb[74].mxu1 %vm5865_vm0, %v5836_v46  ;;  %7329 = vmatprep.subr.bf16.mxu1 %v7583_v57 }
 0xb4d   : > { %7331 = vmatpush3.bf16.msra.mxu1 %v7330_v47  ;;  %7079 = vmatprep.mubr.msk.f32.mxu1 %vm7586_vm3, %v9705_v27 }
 0xc1f   : > { %v5938_v48 = vpop.f32.mrb[74].mxu1 }
 0xc20   : > { %v7074_v20 = vpop.f32.mrb[75].mxu1  ;;  %7080 = vmatmul.mubr.msk.f32.vlgmr.msra.gmra.mrb[76].mxu1 %vm5951_vm6, %v5938_v48 }
 0xcf3   : > { %v6021_v57 = vpop.f32.mrb[76].mxu1 }
 0xcf4   : > { %v6022_v14 = vadd.f32 %v6369_v56, %v6021_v57  ;;  %v7081_v49 = vpop.f32.mrb[77].mxu1 }
 0xcf6   : > { %6026 = vst.msk [vmem:[%s697_s23] sm:$0xff] %vm6025_vm1, %v6022_v14 }
 0xcf7 PF: > { %s33_s3 = sadd.s32 1, %s7577_s3  }
 0xcf8   : > { %p30_p5 = scmp.ge.s32.totalorder %s33_s3, 4  }
 0xcfa   :  { %32 = sbr.rel (!%p30_p5) target bundleno = 8 (0x8), region = 152 }

</bundles_post_ra>
